<compile_context>
chip_gen: v6e
topology: v6e:2x2x1
jax: 0.10.0
libtpu: 0.0.40
codegen_flags: <defaults>
</compile_context>

<pallas_src>
import functools

import numpy as np
import jax
import jax.numpy as jnp
from jax import lax
from jax.experimental import pallas as pl
from jax.experimental.pallas import tpu as pltpu


# ----------------------------------------------------------------------------
# Fused kernel: 3x (BN + polyphase conv(k3,s2,p1) + tanh)  +  FC head
# ----------------------------------------------------------------------------
def _encoder_kernel(x_ref, thr1_ref,
                    pool1_ref, gam1_ref, bet1_ref, wmix1_ref, bias1_ref,
                    pool2_ref, gam2_ref, bet2_ref, wmix2_ref, bias2_ref,
                    pool3_ref, gam3_ref, bet3_ref, wmix3_ref, bias3_ref,
                    w1_ref, b1_ref, w2_ref, b2_ref,
                    w31_ref, b31_ref, w33_ref, b33_ref,
                    out_ref, *, batch, tails, fracs):
    f32 = jnp.float32

    def conv_block(a, pool_ref, gam_ref, bet_ref, wmix_ref, bias_ref,
                   tail_rows, pad_frac, in_keep=None):
        # a: (Cin*P*B, Lh) rows ordered (phase-major, channel, batch), lanes = time/P.
        rows, lh = a.shape

        # --- BatchNorm1d, training-mode batch stats (two-pass, pad-corrected) ----
        rs = jnp.sum(a, axis=1, keepdims=True)                      # (rows, 1)
        mean = jnp.dot(pool_ref[...], rs, preferred_element_type=f32)
        cen = a - mean
        var = jnp.dot(pool_ref[...], jnp.sum(cen * cen, axis=1, keepdims=True),
                      preferred_element_type=f32)
        if pad_frac:
            # padded/zeroed slots contributed (0 - mean)^2 each: remove exactly.
            var = var - pad_frac * mean * mean
        scale = gam_ref[...] * lax.rsqrt(var + 1e-5)
        shift = bet_ref[...] - mean * scale
        abn = a * scale + shift
        if in_keep is not None:
            # re-zero out-of-range slots so the conv sees true zero padding
            abn = jnp.where(in_keep, abn, 0.0)

        # --- polyphase conv: one fused matmul over [phases ; shifted last phase] -
        tail = abn[rows - tail_rows:, :]                            # phase P-1 rows
        shifted = jnp.concatenate(
            [jnp.zeros((tail_rows, 1), f32), tail[:, :lh - 1]], axis=1)   # y_{P-1}[i-1]
        aug = jnp.concatenate([abn, shifted], axis=0)               # (Cin*(P+1)*B, Lh)
        out = jnp.dot(wmix_ref[...], aug, preferred_element_type=f32) + bias_ref[...]
        return jnp.tanh(out)                                        # (Cout*Q*B, Lh)

    # ---- layer 1: 8 input phases -> 4 output phases -------------------------
    a1 = conv_block(x_ref[...], pool1_ref, gam1_ref, bet1_ref, wmix1_ref, bias1_ref,
                    tails[0], fracs[0])
    lane = lax.broadcasted_iota(jnp.int32, a1.shape, 1)
    keep1 = lane < thr1_ref[...]          # per-phase valid length of the 375-long a1
    a1 = jnp.where(keep1, a1, 0.0)        # zero the one out-of-range slot (q=3, lane 93)

    # ---- layer 2: 4 -> 2 phases ---------------------------------------------
    a2 = conv_block(a1, pool2_ref, gam2_ref, bet2_ref, wmix2_ref, bias2_ref,
                    tails[1], fracs[1], in_keep=keep1)

    # ---- layer 3: 2 -> 1 phase (final length 94, no padded slots) -----------
    a3 = conv_block(a2, pool3_ref, gam3_ref, bet3_ref, wmix3_ref, bias3_ref,
                    tails[2], fracs[2])
    # a3: (16*B, 94), rows (channel-major, batch-minor) == torch x.view(B,-1) order

    # ---- fc1 as ONE (B, 1504) @ (1504, 256) matmul ---------------------------
    n_ch = a3.shape[0] // batch
    a_cat = jnp.concatenate([a3[c * batch:(c + 1) * batch, :] for c in range(n_ch)],
                            axis=1)                                 # (B, 16*94)
    h = jnp.tanh(jnp.dot(a_cat, w1_ref[...], preferred_element_type=f32)
                 + b1_ref[...])                                     # (B, 256)

    # ---- fc21|fc23 fused, then separate mu / d heads (exp only on d half) ----
    z = jnp.tanh(jnp.dot(h, w2_ref[...], preferred_element_type=f32)
                 + b2_ref[...])                                     # (B, 256) = [m | dd]
    half = w31_ref.shape[0]                                         # 128-aligned split
    mu = jnp.dot(z[:, :half], w31_ref[...], preferred_element_type=f32) + b31_ref[...]
    dv = jnp.exp(jnp.dot(z[:, half:], w33_ref[...], preferred_element_type=f32)
                 + b33_ref[...]) + 0.001
    out_ref[...] = jnp.concatenate([mu, dv], axis=1)                # (B, 2*n_latent)


# ----------------------------------------------------------------------------
# One-time parameter packing (polyphase-mix matrices, BN pooling, fused FC heads)
# ----------------------------------------------------------------------------
def prepare_kernel_params(p, batch, length=750):
    l1 = length
    l2 = (l1 - 1) // 2 + 1        # 375
    l3 = (l2 - 1) // 2 + 1        # 188
    lh = -(-l1 // 8)              # 94 lanes, shared by every layer

    def pack_layer(w, b, gamma, beta, P, l_true):
        w = np.asarray(w, np.float32)
        cout, cin, _ = w.shape
        Q = P // 2
        # single-sample mixing matrix over (output phase q, cout) x (input phase p, cin)
        # columns 0..P*cin-1 are the un-shifted phases; columns P*cin.. are the
        # right-shifted phase (P-1) rows (used only by output phase q=0, tap 0).
        m = np.zeros((Q * cout, (P + 1) * cin), np.float32)
        for q in range(Q):
            for co in range(cout):
                r = q * cout + co
                for ci in range(cin):
                    m[r, (2 * q) * cin + ci] += w[co, ci, 1]          # center tap
                    m[r, (2 * q + 1) * cin + ci] += w[co, ci, 2]      # right tap
                    if q == 0:
                        m[r, P * cin + ci] += w[co, ci, 0]            # left tap, shifted
                    else:
                        m[r, (2 * q - 1) * cin + ci] += w[co, ci, 0]  # left tap
        eye_b = np.eye(batch, dtype=np.float32)
        wmix = jnp.asarray(np.kron(m, eye_b), jnp.float32)
        bias = jnp.asarray(
            np.tile(np.repeat(np.asarray(b, np.float32), batch), Q).reshape(-1, 1),
            jnp.float32)
        gam = jnp.asarray(
            np.tile(np.repeat(np.asarray(gamma, np.float32), batch), P).reshape(-1, 1),
            jnp.float32)
        bet = jnp.asarray(
            np.tile(np.repeat(np.asarray(beta, np.float32), batch), P).reshape(-1, 1),
            jnp.float32)
        pool = np.kron(np.ones((P, P), np.float32),
                       np.kron(np.eye(cin, dtype=np.float32),
                               np.ones((batch, batch), np.float32))) / np.float32(batch * l_true)
        return (jnp.asarray(pool, jnp.float32), gam, bet, wmix, bias)

    kp = {}
    kp["l1"] = pack_layer(p["conv1_w"], p["conv1_b"], p["bn1_g"], p["bn1_b"], 8, l1)
    kp["l2"] = pack_layer(p["conv2_w"], p["conv2_b"], p["bn2_g"], p["bn2_b"], 4, l2)
    kp["l3"] = pack_layer(p["conv3_w"], p["conv3_b"], p["bn3_g"], p["bn3_b"], 2, l3)

    # per-phase valid length of the layer-1 output (length 375 spread over 4 phases)
    cout1, q1 = int(p["conv1_w"].shape[0]), 4
    valid = np.array([min(lh, (l2 - 1 - q) // q1 + 1) for q in range(q1)], np.int32)
    kp["thr1"] = jnp.asarray(np.repeat(valid, cout1 * batch).reshape(-1, 1), jnp.int32)

    kp["w1"] = jnp.asarray(p["fc1_w"], jnp.float32).T                       # (1504, 256)
    kp["b1"] = jnp.asarray(p["fc1_b"], jnp.float32).reshape(1, -1)
    kp["w2"] = jnp.concatenate([jnp.asarray(p["fc21_w"], jnp.float32).T,
                                jnp.asarray(p["fc23_w"], jnp.float32).T], axis=1)
    kp["b2"] = jnp.concatenate([p["fc21_b"], p["fc23_b"]]).astype(jnp.float32).reshape(1, -1)
    kp["w31"] = jnp.asarray(p["fc31_w"], jnp.float32).T                     # (128, nl)
    kp["b31"] = jnp.asarray(p["fc31_b"], jnp.float32).reshape(1, -1)
    kp["w33"] = jnp.asarray(p["fc33_w"], jnp.float32).T
    kp["b33"] = jnp.asarray(p["fc33_b"], jnp.float32).reshape(1, -1)
    return kp


# ----------------------------------------------------------------------------
# Forward wrapper: one pallas_call, everything VMEM-resident
# ----------------------------------------------------------------------------
@jax.jit
def conv1d_encoder_forward(x_ncl, kp):
    """x_ncl: (B, C, L) -- same layout PyTorch Conv1d expects.  Returns (mu, d)."""
    B, C, L = x_ncl.shape
    P = 8
    lh = -(-L // P)                       # 94
    l2 = (L - 1) // 2 + 1                 # 375
    l3 = (l2 - 1) // 2 + 1                # 188

    # 8-phase split of the input, rows = (phase, channel, batch), lanes = time/8
    xp = jnp.pad(x_ncl.astype(jnp.float32), ((0, 0), (0, 0), (0, P * lh - L)))
    x8 = jnp.transpose(xp.reshape(B, C, lh, P), (3, 1, 0, 2)).reshape(P * C * B, lh)

    cin2 = kp["l2"][0].shape[0] // (4 * B)
    cin3 = kp["l3"][0].shape[0] // (2 * B)
    tails = (C * B, cin2 * B, cin3 * B)                 # rows of the shifted last phase
    fracs = (float(P * lh - L) / float(L),              # padded-slot fraction per channel
             float(4 * lh - l2) / float(l2),
             float(2 * lh - l3) / float(l3))
    n_latent = kp["b31"].shape[1]

    args = [x8, kp["thr1"], *kp["l1"], *kp["l2"], *kp["l3"],
            kp["w1"], kp["b1"], kp["w2"], kp["b2"],
            kp["w31"], kp["b31"], kp["w33"], kp["b33"]]

    out = pl.pallas_call(
        functools.partial(_encoder_kernel, batch=B, tails=tails, fracs=fracs),
        out_shape=jax.ShapeDtypeStruct((B, 2 * n_latent), jnp.float32),
        in_specs=[pl.BlockSpec(memory_space=pltpu.MemorySpace.VMEM) for _ in args],
        out_specs=pl.BlockSpec(memory_space=pltpu.MemorySpace.VMEM),
        compiler_params=pltpu.CompilerParams(vmem_limit_bytes=32 * 1024 * 1024),
    )(*args)
    return out[:, :n_latent], out[:, n_latent:]


# ----------------------------------------------------------------------------
# Deterministic synthetic parameters (torch layouts / shapes from __init__)
# ----------------------------------------------------------------------------
def init_params(key, n_latent, n_channel=3):
    keys = jax.random.split(key, 20)
    nrm = lambda k, shape, s=0.1: s * jax.random.normal(k, shape, jnp.float32)
    p = {}
    p["conv1_w"] = nrm(keys[0], (4, n_channel, 3)); p["conv1_b"] = nrm(keys[1], (4,))
    p["bn1_g"] = 1.0 + nrm(keys[2], (n_channel,));  p["bn1_b"] = nrm(keys[3], (n_channel,))
    p["conv2_w"] = nrm(keys[4], (8, 4, 3));         p["conv2_b"] = nrm(keys[5], (8,))
    p["bn2_g"] = 1.0 + nrm(keys[6], (4,));          p["bn2_b"] = nrm(keys[7], (4,))
    p["conv3_w"] = nrm(keys[8], (16, 8, 3));        p["conv3_b"] = nrm(keys[9], (16,))
    p["bn3_g"] = 1.0 + nrm(keys[10], (8,));         p["bn3_b"] = nrm(keys[11], (8,))
    p["fc1_w"] = nrm(keys[12], (256, 1504), 0.02);  p["fc1_b"] = nrm(keys[13], (256,), 0.02)
    p["fc21_w"] = nrm(keys[14], (128, 256), 0.05);  p["fc21_b"] = nrm(keys[15], (128,), 0.05)
    p["fc23_w"] = nrm(keys[16], (128, 256), 0.05);  p["fc23_b"] = nrm(keys[17], (128,), 0.05)
    p["fc31_w"] = nrm(keys[18], (n_latent, 128), 0.05); p["fc31_b"] = jnp.zeros((n_latent,), jnp.float32)
    p["fc33_w"] = nrm(keys[19], (n_latent, 128), 0.05); p["fc33_b"] = jnp.zeros((n_latent,), jnp.float32)
    return p


# ----------------------------------------------------------------------------
# Pure-JAX reference (mirrors the PyTorch module, training-mode BN)
# ----------------------------------------------------------------------------
def reference_forward(x, p):
    def bn(h, gamma, beta):
        mean = jnp.mean(h, axis=(0, 2), keepdims=True)
        var = jnp.mean((h - mean) ** 2, axis=(0, 2), keepdims=True)    # biased
        return ((h - mean) / jnp.sqrt(var + 1e-5)) * gamma.reshape(1, -1, 1) \
            + beta.reshape(1, -1, 1)

    def conv(h, w, b):
        y = lax.conv_general_dilated(h, w, window_strides=(2,), padding=[(1, 1)],
                                     dimension_numbers=("NCH", "OIH", "NCH"))
        return y + b.reshape(1, -1, 1)

    h = jnp.tanh(conv(bn(x, p["bn1_g"], p["bn1_b"]), p["conv1_w"], p["conv1_b"]))
    h = jnp.tanh(conv(bn(h, p["bn2_g"], p["bn2_b"]), p["conv2_w"], p["conv2_b"]))
    h = jnp.tanh(conv(bn(h, p["bn3_g"], p["bn3_b"]), p["conv3_w"], p["conv3_b"]))
    flat = h.reshape(h.shape[0], -1)                               # (B, 1504)
    hh = jnp.tanh(flat @ p["fc1_w"].T + p["fc1_b"])
    m = jnp.tanh(hh @ p["fc21_w"].T + p["fc21_b"])
    mu = m @ p["fc31_w"].T + p["fc31_b"]
    dd = jnp.tanh(hh @ p["fc23_w"].T + p["fc23_b"])
    d = jnp.exp(dd @ p["fc33_w"].T + p["fc33_b"]) + 0.001
    return mu, d


if __name__ == "__main__":
    key = jax.random.PRNGKey(0)
    k_x, k_p = jax.random.split(key)

    # L must be 750 so that 16 * 94 == 1504 matches fc1's input size (module assumption).
    B, C, L = 2, 3, 750
    n_latent = 8

    x = jax.random.normal(k_x, (B, C, L), jnp.float32)     # NCL, as PyTorch would pass it
    params = init_params(k_p, n_latent, n_channel=C)
    kparams = prepare_kernel_params(params, batch=B, length=L)   # packed once, reused

    mu, d = conv1d_encoder_forward(x, kparams)
    jax.block_until_ready((mu, d))

    mu_ref, d_ref = reference_forward(x, params)
    assert mu.shape == (B, n_latent) and d.shape == (B, n_latent)
    assert bool(jnp.all(jnp.isfinite(mu))) and bool(jnp.all(jnp.isfinite(d)))
    assert bool(jnp.all(d > 0.0))                      # d = exp(...) + 0.001 > 0
    assert bool(jnp.allclose(mu, mu_ref, rtol=1e-3, atol=1e-3)), "mu mismatch vs reference"
    assert bool(jnp.allclose(d, d_ref, rtol=1e-3, atol=1e-3)), "d mismatch vs reference"
    print("KERNEL_OK")
</pallas_src>

<mosaic_0001>
module attributes {stable_mosaic.version = 11 : i64} {
  func.func @_encoder_kernel(%arg0: memref<48x94xf32, #tpu.memory_space<vmem>>, %arg1: memref<32x1xi32, #tpu.memory_space<vmem>>, %arg2: memref<48x48xf32, #tpu.memory_space<vmem>>, %arg3: memref<48x1xf32, #tpu.memory_space<vmem>>, %arg4: memref<48x1xf32, #tpu.memory_space<vmem>>, %arg5: memref<32x54xf32, #tpu.memory_space<vmem>>, %arg6: memref<32x1xf32, #tpu.memory_space<vmem>>, %arg7: memref<32x32xf32, #tpu.memory_space<vmem>>, %arg8: memref<32x1xf32, #tpu.memory_space<vmem>>, %arg9: memref<32x1xf32, #tpu.memory_space<vmem>>, %arg10: memref<32x40xf32, #tpu.memory_space<vmem>>, %arg11: memref<32x1xf32, #tpu.memory_space<vmem>>, %arg12: memref<32x32xf32, #tpu.memory_space<vmem>>, %arg13: memref<32x1xf32, #tpu.memory_space<vmem>>, %arg14: memref<32x1xf32, #tpu.memory_space<vmem>>, %arg15: memref<32x48xf32, #tpu.memory_space<vmem>>, %arg16: memref<32x1xf32, #tpu.memory_space<vmem>>, %arg17: memref<1504x256xf32, #tpu.memory_space<vmem>>, %arg18: memref<1x256xf32, #tpu.memory_space<vmem>>, %arg19: memref<256x256xf32, #tpu.memory_space<vmem>>, %arg20: memref<1x256xf32, #tpu.memory_space<vmem>>, %arg21: memref<128x8xf32, #tpu.memory_space<vmem>>, %arg22: memref<1x8xf32, #tpu.memory_space<vmem>>, %arg23: memref<128x8xf32, #tpu.memory_space<vmem>>, %arg24: memref<1x8xf32, #tpu.memory_space<vmem>>, %arg25: memref<2x16xf32, #tpu.memory_space<vmem>>) attributes {dimension_semantics = [], scalar_prefetch = 0 : i64, scratch_operands = 0 : i64, tpu.core_type = #tpu.core_type<tc>} {
    %c0 = arith.constant 0 : index
    %c0_0 = arith.constant 0 : index
    %0 = vector.load %arg0[%c0, %c0_0] : memref<48x94xf32, #tpu.memory_space<vmem>>, vector<48x94xf32>
    %cst = arith.constant dense<0.000000e+00> : vector<48xf32>
    %1 = vector.multi_reduction <add>, %0, %cst [1] : vector<48x94xf32> to vector<48xf32>
    %2 = vector.shape_cast %1 : vector<48xf32> to vector<48x1xf32>
    %c0_1 = arith.constant 0 : index
    %c0_2 = arith.constant 0 : index
    %3 = vector.load %arg2[%c0_1, %c0_2] : memref<48x48xf32, #tpu.memory_space<vmem>>, vector<48x48xf32>
    %cst_3 = arith.constant dense<0.000000e+00> : vector<48x1xf32>
    %4 = tpu.matmul %3, %2, %cst_3 {dimension_numbers = #tpu.dot_dimension_numbers<[1], [0], [0], [1], [0, 0, 1, 1], [], []>} : vector<48x48xf32>, vector<48x1xf32>, vector<48x1xf32> -> vector<48x1xf32>
    %5 = vector.broadcast %4 : vector<48x1xf32> to vector<48x94xf32>
    %6 = arith.subf %0, %5 : vector<48x94xf32>
    %c0_4 = arith.constant 0 : index
    %c0_5 = arith.constant 0 : index
    %7 = vector.load %arg2[%c0_4, %c0_5] : memref<48x48xf32, #tpu.memory_space<vmem>>, vector<48x48xf32>
    %8 = arith.mulf %6, %6 : vector<48x94xf32>
    %cst_6 = arith.constant dense<0.000000e+00> : vector<48xf32>
    %9 = vector.multi_reduction <add>, %8, %cst_6 [1] : vector<48x94xf32> to vector<48xf32>
    %10 = vector.shape_cast %9 : vector<48xf32> to vector<48x1xf32>
    %cst_7 = arith.constant dense<0.000000e+00> : vector<48x1xf32>
    %11 = tpu.matmul %7, %10, %cst_7 {dimension_numbers = #tpu.dot_dimension_numbers<[1], [0], [0], [1], [0, 0, 1, 1], [], []>} : vector<48x48xf32>, vector<48x1xf32>, vector<48x1xf32> -> vector<48x1xf32>
    %cst_8 = arith.constant 0.00266666664 : f32
    %12 = vector.broadcast %cst_8 : f32 to vector<48x1xf32>
    %13 = arith.mulf %12, %4 : vector<48x1xf32>
    %14 = arith.mulf %13, %4 : vector<48x1xf32>
    %15 = arith.subf %11, %14 : vector<48x1xf32>
    %c0_9 = arith.constant 0 : index
    %c0_10 = arith.constant 0 : index
    %16 = vector.load %arg3[%c0_9, %c0_10] : memref<48x1xf32, #tpu.memory_space<vmem>>, vector<48x1xf32>
    %cst_11 = arith.constant 9.99999974E-6 : f32
    %17 = vector.broadcast %cst_11 : f32 to vector<48x1xf32>
    %18 = arith.addf %15, %17 : vector<48x1xf32>
    %19 = math.rsqrt %18 : vector<48x1xf32>
    %20 = arith.mulf %16, %19 : vector<48x1xf32>
    %c0_12 = arith.constant 0 : index
    %c0_13 = arith.constant 0 : index
    %21 = vector.load %arg4[%c0_12, %c0_13] : memref<48x1xf32, #tpu.memory_space<vmem>>, vector<48x1xf32>
    %22 = arith.mulf %4, %20 : vector<48x1xf32>
    %23 = arith.subf %21, %22 : vector<48x1xf32>
    %24 = vector.broadcast %20 : vector<48x1xf32> to vector<48x94xf32>
    %25 = arith.mulf %0, %24 : vector<48x94xf32>
    %26 = vector.broadcast %23 : vector<48x1xf32> to vector<48x94xf32>
    %27 = arith.addf %25, %26 : vector<48x94xf32>
    %28 = vector.extract_strided_slice %27 {offsets = [42, 0], sizes = [6, 94], strides = [1, 1]} : vector<48x94xf32> to vector<6x94xf32>
    %cst_14 = arith.constant 0.000000e+00 : f32
    %29 = vector.broadcast %cst_14 : f32 to vector<6x1xf32>
    %30 = vector.extract_strided_slice %28 {offsets = [0, 0], sizes = [6, 93], strides = [1, 1]} : vector<6x94xf32> to vector<6x93xf32>
    %31 = tpu.concatenate %29, %30 in 1 : vector<6x1xf32>, vector<6x93xf32> -> vector<6x94xf32>
    %32 = tpu.concatenate %27, %31 in 0 : vector<48x94xf32>, vector<6x94xf32> -> vector<54x94xf32>
    %c0_15 = arith.constant 0 : index
    %c0_16 = arith.constant 0 : index
    %33 = vector.load %arg5[%c0_15, %c0_16] : memref<32x54xf32, #tpu.memory_space<vmem>>, vector<32x54xf32>
    %cst_17 = arith.constant dense<0.000000e+00> : vector<32x94xf32>
    %34 = tpu.matmul %33, %32, %cst_17 {dimension_numbers = #tpu.dot_dimension_numbers<[1], [0], [0], [1], [0, 0, 1, 1], [], []>} : vector<32x54xf32>, vector<54x94xf32>, vector<32x94xf32> -> vector<32x94xf32>
    %c0_18 = arith.constant 0 : index
    %c0_19 = arith.constant 0 : index
    %35 = vector.load %arg6[%c0_18, %c0_19] : memref<32x1xf32, #tpu.memory_space<vmem>>, vector<32x1xf32>
    %36 = vector.broadcast %35 : vector<32x1xf32> to vector<32x94xf32>
    %37 = arith.addf %34, %36 : vector<32x94xf32>
    %38 = math.tanh %37 : vector<32x94xf32>
    %39 = tpu.iota {dimensions = array<i32: 1>} : vector<32x94xi32>
    %c0_20 = arith.constant 0 : index
    %c0_21 = arith.constant 0 : index
    %40 = vector.load %arg1[%c0_20, %c0_21] : memref<32x1xi32, #tpu.memory_space<vmem>>, vector<32x1xi32>
    %41 = vector.broadcast %40 : vector<32x1xi32> to vector<32x94xi32>
    %42 = arith.cmpi slt, %39, %41 : vector<32x94xi32>
    %cst_22 = arith.constant 0.000000e+00 : f32
    %43 = vector.broadcast %cst_22 : f32 to vector<32x94xf32>
    %44 = arith.select %42, %38, %43 : vector<32x94xi1>, vector<32x94xf32>
    %cst_23 = arith.constant dense<0.000000e+00> : vector<32xf32>
    %45 = vector.multi_reduction <add>, %44, %cst_23 [1] : vector<32x94xf32> to vector<32xf32>
    %46 = vector.shape_cast %45 : vector<32xf32> to vector<32x1xf32>
    %c0_24 = arith.constant 0 : index
    %c0_25 = arith.constant 0 : index
    %47 = vector.load %arg7[%c0_24, %c0_25] : memref<32x32xf32, #tpu.memory_space<vmem>>, vector<32x32xf32>
    %cst_26 = arith.constant dense<0.000000e+00> : vector<32x1xf32>
    %48 = tpu.matmul %47, %46, %cst_26 {dimension_numbers = #tpu.dot_dimension_numbers<[1], [0], [0], [1], [0, 0, 1, 1], [], []>} : vector<32x32xf32>, vector<32x1xf32>, vector<32x1xf32> -> vector<32x1xf32>
    %49 = vector.broadcast %48 : vector<32x1xf32> to vector<32x94xf32>
    %50 = arith.subf %44, %49 : vector<32x94xf32>
    %c0_27 = arith.constant 0 : index
    %c0_28 = arith.constant 0 : index
    %51 = vector.load %arg7[%c0_27, %c0_28] : memref<32x32xf32, #tpu.memory_space<vmem>>, vector<32x32xf32>
    %52 = arith.mulf %50, %50 : vector<32x94xf32>
    %cst_29 = arith.constant dense<0.000000e+00> : vector<32xf32>
    %53 = vector.multi_reduction <add>, %52, %cst_29 [1] : vector<32x94xf32> to vector<32xf32>
    %54 = vector.shape_cast %53 : vector<32xf32> to vector<32x1xf32>
    %cst_30 = arith.constant dense<0.000000e+00> : vector<32x1xf32>
    %55 = tpu.matmul %51, %54, %cst_30 {dimension_numbers = #tpu.dot_dimension_numbers<[1], [0], [0], [1], [0, 0, 1, 1], [], []>} : vector<32x32xf32>, vector<32x1xf32>, vector<32x1xf32> -> vector<32x1xf32>
    %cst_31 = arith.constant 0.00266666664 : f32
    %56 = vector.broadcast %cst_31 : f32 to vector<32x1xf32>
    %57 = arith.mulf %56, %48 : vector<32x1xf32>
    %58 = arith.mulf %57, %48 : vector<32x1xf32>
    %59 = arith.subf %55, %58 : vector<32x1xf32>
    %c0_32 = arith.constant 0 : index
    %c0_33 = arith.constant 0 : index
    %60 = vector.load %arg8[%c0_32, %c0_33] : memref<32x1xf32, #tpu.memory_space<vmem>>, vector<32x1xf32>
    %cst_34 = arith.constant 9.99999974E-6 : f32
    %61 = vector.broadcast %cst_34 : f32 to vector<32x1xf32>
    %62 = arith.addf %59, %61 : vector<32x1xf32>
    %63 = math.rsqrt %62 : vector<32x1xf32>
    %64 = arith.mulf %60, %63 : vector<32x1xf32>
    %c0_35 = arith.constant 0 : index
    %c0_36 = arith.constant 0 : index
    %65 = vector.load %arg9[%c0_35, %c0_36] : memref<32x1xf32, #tpu.memory_space<vmem>>, vector<32x1xf32>
    %66 = arith.mulf %48, %64 : vector<32x1xf32>
    %67 = arith.subf %65, %66 : vector<32x1xf32>
    %68 = vector.broadcast %64 : vector<32x1xf32> to vector<32x94xf32>
    %69 = arith.mulf %44, %68 : vector<32x94xf32>
    %70 = vector.broadcast %67 : vector<32x1xf32> to vector<32x94xf32>
    %71 = arith.addf %69, %70 : vector<32x94xf32>
    %cst_37 = arith.constant 0.000000e+00 : f32
    %72 = vector.broadcast %cst_37 : f32 to vector<32x94xf32>
    %73 = arith.select %42, %71, %72 : vector<32x94xi1>, vector<32x94xf32>
    %74 = vector.extract_strided_slice %73 {offsets = [24, 0], sizes = [8, 94], strides = [1, 1]} : vector<32x94xf32> to vector<8x94xf32>
    %cst_38 = arith.constant 0.000000e+00 : f32
    %75 = vector.broadcast %cst_38 : f32 to vector<8x1xf32>
    %76 = vector.extract_strided_slice %74 {offsets = [0, 0], sizes = [8, 93], strides = [1, 1]} : vector<8x94xf32> to vector<8x93xf32>
    %77 = tpu.concatenate %75, %76 in 1 : vector<8x1xf32>, vector<8x93xf32> -> vector<8x94xf32>
    %78 = tpu.concatenate %73, %77 in 0 : vector<32x94xf32>, vector<8x94xf32> -> vector<40x94xf32>
    %c0_39 = arith.constant 0 : index
    %c0_40 = arith.constant 0 : index
    %79 = vector.load %arg10[%c0_39, %c0_40] : memref<32x40xf32, #tpu.memory_space<vmem>>, vector<32x40xf32>
    %cst_41 = arith.constant dense<0.000000e+00> : vector<32x94xf32>
    %80 = tpu.matmul %79, %78, %cst_41 {dimension_numbers = #tpu.dot_dimension_numbers<[1], [0], [0], [1], [0, 0, 1, 1], [], []>} : vector<32x40xf32>, vector<40x94xf32>, vector<32x94xf32> -> vector<32x94xf32>
    %c0_42 = arith.constant 0 : index
    %c0_43 = arith.constant 0 : index
    %81 = vector.load %arg11[%c0_42, %c0_43] : memref<32x1xf32, #tpu.memory_space<vmem>>, vector<32x1xf32>
    %82 = vector.broadcast %81 : vector<32x1xf32> to vector<32x94xf32>
    %83 = arith.addf %80, %82 : vector<32x94xf32>
    %84 = math.tanh %83 : vector<32x94xf32>
    %cst_44 = arith.constant dense<0.000000e+00> : vector<32xf32>
    %85 = vector.multi_reduction <add>, %84, %cst_44 [1] : vector<32x94xf32> to vector<32xf32>
    %86 = vector.shape_cast %85 : vector<32xf32> to vector<32x1xf32>
    %c0_45 = arith.constant 0 : index
    %c0_46 = arith.constant 0 : index
    %87 = vector.load %arg12[%c0_45, %c0_46] : memref<32x32xf32, #tpu.memory_space<vmem>>, vector<32x32xf32>
    %cst_47 = arith.constant dense<0.000000e+00> : vector<32x1xf32>
    %88 = tpu.matmul %87, %86, %cst_47 {dimension_numbers = #tpu.dot_dimension_numbers<[1], [0], [0], [1], [0, 0, 1, 1], [], []>} : vector<32x32xf32>, vector<32x1xf32>, vector<32x1xf32> -> vector<32x1xf32>
    %89 = vector.broadcast %88 : vector<32x1xf32> to vector<32x94xf32>
    %90 = arith.subf %84, %89 : vector<32x94xf32>
    %c0_48 = arith.constant 0 : index
    %c0_49 = arith.constant 0 : index
    %91 = vector.load %arg12[%c0_48, %c0_49] : memref<32x32xf32, #tpu.memory_space<vmem>>, vector<32x32xf32>
    %92 = arith.mulf %90, %90 : vector<32x94xf32>
    %cst_50 = arith.constant dense<0.000000e+00> : vector<32xf32>
    %93 = vector.multi_reduction <add>, %92, %cst_50 [1] : vector<32x94xf32> to vector<32xf32>
    %94 = vector.shape_cast %93 : vector<32xf32> to vector<32x1xf32>
    %cst_51 = arith.constant dense<0.000000e+00> : vector<32x1xf32>
    %95 = tpu.matmul %91, %94, %cst_51 {dimension_numbers = #tpu.dot_dimension_numbers<[1], [0], [0], [1], [0, 0, 1, 1], [], []>} : vector<32x32xf32>, vector<32x1xf32>, vector<32x1xf32> -> vector<32x1xf32>
    %c0_52 = arith.constant 0 : index
    %c0_53 = arith.constant 0 : index
    %96 = vector.load %arg13[%c0_52, %c0_53] : memref<32x1xf32, #tpu.memory_space<vmem>>, vector<32x1xf32>
    %cst_54 = arith.constant 9.99999974E-6 : f32
    %97 = vector.broadcast %cst_54 : f32 to vector<32x1xf32>
    %98 = arith.addf %95, %97 : vector<32x1xf32>
    %99 = math.rsqrt %98 : vector<32x1xf32>
    %100 = arith.mulf %96, %99 : vector<32x1xf32>
    %c0_55 = arith.constant 0 : index
    %c0_56 = arith.constant 0 : index
    %101 = vector.load %arg14[%c0_55, %c0_56] : memref<32x1xf32, #tpu.memory_space<vmem>>, vector<32x1xf32>
    %102 = arith.mulf %88, %100 : vector<32x1xf32>
    %103 = arith.subf %101, %102 : vector<32x1xf32>
    %104 = vector.broadcast %100 : vector<32x1xf32> to vector<32x94xf32>
    %105 = arith.mulf %84, %104 : vector<32x94xf32>
    %106 = vector.broadcast %103 : vector<32x1xf32> to vector<32x94xf32>
    %107 = arith.addf %105, %106 : vector<32x94xf32>
    %108 = vector.extract_strided_slice %107 {offsets = [16, 0], sizes = [16, 94], strides = [1, 1]} : vector<32x94xf32> to vector<16x94xf32>
    %cst_57 = arith.constant 0.000000e+00 : f32
    %109 = vector.broadcast %cst_57 : f32 to vector<16x1xf32>
    %110 = vector.extract_strided_slice %108 {offsets = [0, 0], sizes = [16, 93], strides = [1, 1]} : vector<16x94xf32> to vector<16x93xf32>
    %111 = tpu.concatenate %109, %110 in 1 : vector<16x1xf32>, vector<16x93xf32> -> vector<16x94xf32>
    %112 = tpu.concatenate %107, %111 in 0 : vector<32x94xf32>, vector<16x94xf32> -> vector<48x94xf32>
    %c0_58 = arith.constant 0 : index
    %c0_59 = arith.constant 0 : index
    %113 = vector.load %arg15[%c0_58, %c0_59] : memref<32x48xf32, #tpu.memory_space<vmem>>, vector<32x48xf32>
    %cst_60 = arith.constant dense<0.000000e+00> : vector<32x94xf32>
    %114 = tpu.matmul %113, %112, %cst_60 {dimension_numbers = #tpu.dot_dimension_numbers<[1], [0], [0], [1], [0, 0, 1, 1], [], []>} : vector<32x48xf32>, vector<48x94xf32>, vector<32x94xf32> -> vector<32x94xf32>
    %c0_61 = arith.constant 0 : index
    %c0_62 = arith.constant 0 : index
    %115 = vector.load %arg16[%c0_61, %c0_62] : memref<32x1xf32, #tpu.memory_space<vmem>>, vector<32x1xf32>
    %116 = vector.broadcast %115 : vector<32x1xf32> to vector<32x94xf32>
    %117 = arith.addf %114, %116 : vector<32x94xf32>
    %118 = math.tanh %117 : vector<32x94xf32>
    %119 = vector.extract_strided_slice %118 {offsets = [0, 0], sizes = [2, 94], strides = [1, 1]} : vector<32x94xf32> to vector<2x94xf32>
    %120 = vector.extract_strided_slice %118 {offsets = [2, 0], sizes = [2, 94], strides = [1, 1]} : vector<32x94xf32> to vector<2x94xf32>
    %121 = vector.extract_strided_slice %118 {offsets = [4, 0], sizes = [2, 94], strides = [1, 1]} : vector<32x94xf32> to vector<2x94xf32>
    %122 = vector.extract_strided_slice %118 {offsets = [6, 0], sizes = [2, 94], strides = [1, 1]} : vector<32x94xf32> to vector<2x94xf32>
    %123 = vector.extract_strided_slice %118 {offsets = [8, 0], sizes = [2, 94], strides = [1, 1]} : vector<32x94xf32> to vector<2x94xf32>
    %124 = vector.extract_strided_slice %118 {offsets = [10, 0], sizes = [2, 94], strides = [1, 1]} : vector<32x94xf32> to vector<2x94xf32>
    %125 = vector.extract_strided_slice %118 {offsets = [12, 0], sizes = [2, 94], strides = [1, 1]} : vector<32x94xf32> to vector<2x94xf32>
    %126 = vector.extract_strided_slice %118 {offsets = [14, 0], sizes = [2, 94], strides = [1, 1]} : vector<32x94xf32> to vector<2x94xf32>
    %127 = vector.extract_strided_slice %118 {offsets = [16, 0], sizes = [2, 94], strides = [1, 1]} : vector<32x94xf32> to vector<2x94xf32>
    %128 = vector.extract_strided_slice %118 {offsets = [18, 0], sizes = [2, 94], strides = [1, 1]} : vector<32x94xf32> to vector<2x94xf32>
    %129 = vector.extract_strided_slice %118 {offsets = [20, 0], sizes = [2, 94], strides = [1, 1]} : vector<32x94xf32> to vector<2x94xf32>
    %130 = vector.extract_strided_slice %118 {offsets = [22, 0], sizes = [2, 94], strides = [1, 1]} : vector<32x94xf32> to vector<2x94xf32>
    %131 = vector.extract_strided_slice %118 {offsets = [24, 0], sizes = [2, 94], strides = [1, 1]} : vector<32x94xf32> to vector<2x94xf32>
    %132 = vector.extract_strided_slice %118 {offsets = [26, 0], sizes = [2, 94], strides = [1, 1]} : vector<32x94xf32> to vector<2x94xf32>
    %133 = vector.extract_strided_slice %118 {offsets = [28, 0], sizes = [2, 94], strides = [1, 1]} : vector<32x94xf32> to vector<2x94xf32>
    %134 = vector.extract_strided_slice %118 {offsets = [30, 0], sizes = [2, 94], strides = [1, 1]} : vector<32x94xf32> to vector<2x94xf32>
    %135 = tpu.concatenate %119, %120, %121, %122, %123, %124, %125, %126, %127, %128, %129, %130, %131, %132, %133, %134 in 1 : vector<2x94xf32>, vector<2x94xf32>, vector<2x94xf32>, vector<2x94xf32>, vector<2x94xf32>, vector<2x94xf32>, vector<2x94xf32>, vector<2x94xf32>, vector<2x94xf32>, vector<2x94xf32>, vector<2x94xf32>, vector<2x94xf32>, vector<2x94xf32>, vector<2x94xf32>, vector<2x94xf32>, vector<2x94xf32> -> vector<2x1504xf32>
    %c0_63 = arith.constant 0 : index
    %c0_64 = arith.constant 0 : index
    %136 = vector.load %arg17[%c0_63, %c0_64] : memref<1504x256xf32, #tpu.memory_space<vmem>>, vector<1504x256xf32>
    %cst_65 = arith.constant dense<0.000000e+00> : vector<2x256xf32>
    %137 = tpu.matmul %135, %136, %cst_65 {dimension_numbers = #tpu.dot_dimension_numbers<[1], [0], [0], [1], [0, 0, 1, 1], [], []>} : vector<2x1504xf32>, vector<1504x256xf32>, vector<2x256xf32> -> vector<2x256xf32>
    %c0_66 = arith.constant 0 : index
    %c0_67 = arith.constant 0 : index
    %138 = vector.load %arg18[%c0_66, %c0_67] : memref<1x256xf32, #tpu.memory_space<vmem>>, vector<1x256xf32>
    %139 = vector.broadcast %138 : vector<1x256xf32> to vector<2x256xf32>
    %140 = arith.addf %137, %139 : vector<2x256xf32>
    %141 = math.tanh %140 : vector<2x256xf32>
    %c0_68 = arith.constant 0 : index
    %c0_69 = arith.constant 0 : index
    %142 = vector.load %arg19[%c0_68, %c0_69] : memref<256x256xf32, #tpu.memory_space<vmem>>, vector<256x256xf32>
    %cst_70 = arith.constant dense<0.000000e+00> : vector<2x256xf32>
    %143 = tpu.matmul %141, %142, %cst_70 {dimension_numbers = #tpu.dot_dimension_numbers<[1], [0], [0], [1], [0, 0, 1, 1], [], []>} : vector<2x256xf32>, vector<256x256xf32>, vector<2x256xf32> -> vector<2x256xf32>
    %c0_71 = arith.constant 0 : index
    %c0_72 = arith.constant 0 : index
    %144 = vector.load %arg20[%c0_71, %c0_72] : memref<1x256xf32, #tpu.memory_space<vmem>>, vector<1x256xf32>
    %145 = vector.broadcast %144 : vector<1x256xf32> to vector<2x256xf32>
    %146 = arith.addf %143, %145 : vector<2x256xf32>
    %147 = math.tanh %146 : vector<2x256xf32>
    %148 = vector.extract_strided_slice %147 {offsets = [0, 0], sizes = [2, 128], strides = [1, 1]} : vector<2x256xf32> to vector<2x128xf32>
    %c0_73 = arith.constant 0 : index
    %c0_74 = arith.constant 0 : index
    %149 = vector.load %arg21[%c0_73, %c0_74] : memref<128x8xf32, #tpu.memory_space<vmem>>, vector<128x8xf32>
    %cst_75 = arith.constant dense<0.000000e+00> : vector<2x8xf32>
    %150 = tpu.matmul %148, %149, %cst_75 {dimension_numbers = #tpu.dot_dimension_numbers<[1], [0], [0], [1], [0, 0, 1, 1], [], []>} : vector<2x128xf32>, vector<128x8xf32>, vector<2x8xf32> -> vector<2x8xf32>
    %c0_76 = arith.constant 0 : index
    %c0_77 = arith.constant 0 : index
    %151 = vector.load %arg22[%c0_76, %c0_77] : memref<1x8xf32, #tpu.memory_space<vmem>>, vector<1x8xf32>
    %152 = vector.broadcast %151 : vector<1x8xf32> to vector<2x8xf32>
    %153 = arith.addf %150, %152 : vector<2x8xf32>
    %154 = vector.extract_strided_slice %147 {offsets = [0, 128], sizes = [2, 128], strides = [1, 1]} : vector<2x256xf32> to vector<2x128xf32>
    %c0_78 = arith.constant 0 : index
    %c0_79 = arith.constant 0 : index
    %155 = vector.load %arg23[%c0_78, %c0_79] : memref<128x8xf32, #tpu.memory_space<vmem>>, vector<128x8xf32>
    %cst_80 = arith.constant dense<0.000000e+00> : vector<2x8xf32>
    %156 = tpu.matmul %154, %155, %cst_80 {dimension_numbers = #tpu.dot_dimension_numbers<[1], [0], [0], [1], [0, 0, 1, 1], [], []>} : vector<2x128xf32>, vector<128x8xf32>, vector<2x8xf32> -> vector<2x8xf32>
    %c0_81 = arith.constant 0 : index
    %c0_82 = arith.constant 0 : index
    %157 = vector.load %arg24[%c0_81, %c0_82] : memref<1x8xf32, #tpu.memory_space<vmem>>, vector<1x8xf32>
    %158 = vector.broadcast %157 : vector<1x8xf32> to vector<2x8xf32>
    %159 = arith.addf %156, %158 : vector<2x8xf32>
    %160 = math.exp %159 : vector<2x8xf32>
    %cst_83 = arith.constant 1.000000e-03 : f32
    %161 = vector.broadcast %cst_83 : f32 to vector<2x8xf32>
    %162 = arith.addf %160, %161 : vector<2x8xf32>
    %163 = tpu.concatenate %153, %162 in 1 : vector<2x8xf32>, vector<2x8xf32> -> vector<2x16xf32>
    %c0_84 = arith.constant 0 : index
    %c0_85 = arith.constant 0 : index
    %164 = vector.load %arg25[%c0_84, %c0_85] : memref<2x16xf32, #tpu.memory_space<vmem>>, vector<2x16xf32>
    tpu.vector_store %arg25[%c0_84, %c0_85], %163 {strides = array<i32>} : memref<2x16xf32, #tpu.memory_space<vmem>>, vector<2x16xf32>,
    return
  }
}

</mosaic_0001>

<bundles_post_ra>
// kernel: conv1d_encoder_forward.1
= control target key start
LH: loop header
LB: loop body
LE: loop exit
PB: predicated region body
PF: predicated region fallthrough
CT: control target
= control target key end

     0   :  { %s4625_s0 = inlined_call_operand.vmem [shape: f32[48,94], index: 0, kind: input, shape index: {}]   ;;  %s4626_s1 = inlined_call_operand.vmem [shape: s32[32,1], index: 1, kind: input, shape index: {}]   ;;  %s4627_s2 = inlined_call_operand.hbm [shape: f32[48,48], index: 2, kind: input, shape index: {}]   ;;  %s4628_s3 = inlined_call_operand.vmem [shape: f32[48,1], index: 3, kind: input, shape index: {}]   ;;  %s4629_s4 = inlined_call_operand.vmem [shape: f32[48,1], index: 4, kind: input, shape index: {}]   ;;  %s4630_s5 = inlined_call_operand.hbm [shape: f32[32,54], index: 5, kind: input, shape index: {}]   ;;  %s4631_s6 = inlined_call_operand.vmem [shape: f32[32,1], index: 6, kind: input, shape index: {}]   ;;  %s4632_s7 = inlined_call_operand.hbm [shape: f32[32,32], index: 7, kind: input, shape index: {}]   ;;  %s4633_s8 = inlined_call_operand.vmem [shape: f32[32,1], index: 8, kind: input, shape index: {}]   ;;  %s4634_s9 = inlined_call_operand.vmem [shape: f32[32,1], index: 9, kind: input, shape index: {}]   ;;  %s4635_s10 = inlined_call_operand.hbm [shape: f32[32,40], index: 10, kind: input, shape index: {}]   ;;  %s4636_s11 = inlined_call_operand.vmem [shape: f32[32,1], index: 11, kind: input, shape index: {}]   ;;  %s4637_s12 = inlined_call_operand.hbm [shape: f32[32,32], index: 12, kind: input, shape index: {}]   ;;  %s4638_s13 = inlined_call_operand.vmem [shape: f32[32,1], index: 13, kind: input, shape index: {}]   ;;  %s4639_s14 = inlined_call_operand.vmem [shape: f32[32,1], index: 14, kind: input, shape index: {}]   ;;  %s4640_s15 = inlined_call_operand.hbm [shape: f32[32,48], index: 15, kind: input, shape index: {}]   ;;  %s4641_s16 = inlined_call_operand.vmem [shape: f32[32,1], index: 16, kind: input, shape index: {}]   ;;  %s4642_s17 = inlined_call_operand.hbm [shape: f32[1504,256], index: 17, kind: input, shape index: {}]   ;;  %s4643_s18 = inlined_call_operand.hbm [shape: f32[1,256], index: 18, kind: input, shape index: {}]   ;;  %s4644_s19 = inlined_call_operand.hbm [shape: f32[256,256], index: 19, kind: input, shape index: {}]   ;;  %s4645_s20 = inlined_call_operand.hbm [shape: f32[1,256], index: 20, kind: input, shape index: {}]   ;;  %s4646_s21 = inlined_call_operand.vmem [shape: f32[128,8], index: 21, kind: input, shape index: {}]   ;;  %s4647_s22 = inlined_call_operand.hbm [shape: f32[1,8], index: 22, kind: input, shape index: {}]   ;;  %s4648_s23 = inlined_call_operand.vmem [shape: f32[128,8], index: 23, kind: input, shape index: {}]   ;;  %s4649_s24 = inlined_call_operand.hbm [shape: f32[1,8], index: 24, kind: input, shape index: {}]   ;;  %s4650_s25 = inlined_call_operand.vmem [shape: f32[2,16], index: 25, kind: output, shape index: {}]  }
   0x1   :  { %4658 = sst [smem:[#allocation28_spill]] %s4625_s0 }
   0x2   :  { %4659 = sst [smem:[#allocation29_spill]] %s4626_s1 }
   0x3   :  { %4660 = sst [smem:[#allocation30_spill]] %s4627_s2 }
   0x4   :  { %4661 = sst [smem:[#allocation31_spill]] %s4628_s3 }
   0x5   :  { %4662 = sst [smem:[#allocation32_spill]] %s4629_s4 }
   0x6   :  { %4663 = sst [smem:[#allocation33_spill]] %s4630_s5 }
   0x7   :  { %4664 = sst [smem:[#allocation34_spill]] %s4631_s6 }
   0x8   :  { %4665 = sst [smem:[#allocation35_spill]] %s4632_s7 }
   0x9   :  { %4666 = sst [smem:[#allocation36_spill]] %s4633_s8 }
   0xa   :  { %4667 = sst [smem:[#allocation37_spill]] %s4634_s9 }
   0xb   :  { %30 = vsyncpa [#allocation3], 0 }
   0xc   :  { %31 = vsyncpa [#allocation5], 0 }
   0xd   :  { %32 = vsyncpa [#allocation8], 0 }
   0xe   :  { %33 = vsyncpa [#allocation11], 0 }
   0xf   :  { %34 = vsyncpa [#allocation14], 0 }
  0x10   :  { %35 = vsyncpa [#allocation17], 0 }
  0x11   :  { %36 = vsyncpa [#allocation20], 0  ;;  %s3765_s29 = smov [#allocation4]   ;;  %s3766_s6 = smov [#allocation7]  }
  0x12   :  { %s62_s2 = sshll.u32 %s3765_s29, 4  ;;  %s92_s30 = sshll.u32 %s3766_s6, 4  ;;  %s63_s2 = int_to_ptr.vmem [resolvable:$true] %s62_s2  ;;  %s93_s30 = int_to_ptr.vmem [resolvable:$true] %s92_s30 }
  0x13   :  { %s3519_s7 = scalar_lea.vmem %s63_s2, 512  ;;  %p3524_p1 = scmp.lt.s32.totalorder %s63_s2, %s63_s2 }
  0x14   :  { %p3520_p0 = scmp.ne.s32.totalorder %s63_s2, %s3519_s7  ;;  %p3525_p2 = scmp.lt.s32.totalorder %s3519_s7, %s3519_s7 }
  0x16   :  { %p3526_p3 = por %p3525_p2, %p3524_p1 }
  0x18   :  { %p3527_p4 = pnand %p3526_p3, %p3520_p0 }
  0x1a   :  { %3530 = shalt.err (!%p3527_p4)
}
  0x1b   :  { %s3767_s3 = smov 128   ;;  %s3768_s26 = smov 8  }
  0x1c   :  { %s4668_s27 = sld [smem:[#allocation33_spill]]  ;;  %s3539_s4 = scalar_lea.vmem %s93_s30, 512 }
  0x1d   :  { %p3540_p5 = scmp.ne.s32.totalorder %s93_s30, %s3539_s4  ;;  %p3544_p6 = scmp.lt.s32.totalorder %s93_s30, %s93_s30 }
  0x1e   :  { %p3545_p7 = scmp.lt.s32.totalorder %s3539_s4, %s3539_s4 }
  0x20   :  { %p3546_p8 = por %p3545_p7, %p3544_p6 }
  0x22   :  { %68 = dma.hbm_to_vmem [thread:$0]  %s4668_s27, 512, %s63_s2, [#allocation5], %s3767_s3, %s3767_s3, %s3768_s26  }
  0x23   :  { %p3547_p9 = pnand %p3546_p8, %p3540_p5 }
  0x25   :  { %3550 = shalt.err (!%p3547_p9)
}
  0x26   :  { %98 = dma.hbm_to_vmem [thread:$0]  %s4635_s10, 512, %s93_s30, [#allocation8], %s3767_s3, %s3767_s3, %s3768_s26  }
  0x27   :  { %s3769_s5 = smov [#allocation10]   ;;  %s3770_s29 = smov [#allocation13]  }
  0x28   :  { %s122_s0 = sshll.u32 %s3769_s5, 4  ;;  %s149_s6 = sshll.u32 %s3770_s29, 4  ;;  %s123_s0 = int_to_ptr.vmem [resolvable:$true] %s122_s0  ;;  %s150_s6 = int_to_ptr.vmem [resolvable:$true] %s149_s6 }
  0x29   :  { %s3559_s2 = scalar_lea.vmem %s123_s0, 512  ;;  %p3564_p11 = scmp.lt.s32.totalorder %s123_s0, %s123_s0 }
  0x2a   :  { %p3560_p10 = scmp.ne.s32.totalorder %s123_s0, %s3559_s2  ;;  %p3565_p12 = scmp.lt.s32.totalorder %s3559_s2, %s3559_s2 }
  0x2c   :  { %p3566_p13 = por %p3565_p12, %p3564_p11 }
  0x2e   :  { %p3567_p0 = pnand %p3566_p13, %p3560_p10 }
  0x30   :  { %3570 = shalt.err (!%p3567_p0)
}
  0x31   :  { %128 = dma.hbm_to_vmem [thread:$0]  %s4640_s15, 512, %s123_s0, [#allocation11], %s3767_s3, %s3767_s3, %s3768_s26  }
  0x32   :  { %s3579_s10 = scalar_lea.vmem %s150_s6, 32  ;;  %p3584_p2 = scmp.lt.s32.totalorder %s150_s6, %s150_s6 }
  0x33   :  { %p3580_p1 = scmp.ne.s32.totalorder %s150_s6, %s3579_s10  ;;  %p3585_p3 = scmp.lt.s32.totalorder %s3579_s10, %s3579_s10 }
  0x35   :  { %p3586_p4 = por %p3585_p3, %p3584_p2 }
  0x37   :  { %p3587_p5 = pnand %p3586_p4, %p3580_p1 }
  0x39   :  { %3590 = shalt.err (!%p3587_p5)
}
  0x3a   :  { %152 = dma.hbm_to_vmem [thread:$0]  %s4643_s18, 32, %s150_s6, [#allocation14]  }
  0x3b   :  { %s3771_s27 = smov [#allocation16]   ;;  %s3772_s28 = smov [#allocation2]  }
  0x3c   :  { %s171_s4 = sshll.u32 %s3771_s27, 4  ;;  %s46_s9 = sshll.u32 %s3772_s28, 4  ;;  %s172_s4 = int_to_ptr.vmem [resolvable:$true] %s171_s4  ;;  %s47_s9 = int_to_ptr.vmem [resolvable:$true] %s46_s9 }
  0x3d   :  { %s3599_s5 = scalar_lea.vmem %s172_s4, 32  ;;  %p3604_p7 = scmp.lt.s32.totalorder %s172_s4, %s172_s4 }
  0x3e   :  { %p3600_p6 = scmp.ne.s32.totalorder %s172_s4, %s3599_s5  ;;  %p3605_p8 = scmp.lt.s32.totalorder %s3599_s5, %s3599_s5 }
  0x40   :  { %p3606_p9 = por %p3605_p8, %p3604_p7 }
  0x42   :  { %p3607_p10 = pnand %p3606_p9, %p3600_p6 }
  0x44   :  { %3610 = shalt.err (!%p3607_p10)
}
  0x45   :  { %174 = dma.hbm_to_vmem [thread:$0]  %s4645_s20, 32, %s172_s4, [#allocation17]  }
  0x46   :  { %s3619_s29 = scalar_lea.vmem %s47_s9, 768  ;;  %p3624_p12 = scmp.lt.s32.totalorder %s47_s9, %s47_s9 }
  0x47   :  { %p3620_p11 = scmp.ne.s32.totalorder %s47_s9, %s3619_s29  ;;  %p3625_p13 = scmp.lt.s32.totalorder %s3619_s29, %s3619_s29 }
  0x49   :  { %p3626_p0 = por %p3625_p13, %p3624_p12 }
  0x4b   :  { %p3627_p1 = pnand %p3626_p0, %p3620_p11 }
  0x4d   :  { %3630 = shalt.err (!%p3627_p1)
}
  0x4e   :  { %s4669_s2 = sld [smem:[#allocation30_spill]]  ;;  %s3773_s7 = smov [#allocation6]  }
  0x4f   :  { %s76_s1 = sshll.u32 %s3773_s7, 4  ;;  %s3774_s10 = smov [#allocation9]   ;;  %s77_s1 = int_to_ptr.vmem [resolvable:$true] %s76_s1 }
  0x50   :  { %s106_s30 = sshll.u32 %s3774_s10, 4  ;;  %s3639_s20 = scalar_lea.vmem %s77_s1, 512  ;;  %s107_s30 = int_to_ptr.vmem [resolvable:$true] %s106_s30 }
  0x51   :  { %p3640_p2 = scmp.ne.s32.totalorder %s77_s1, %s3639_s20  ;;  %p3644_p3 = scmp.lt.s32.totalorder %s77_s1, %s77_s1 }
  0x52   :  { %p3645_p4 = scmp.lt.s32.totalorder %s3639_s20, %s3639_s20 }
  0x54   :  { %52 = dma.hbm_to_vmem [thread:$0]  %s4669_s2, 768, %s47_s9, [#allocation3], %s3767_s3, %s3767_s3, %s3768_s26  }
  0x55   :  { %p3646_p5 = por %p3645_p4, %p3644_p3 }
  0x57   :  { %p3647_p6 = pnand %p3646_p5, %p3640_p2 }
  0x59   :  { %3650 = shalt.err (!%p3647_p6)
}
  0x5a   :  { %s4670_s4 = sld [smem:[#allocation35_spill]]  ;;  %s3659_s28 = scalar_lea.vmem %s107_s30, 512 }
  0x5b   :  { %p3660_p7 = scmp.ne.s32.totalorder %s107_s30, %s3659_s28  ;;  %p3664_p8 = scmp.lt.s32.totalorder %s107_s30, %s107_s30 }
  0x5c   :  { %p3665_p9 = scmp.lt.s32.totalorder %s3659_s28, %s3659_s28 }
  0x5e   :  { %p3666_p10 = por %p3665_p9, %p3664_p8 }
  0x60   :  { %82 = dma.hbm_to_vmem [thread:$0]  %s4670_s4, 512, %s77_s1, [#allocation5], %s3767_s3, %s3767_s3, %s3768_s26  }
  0x61   :  { %p3667_p11 = pnand %p3666_p10, %p3660_p7 }
  0x63   :  { %3670 = shalt.err (!%p3667_p11)
}
  0x64   :  { %112 = dma.hbm_to_vmem [thread:$0]  %s4637_s12, 512, %s107_s30, [#allocation8], %s3767_s3, %s3767_s3, %s3768_s26  }
  0x65   :  { %s3775_s15 = smov [#allocation12]  }
  0x66   :  { %s136_s0 = sshll.u32 %s3775_s15, 4  ;;  %s137_s0 = int_to_ptr.vmem [resolvable:$true] %s136_s0 }
  0x67   :  { %s3679_s29 = scalar_lea.vmem %s137_s0, 48128  ;;  %p3684_p13 = scmp.lt.s32.totalorder %s137_s0, %s137_s0 }
  0x68   :  { %p3680_p12 = scmp.ne.s32.totalorder %s137_s0, %s3679_s29  ;;  %p3685_p0 = scmp.lt.s32.totalorder %s3679_s29, %s3679_s29 }
  0x6a   :  { %p3686_p1 = por %p3685_p0, %p3684_p13 }
  0x6c   :  { %p3687_p2 = pnand %p3686_p1, %p3680_p12 }
  0x6e   :  { %3690 = shalt.err (!%p3687_p2)
}
  0x6f   :  { %s3776_s18 = smov 256   ;;  %s3777_s6 = smov 16  }
  0x70   :  { %142 = dma.hbm_to_vmem [thread:$0]  %s4642_s17, 48128, %s137_s0, [#allocation11], %s3776_s18, %s3776_s18, %s3777_s6  }
  0x71   :  { %s3778_s1 = smov [#allocation15]   ;;  %s3779_s12 = smov [#allocation18]  }
  0x72   :  { %s158_s10 = sshll.u32 %s3778_s1, 4  ;;  %s183_s3 = sshll.u32 %s3779_s12, 4  ;;  %s159_s10 = int_to_ptr.vmem [resolvable:$true] %s158_s10  ;;  %s184_s3 = int_to_ptr.vmem [resolvable:$true] %s183_s3 }
  0x73   :  { %s3699_s30 = scalar_lea.vmem %s159_s10, 8192  ;;  %p3704_p4 = scmp.lt.s32.totalorder %s159_s10, %s159_s10 }
  0x74   :  { %p3700_p3 = scmp.ne.s32.totalorder %s159_s10, %s3699_s30  ;;  %p3705_p5 = scmp.lt.s32.totalorder %s3699_s30, %s3699_s30 }
  0x76   :  { %p3706_p6 = por %p3705_p5, %p3704_p4 }
  0x78   :  { %p3707_p7 = pnand %p3706_p6, %p3700_p3 }
  0x7a   :  { %3710 = shalt.err (!%p3707_p7)
}
  0x7b   :  { %164 = dma.hbm_to_vmem [thread:$0]  %s4644_s19, 8192, %s159_s10, [#allocation14], %s3776_s18, %s3776_s18, %s3777_s6  }
  0x7c   :  { %s3719_s27 = scalar_lea.vmem %s184_s3, 16  ;;  %s3723_s17 = scalar_lea.vmem %s184_s3, 32 }
  0x7d   :  { %p3720_p8 = scmp.ne.s32.totalorder %s184_s3, %s3719_s27  ;;  %p3724_p9 = scmp.lt.s32.totalorder %s184_s3, %s184_s3 }
  0x7e   :  { %p3725_p10 = scmp.lt.s32.totalorder %s3723_s17, %s3719_s27 }
  0x80   :  { %p3726_p11 = por %p3725_p10, %p3724_p9 }
  0x82   :  { %p3727_p12 = pnand %p3726_p11, %p3720_p8 }
  0x84   :  { %3730 = shalt.err (!%p3727_p12)
}
  0x85   :  { %186 = dma.hbm_to_vmem [thread:$0]  %s4647_s22, 16, %s184_s3, [#allocation17]  }
  0x86   :  { %s3780_s9 = smov [#allocation19]  }
  0x87   :  { %s195_s5 = sshll.u32 %s3780_s9, 4  ;;  %s196_s5 = int_to_ptr.vmem [resolvable:$true] %s195_s5 }
  0x88   :  { %s3739_s15 = scalar_lea.vmem %s196_s5, 16  ;;  %s3743_s0 = scalar_lea.vmem %s196_s5, 32 }
  0x89   :  { %p3740_p13 = scmp.ne.s32.totalorder %s196_s5, %s3739_s15  ;;  %p3744_p0 = scmp.lt.s32.totalorder %s196_s5, %s196_s5 }
  0x8a   :  { %p3745_p1 = scmp.lt.s32.totalorder %s3743_s0, %s3739_s15 }
  0x8c   :  { %p3746_p2 = por %p3745_p1, %p3744_p0 }
  0x8e   :  { %p3747_p3 = pnand %p3746_p2, %p3740_p13 }
  0x90   :  { %3750 = shalt.err (!%p3747_p3)
}
  0x91   :  { %198 = dma.hbm_to_vmem [thread:$0]  %s4649_s24, 16, %s196_s5, [#allocation20]  }
  0x92   :  { %3751 = dma.done.wait [#allocation3], 768  }
  0x93   :  { %3752 = vsyncadd [#allocation3], 4294966528 }
  0x94   :  { %3753 = dma.done.wait [#allocation5], 1024  }
  0x95   :  { %3754 = vsyncadd [#allocation5], 4294966272 }
  0x96   :  { %3755 = dma.done.wait [#allocation8], 1024  }
  0x97   :  { %3756 = vsyncadd [#allocation8], 4294966272 }
  0x98   :  { %3757 = dma.done.wait [#allocation11], 48640  }
  0x99   :  { %3758 = vsyncadd [#allocation11], 4294918656 }
  0x9a   :  { %3759 = dma.done.wait [#allocation14], 8224  }
  0x9b   :  { %3760 = vsyncadd [#allocation14], 4294959072 }
  0x9c   :  { %3761 = dma.done.wait [#allocation17], 48  }
  0x9d   :  { %3762 = vsyncadd [#allocation17], 4294967248 }
  0x9e   :  { %3763 = dma.done.wait [#allocation20], 16  }
  0x9f   :  { %3764 = vsyncadd [#allocation20], 4294967280  ;;  %vm241_vm0 = vcmask 769024   ;;  %s4671_s6 = sld [smem:[#allocation28_spill]]  ;;  %v260_v12 = vld [vmem:[#allocation2] sm:$0xff]  ;;  %vm266_vm1 = vcmask 392192  }
  0xa0   :  { %3202 = vmatprep.mubr.msk.f32.mxu0 %vm266_vm1, %v260_v12  ;;  %3223 = vmatprep.mubr.msk.f32.mxu1 %vm266_vm1, %v260_v12  ;;  %v4028_v19 = vld [vmem:[#allocation2 + $0x8] sm:$0xff]  ;;  %v4030_v20 = vld [vmem:[#allocation2 + $0x10] sm:$0xff]  ;;  %v4036_v21 = vld [vmem:[#allocation2 + $0x18] sm:$0xff]  ;;  %v3781_v24 = vmov 0   ;;  %s4672_s4 = sld [smem:[#allocation31_spill]]  ;;  %s3782_s2 = smov 1  }
  0xa1   :  { %v4038_v22 = vld [vmem:[#allocation2 + $0x20] sm:$0xff]  ;;  %v4044_v23 = vld [vmem:[#allocation2 + $0x28] sm:$0xff]  ;;  %3448 = vset.pattern.permute.xlu1 %v3781_v24  ;;  %3447 = vset.pattern.permute.xlu0 %v3781_v24  ;;  %s4673_s0 = sld [smem:[#allocation32_spill]]  ;;  %vm702_vm2 = vcmask 441344   ;;  %vm672_vm3 = vcmask 7168   ;;  %vm715_vm4 = vcmask 1045504  }
  0xa2   :  { %s4674_s9 = sld [smem:[#allocation34_spill]]  ;;  %vm850_vm9 = vcmask 261120   ;;  %vm1198_vm10 = vcmask 326656   ;;  %vm4308_vm11 = vmneg %vm672_vm3  ;;  %s3784_s27 = smov 94   ;;  %vm1811_vm12 = vcmask 490496   ;;  %vm1813_vm13 = vcmask 211968  }
  0xa3   :  { %s4675_s29 = sld [smem:[#allocation29_spill]]  ;;  %s3786_s28 = smov 120   ;;  %vm1817_vm14 = vcmask 703488   ;;  %vm1815_vm15 = vcmask 982016  }
  0xa4   :  { %s4676_s17 = sld [smem:[#allocation36_spill]]  ;;  %s3787_s5 = smov 86  }
  0xa5   :  { %v3987_v0 = vld [vmem:[%s4671_s6 + $0x28] sm:$0xff]  ;;  %v3992_v1 = vld [vmem:[%s4671_s6 + $0x20] sm:$0xff]  ;;  %v3997_v2 = vld [vmem:[%s4671_s6 + $0x18] sm:$0xff]  ;;  %s4677_s15 = sld [smem:[#allocation37_spill]]  ;;  %s3790_s19 = smov 78  }
  0xa6   :  { %v257_v3 = vsel %vm241_vm0, %v3987_v0, 0.0  ;;  %v251_v4 = vsel %vm241_vm0, %v3997_v2, 0.0  ;;  %v4006_v5 = vld [vmem:[%s4671_s6 + $0x10] sm:$0xff]  ;;  %v254_v6 = vsel %vm241_vm0, %v3992_v1, 0.0  ;;  %v4015_v8 = vld [vmem:[%s4671_s6 + $0x8] sm:$0xff]  ;;  %v4020_v9 = vld [vmem:[%s4671_s6] sm:$0xff] }
  0xa7   :  { %258 = vadd.xlane.f32.xlu0 %v257_v3  ;;  %252 = vadd.xlane.f32.xlu1 %v251_v4  ;;  %v248_v7 = vsel %vm241_vm0, %v4006_v5, 0.0  ;;  %v245_v10 = vsel %vm241_vm0, %v4015_v8, 0.0  ;;  %v242_v11 = vsel %vm241_vm0, %v4020_v9, 0.0  ;;  %s3793_s22 = smov 104   ;;  %s3794_s18 = smov 70  }
  0xa8   :  { %s3795_s6 = smov 36   ;;  %s3796_s24 = smov 10  }
  0xa9   :  { %s3797_s7 = smov 2  }
  0xab   :  { %255 = vadd.xlane.f32.xlu0 %v254_v6  ;;  %249 = vadd.xlane.f32.xlu1 %v248_v7 }
  0xaf   :  { %246 = vadd.xlane.f32.xlu0 %v245_v10  ;;  %243 = vadd.xlane.f32.xlu1 %v242_v11 }
 0x130   :  { %v259_v13 = vpop.xlane.xlu0 %258  ;;  %v253_v14 = vpop.xlane.xlu1 %252 }
 0x131   :  { %3190 = vmatprep.subr.mxu0 %v259_v13 }
 0x132   :  { %3191 = vmatpush3.msra.mxu0 %v259_v13 }
 0x134   :  { %v256_v15 = vpop.xlane.xlu0 %255  ;;  %v250_v16 = vpop.xlane.xlu1 %249 }
 0x135   :  { %3192 = vmatprep.subr.mxu0 %v256_v15 }
 0x136   :  { %3193 = vmatpush3.msra.mxu0 %v256_v15 }
 0x137   :  { %3194 = vmatprep.subr.mxu0 %v253_v14 }
 0x138   :  { %3195 = vmatpush3.msra.mxu0 %v253_v14  ;;  %v247_v17 = vpop.xlane.xlu0 %246  ;;  %v244_v18 = vpop.xlane.xlu1 %243 }
 0x139   :  { %3196 = vmatprep.subr.mxu0 %v250_v16 }
 0x13a   :  { %3197 = vmatpush3.msra.mxu0 %v250_v16 }
 0x13b   :  { %3198 = vmatprep.subr.mxu0 %v247_v17 }
 0x13c   :  { %3199 = vmatpush3.msra.mxu0 %v247_v17 }
 0x13d   :  { %3200 = vmatprep.subr.mxu0 %v244_v18 }
 0x13e   :  { %3201 = vmatpush3.msra.mxu0 %v244_v18 }
 0x13f   :  { %3203 = vmatmul.mubr.msk.f32.vlgmr.msra.gmra.mxu0 %vm266_vm1, %v4028_v19 }
 0x140   :  { %3205 = vmatprep.mubr.msk.f32.mxu0 %vm266_vm1, %v4030_v20 }
 0x143   :  { %3206 = vmatmul.mubr.msk.f32.gmra.mxu0 %vm266_vm1, %v4036_v21 }
 0x144   :  { %3208 = vmatprep.mubr.msk.f32.mxu0 %vm266_vm1, %v4038_v22 }
 0x147   :  { %3209 = vmatmul.mubr.msk.f32.gmra.mxu0 %vm266_vm1, %v4044_v23 }
 0x1ff   :  { %v4048_v25 = vpop.f32.mrf.mxu0 }
 0x200   :  { %v536_v24 = vmul.f32 0.0026666666, %v4048_v25 }
 0x201   :  { %v4050_v26 = vpop.f32.mrf.mxu0 }
 0x203   :  { %v4052_v27 = vpop.f32.mrf.mxu0 }
 0x204   :  { %397 = vperm.xlu1 %3448, %v4052_v27   ;;  %v538_v62 = vmul.f32 0.0026666666, %v4052_v27 }
 0x205   :  { %v4055_v28 = vpop.f32.mrf.mxu0 }
 0x206   :  { %v537_v63 = vmul.f32 0.0026666666, %v4055_v28  ;;  %v544_v7 = vmul.f32 %v4052_v27, %v538_v62  ;;  %v581_v62 = vld [vmem:[%s4673_s0 + $0x20] sm:$0xff] }
 0x207   :  { %v4057_v29 = vpop.f32.mrf.mxu0 }
 0x208   :  { %392 = vperm.xlu1 %3448, %v4055_v28   ;;  %407 = vperm.xlu0 %3447, %v4057_v29   ;;  %v540_v4 = vmul.f32 0.0026666666, %v4057_v29  ;;  %v543_v10 = vmul.f32 %v537_v63, %v4055_v28  ;;  %v553_v63 = vld [vmem:[%s4672_s4] sm:$0xff] }
 0x209   :  { %v4061_v30 = vpop.f32.mrf.mxu0 }
 0x20a   :  { %v539_v11 = vmul.f32 0.0026666666, %v4061_v30  ;;  %v546_v15 = vmul.f32 %v4057_v29, %v540_v4 }
 0x20c   :  { %402 = vperm.xlu1 %3448, %v4061_v30   ;;  %v545_v18 = vmul.f32 %v539_v11, %v4061_v30  ;;  %v678_v11 = vld [vmem:[%s4674_s9] sm:$0xff] }
 0x210   :  { %387 = vperm.xlu1 %3448, %v4048_v25  }
 0x214   :  { %382 = vperm.xlu1 %3448, %v4050_v26  }
 0x27f   :  { %v398_v31 = vpop.permute.xlu1 %397 }
 0x280   :  { %v413_v34 = vsub.f32 %v3997_v2, %v398_v31 }
 0x282   :  { %v419_v38 = vmul.f32 %v413_v34, %v413_v34 }
 0x283   :  { %v393_v32 = vpop.permute.xlu1 %392  ;;  %v408_v33 = vpop.permute.xlu0 %407 }
 0x284   :  { %v415_v35 = vsub.f32 %v3987_v0, %v408_v33  ;;  %v412_v39 = vsub.f32 %v4006_v5, %v393_v32  ;;  %v431_v46 = vsel %vm241_vm0, %v419_v38, 0.0  ;;  %v542_v32 = vmul.f32 %v4048_v25, %v536_v24  ;;  %v558_v38 = vld [vmem:[%s4672_s4 + $0x28] sm:$0xff] }
 0x285   :  { %v535_v33 = vmul.f32 0.0026666666, %v4050_v26 }
 0x286   :  { %v421_v36 = vmul.f32 %v415_v35, %v415_v35  ;;  %v418_v44 = vmul.f32 %v412_v39, %v412_v39 }
 0x287   :  { %v403_v37 = vpop.permute.xlu1 %402  ;;  %v541_v35 = vmul.f32 %v535_v33, %v4050_v26 }
 0x288   :  { %v414_v40 = vsub.f32 %v3992_v1, %v403_v37  ;;  %v437_v41 = vsel %vm241_vm0, %v421_v36, 0.0  ;;  %v428_v51 = vsel %vm241_vm0, %v418_v44, 0.0  ;;  %v556_v44 = vld [vmem:[%s4672_s4 + $0x18] sm:$0xff] }
 0x289   :  { %438 = vadd.xlane.f32.xlu1 %v437_v41 }
 0x28a   :  { %v420_v42 = vmul.f32 %v414_v40, %v414_v40 }
 0x28b   :  { %v388_v43 = vpop.permute.xlu1 %387 }
 0x28c   :  { %v411_v45 = vsub.f32 %v4015_v8, %v388_v43  ;;  %v434_v47 = vsel %vm241_vm0, %v420_v42, 0.0 }
 0x28d   :  { %432 = vadd.xlane.f32.xlu1 %v431_v46  ;;  %435 = vadd.xlane.f32.xlu0 %v434_v47  ;;  %v555_v46 = vld [vmem:[%s4672_s4 + $0x10] sm:$0xff] }
 0x28e   :  { %v417_v48 = vmul.f32 %v411_v45, %v411_v45  ;;  %v582_v45 = vld [vmem:[%s4673_s0 + $0x28] sm:$0xff] }
 0x28f   :  { %v383_v49 = vpop.permute.xlu1 %382 }
 0x290   :  { %v410_v50 = vsub.f32 %v4020_v9, %v383_v49  ;;  %v425_v52 = vsel %vm241_vm0, %v417_v48, 0.0 }
 0x291   :  { %429 = vadd.xlane.f32.xlu1 %v428_v51  ;;  %426 = vadd.xlane.f32.xlu0 %v425_v52  ;;  %v557_v52 = vld [vmem:[%s4672_s4 + $0x20] sm:$0xff] }
 0x292   :  { %v416_v53 = vmul.f32 %v410_v50, %v410_v50 }
 0x294   :  { %v422_v54 = vsel %vm241_vm0, %v416_v53, 0.0 }
 0x295   :  { %423 = vadd.xlane.f32.xlu1 %v422_v54 }
 0x312   :  { %v439_v55 = vpop.xlane.xlu1 %438 }
 0x313   :  { %3211 = vmatprep.subr.mxu1 %v439_v55 }
 0x314   :  { %3212 = vmatpush3.msra.mxu1 %v439_v55 }
 0x316   :  { %v436_v56 = vpop.xlane.xlu0 %435  ;;  %v433_v57 = vpop.xlane.xlu1 %432 }
 0x317   :  { %3213 = vmatprep.subr.mxu1 %v436_v56 }
 0x318   :  { %3214 = vmatpush3.msra.mxu1 %v436_v56  ;;  %v580_v56 = vld [vmem:[%s4673_s0 + $0x18] sm:$0xff] }
 0x319   :  { %3215 = vmatprep.subr.mxu1 %v433_v57 }
 0x31a   :  { %3216 = vmatpush3.msra.mxu1 %v433_v57  ;;  %v430_v58 = vpop.xlane.xlu1 %429  ;;  %v427_v59 = vpop.xlane.xlu0 %426 }
 0x31b   :  { %3217 = vmatprep.subr.mxu1 %v430_v58 }
 0x31c   :  { %3218 = vmatpush3.msra.mxu1 %v430_v58 }
 0x31d   :  { %3219 = vmatprep.subr.mxu1 %v427_v59 }
 0x31e   :  { %3220 = vmatpush3.msra.mxu1 %v427_v59  ;;  %v424_v60 = vpop.xlane.xlu1 %423 }
 0x31f   :  { %3221 = vmatprep.subr.mxu1 %v424_v60 }
 0x320   :  { %3222 = vmatpush3.msra.mxu1 %v424_v60  ;;  %v554_v60 = vld [vmem:[%s4672_s4 + $0x8] sm:$0xff]  ;;  %s3788_s4 = smov 18  }
 0x321   :  { %3224 = vmatmul.mubr.msk.f32.vlgmr.msra.gmra.mxu1 %vm266_vm1, %v4028_v19 }
 0x322   :  { %3226 = vmatprep.mubr.msk.f32.mxu1 %vm266_vm1, %v4030_v20 }
 0x325   :  { %3227 = vmatmul.mubr.msk.f32.gmra.mxu1 %vm266_vm1, %v4036_v21 }
 0x326   :  { %3229 = vmatprep.mubr.msk.f32.mxu1 %vm266_vm1, %v4038_v22 }
 0x329   :  { %3230 = vmatmul.mubr.msk.f32.gmra.mxu1 %vm266_vm1, %v4044_v23 }
 0x3e1   :  { %v3225_v61 = vpop.f32.mrf.mxu1 }
 0x3e2   :  { %v548_v34 = vsub.f32 %v3225_v61, %v542_v32 }
 0x3e3   :  { %v506_v3 = vpop.f32.mrf.mxu1 }
 0x3e4   :  { %v560_v36 = vadd.f32 1e-05, %v548_v34  ;;  %v547_v37 = vsub.f32 %v506_v3, %v541_v35 }
 0x3e5   :  { %v3228_v6 = vpop.f32.mrf.mxu1 }
 0x3e6   :  { %v550_v12 = vsub.f32 %v3228_v6, %v544_v7  ;;  %v559_v41 = vadd.f32 1e-05, %v547_v37  ;;  %v577_v7 = vld [vmem:[%s4673_s0] sm:$0xff] }
 0x3e7   :  { %v516_v13 = vpop.f32.mrf.mxu1 }
 0x3e8   :  { %v549_v14 = vsub.f32 %v516_v13, %v543_v10  ;;  %v562_v19 = vadd.f32 1e-05, %v550_v12  ;;  %v680_v10 = vld [vmem:[%s4674_s9 + $0x10] sm:$0xff]  ;;  %v810_v12 = vld [vmem:[%s4675_s29] sm:$0xff] }
 0x3e9   :  { %v3231_v16 = vpop.f32.mrf.mxu1 }
 0x3ea   :  { %v552_v17 = vsub.f32 %v3231_v16, %v546_v15  ;;  %v561_v21 = vadd.f32 1e-05, %v549_v14 }
 0x3eb   :  { %v526_v20 = vpop.f32.mrf.mxu1 }
 0x3ec   :  { %v564_v22 = vadd.f32 1e-05, %v552_v17  ;;  %v551_v23 = vsub.f32 %v526_v20, %v545_v18 }
 0x3ee   :  { %3449 = vrsqrt.f32 %v564_v22  ;;  %v563_v31 = vadd.f32 1e-05, %v551_v23  ;;  %v813_v22 = vld [vmem:[%s4675_s29 + $0x18] sm:$0xff]  ;;  %v811_v23 = vld [vmem:[%s4675_s29 + $0x8] sm:$0xff] }
 0x3ef   :  { %3451 = vrsqrt.f32 %v562_v19  ;;  %v578_v19 = vld [vmem:[%s4673_s0 + $0x8] sm:$0xff] }
 0x3f0   :  { %3453 = vrsqrt.f32 %v561_v21  ;;  %v674_v21 = vld [vmem:[#allocation4] sm:$0xff] }
 0x3f1   :  { %3455 = vrsqrt.f32 %v563_v31  ;;  %3246 = vmatprep.mubr.msk.f32.mxu0 %vm702_vm2, %v674_v21 }
 0x3f2   :  { %3457 = vrsqrt.f32 %v560_v36 }
 0x3f3   :  { %3459 = vrsqrt.f32 %v559_v41 }
 0x3fb   :  { %v3450_v39 = vpop.eup %3449 }
 0x3fc   :  { %v3452_v40 = vpop.eup %3451  ;;  %v576_v42 = vmul.f32 %v3450_v39, %v558_v38 }
 0x3fd   :  { %v3454_v43 = vpop.eup %3453  ;;  %v574_v48 = vmul.f32 %v3452_v40, %v556_v44 }
 0x3fe   :  { %622 = vperm.xlu0 %3447, %v576_v42   ;;  %v588_v47 = vmul.f32 %v4057_v29, %v576_v42  ;;  %v573_v50 = vmul.f32 %v3454_v43, %v555_v46  ;;  %v3456_v51 = vpop.eup %3455  ;;  %v579_v29 = vld [vmem:[%s4673_s0 + $0x10] sm:$0xff] }
 0x3ff   :  { %v575_v53 = vmul.f32 %v3456_v51, %v557_v52  ;;  %v586_v55 = vmul.f32 %v4052_v27, %v574_v48  ;;  %v3458_v59 = vpop.eup %3457  ;;  %v677_v51 = vld [vmem:[#allocation4 + $0x18] sm:$0xff] }
 0x400   :  { %v594_v49 = vsub.f32 %v582_v45, %v588_v47  ;;  %v585_v54 = vmul.f32 %v573_v50, %v4055_v28  ;;  %v572_v27 = vmul.f32 %v3458_v59, %v554_v60  ;;  %v3460_v61 = vpop.eup %3459 }
 0x401   :  { %v592_v58 = vsub.f32 %v580_v56, %v586_v55  ;;  %v587_v28 = vmul.f32 %v575_v53, %v4061_v30  ;;  %v571_v4 = vmul.f32 %v3460_v61, %v553_v63 }
 0x402   :  { %612 = vperm.xlu0 %3447, %v574_v48   ;;  %658 = vperm.xlu1 %3448, %v594_v49   ;;  %v591_v57 = vsub.f32 %v579_v29, %v585_v54  ;;  %v584_v18 = vmul.f32 %v4048_v25, %v572_v27  ;;  %v679_v25 = vld [vmem:[%s4674_s9 + $0x8] sm:$0xff] }
 0x403   :  { %v593_v3 = vsub.f32 %v581_v62, %v587_v28  ;;  %v583_v6 = vmul.f32 %v571_v4, %v4050_v26  ;;  %v812_v26 = vld [vmem:[%s4675_s29 + $0x10] sm:$0xff]  ;;  %v808_v28 = vlaneseq  ;;  %s3791_s29 = smov 112  }
 0x404   :  { %v590_v20 = vsub.f32 %v578_v19, %v584_v18 }
 0x405   :  { %v589_v30 = vsub.f32 %v577_v7, %v583_v6  ;;  %v4183_v62 = vand.u32 127, %v808_v28 }
 0x406   :  { %607 = vperm.xlu0 %3447, %v573_v50   ;;  %617 = vperm.xlu1 %3448, %v575_v53   ;;  %v676_v50 = vld [vmem:[#allocation4 + $0x10] sm:$0xff] }
 0x40a   :  { %643 = vperm.xlu0 %3447, %v591_v57   ;;  %648 = vperm.xlu1 %3448, %v592_v58  }
 0x40e   :  { %602 = vperm.xlu1 %3448, %v572_v27  }
 0x412   :  { %653 = vperm.xlu1 %3448, %v593_v3  }
 0x416   :  { %597 = vperm.xlu1 %3448, %v571_v4  }
 0x41a   :  { %633 = vperm.xlu1 %3448, %v589_v30  }
 0x41e   :  { %694 = vperm.xlu1 %3448, %v680_v10  }
 0x422   :  { %684 = vperm.xlu1 %3448, %v678_v11  }
 0x426   :  { %821 = vperm.xlu1 %3448, %v812_v26  }
 0x42a   :  { %815 = vperm.xlu1 %3448, %v810_v12  }
 0x479   :  { %v623_v13 = vpop.permute.xlu0 %622 }
 0x47a   :  { %v630_v14 = vmul.f32 %v623_v13, %v3987_v0  ;;  %v681_v0 = vld [vmem:[%s4674_s9 + $0x18] sm:$0xff] }
 0x47d   :  { %v659_v15 = vpop.permute.xlu1 %658  ;;  %v613_v31 = vpop.permute.xlu0 %612 }
 0x47e   :  { %v666_v16 = vadd.f32 %v659_v15, %v630_v14  ;;  %v628_v40 = vmul.f32 %v613_v31, %v3997_v2 }
 0x480   :  { %v668_v17 = vrot.slane %v666_v16, 2 }
 0x481   :  { %v618_v24 = vpop.permute.xlu1 %617  ;;  %v608_v33 = vpop.permute.xlu0 %607 }
 0x482   :  { %669 = vrot.lane.b32.xlu0 %v668_v17, %s3782_s2  ;;  %v629_v39 = vmul.f32 %v618_v24, %v3992_v1  ;;  %v627_v42 = vmul.f32 %v608_v33, %v4006_v5  ;;  %v675_v5 = vld [vmem:[#allocation4 + $0x8] sm:$0xff]  ;;  %v846_v17 = vld [vmem:[#allocation6] sm:$0xff] }
 0x483   :  { %3260 = vmatprep.mubr.msk.f32.mxu1 %vm850_vm9, %v846_v17 }
 0x485   :  { %v649_v32 = vpop.permute.xlu1 %648  ;;  %v644_v35 = vpop.permute.xlu0 %643 }
 0x486   :  { %638 = vperm.xlu0 %3447, %v590_v20   ;;  %v664_v43 = vadd.f32 %v649_v32, %v628_v40  ;;  %v663_v45 = vadd.f32 %v644_v35, %v627_v42 }
 0x489   :  { %v603_v34 = vpop.permute.xlu1 %602 }
 0x48a   :  { %699 = vperm.xlu0 %3447, %v681_v0   ;;  %v626_v1 = vmul.f32 %v603_v34, %v4015_v8  ;;  %v847_v0 = vld [vmem:[#allocation6 + $0x8] sm:$0xff] }
 0x48d   :  { %v654_v37 = vpop.permute.xlu1 %653 }
 0x48e   :  { %689 = vperm.xlu0 %3447, %v679_v25   ;;  %v665_v41 = vadd.f32 %v654_v37, %v629_v39  ;;  %v848_v25 = vld [vmem:[#allocation6 + $0x10] sm:$0xff] }
 0x491   :  { %v598_v44 = vpop.permute.xlu1 %597 }
 0x492   :  { %824 = vperm.xlu0 %3447, %v813_v22   ;;  %v625_v2 = vmul.f32 %v598_v44, %v4020_v9  ;;  %v849_v22 = vld [vmem:[#allocation6 + $0x18] sm:$0xff] }
 0x495   :  { %v634_v46 = vpop.permute.xlu1 %633 }
 0x496   :  { %818 = vperm.xlu0 %3447, %v811_v23   ;;  %v661_v49 = vadd.f32 %v634_v46, %v625_v2 }
 0x499   :  { %v695_v52 = vpop.permute.xlu1 %694 }
 0x49d   :  { %v685_v57 = vpop.permute.xlu1 %684 }
 0x4a1   :  { %v4180_v61 = vpop.permute.xlu1 %821 }
 0x4a2   :  { %vm828_vm6 = vcmp.lt.s32.totalorder %v4183_v62, %v4180_v61  ;;  %v1173_v61 = vld [vmem:[#allocation7 + $0x18] sm:$0xff] }
 0x4a5   :  { %v4200_v10 = vpop.permute.xlu1 %815 }
 0x4a6   :  { %vm826_vm8 = vcmp.lt.s32.totalorder %v4183_v62, %v4200_v10 }
 0x4f4   :  { %v670_v36 = vpop.permute.xlu0 %669 }
 0x4f5   :  { %v673_v38 = vsel %vm672_vm3, 0.0, %v670_v36  ;;  %vm1819_vm3 = vcmask 424960  }
 0x4f6   :  { %3232 = vmatprep.subr.msk.mxu0 %vm715_vm4, %v673_v38 }
 0x4f7   :  { %3233 = vmatpush3.msk.msra.mxu0 %vm715_vm4, %v673_v38  ;;  %vm1825_vm4 = vcmask 637952  }
 0x4f8   :  { %3234 = vmatprep.subr.mxu0 %v666_v16 }
 0x4f9   :  { %3235 = vmatpush3.msra.mxu0 %v666_v16 }
 0x4fa   :  { %3236 = vmatprep.subr.mxu0 %v665_v41 }
 0x4fb   :  { %3237 = vmatpush3.msra.mxu0 %v665_v41 }
 0x4fc   :  { %3238 = vmatprep.subr.mxu0 %v664_v43 }
 0x4fd   :  { %3239 = vmatpush3.msra.mxu0 %v664_v43 }
 0x4fe   :  { %3240 = vmatprep.subr.mxu0 %v663_v45 }
 0x4ff   :  { %3241 = vmatpush3.msra.mxu0 %v663_v45 }
 0x501   :  { %v639_v47 = vpop.permute.xlu0 %638 }
 0x502   :  { %v662_v48 = vadd.f32 %v639_v47, %v626_v1 }
 0x504   :  { %3242 = vmatprep.subr.mxu0 %v662_v48 }
 0x505   :  { %3243 = vmatpush3.msra.mxu0 %v662_v48  ;;  %v700_v8 = vpop.permute.xlu0 %699 }
 0x506   :  { %3244 = vmatprep.subr.mxu0 %v661_v49 }
 0x507   :  { %3245 = vmatpush3.msra.mxu0 %v661_v49 }
 0x508   :  { %3247 = vmatmul.mubr.msk.f32.vlgmr.msra.gmra.mxu0 %vm702_vm2, %v675_v5 }
 0x509   :  { %3249 = vmatprep.mubr.msk.f32.mxu0 %vm702_vm2, %v676_v50  ;;  %v690_v54 = vpop.permute.xlu0 %689 }
 0x50c   :  { %3250 = vmatmul.mubr.msk.f32.gmra.mxu0 %vm702_vm2, %v677_v51  ;;  %vm1827_vm2 = vcmask 359424  }
 0x50d   :  { %v4178_v27 = vpop.permute.xlu0 %824 }
 0x50e   :  { %vm829_vm5 = vcmp.lt.s32.totalorder %v4183_v62, %v4178_v27  ;;  %v1171_v27 = vld [vmem:[#allocation7 + $0x8] sm:$0xff] }
 0x511   :  { %v4185_v3 = vpop.permute.xlu0 %818 }
 0x512   :  { %vm827_vm7 = vcmp.lt.s32.totalorder %v4183_v62, %v4185_v3 }
 0x5c8   :  { %v3248_v53 = vpop.f32.mrf.mxu0 }
 0x5c9   :  { %v791_v9 = vadd.f32 %v3248_v53, %v690_v54 }
 0x5ca   :  { %v785_v55 = vpop.f32.mrf.mxu0 }
 0x5cb   :  { %3461 = vtanh.f32 %v791_v9  ;;  %v786_v59 = vadd.f32 %v785_v55, %v685_v57 }
 0x5cc   :  { %v3251_v29 = vpop.f32.mrf.mxu0 }
 0x5cd   :  { %v801_v56 = vadd.f32 %v3251_v29, %v700_v8 }
 0x5ce   :  { %v795_v58 = vpop.f32.mrf.mxu0 }
 0x5cf   :  { %3463 = vtanh.f32 %v801_v56  ;;  %v796_v60 = vadd.f32 %v795_v58, %v695_v52 }
 0x5d1   :  { %3465 = vtanh.f32 %v796_v60 }
 0x5d2   :  { %3467 = vtanh.f32 %v786_v59 }
 0x5d8   :  { %v3462_v63 = vpop.eup %3461 }
 0x5d9   :  { %v4210_v26 = vsel %vm827_vm7, %v3462_v63, 0.0 }
 0x5da   :  { %v837_v14 = vsel %vm241_vm0, %v4210_v26, 0.0 }
 0x5dc   :  { %v3464_v4 = vpop.eup %3463 }
 0x5dd   :  { %v4192_v6 = vsel %vm829_vm5, %v3464_v4, 0.0 }
 0x5de   :  { %v3466_v7 = vpop.eup %3465  ;;  %v843_v30 = vsel %vm241_vm0, %v4192_v6, 0.0 }
 0x5df   :  { %844 = vadd.xlane.f32.xlu0 %v843_v30  ;;  %v4205_v11 = vsel %vm828_vm6, %v3466_v7, 0.0  ;;  %v3468_v12 = vpop.eup %3467 }
 0x5e0   :  { %v840_v13 = vsel %vm241_vm0, %v4205_v11, 0.0  ;;  %v4221_v15 = vsel %vm826_vm8, %v3468_v12, 0.0 }
 0x5e1   :  { %841 = vadd.xlane.f32.xlu1 %v840_v13  ;;  %v834_v16 = vsel %vm241_vm0, %v4221_v15, 0.0 }
 0x5e3   :  { %838 = vadd.xlane.f32.xlu0 %v837_v14 }
 0x5e7   :  { %835 = vadd.xlane.f32.xlu0 %v834_v16  ;;  %v1088_v16 = vld [vmem:[%s4676_s17 + $0x18] sm:$0xff] }
 0x668   :  { %v845_v18 = vpop.xlane.xlu0 %844 }
 0x669   :  { %3252 = vmatprep.subr.mxu1 %v845_v18 }
 0x66a   :  { %3253 = vmatpush3.msra.mxu1 %v845_v18  ;;  %v842_v19 = vpop.xlane.xlu1 %841 }
 0x66b   :  { %3254 = vmatprep.subr.mxu1 %v842_v19 }
 0x66c   :  { %v839_v20 = vpop.xlane.xlu0 %838  ;;  %3255 = vmatpush3.msra.mxu1 %v842_v19 }
 0x66d   :  { %3256 = vmatprep.subr.mxu1 %v839_v20 }
 0x66e   :  { %3257 = vmatpush3.msra.mxu1 %v839_v20 }
 0x670   :  { %v836_v21 = vpop.xlane.xlu0 %835 }
 0x671   :  { %3258 = vmatprep.subr.mxu1 %v836_v21 }
 0x672   :  { %3259 = vmatpush3.msra.mxu1 %v836_v21 }
 0x673   :  { %3261 = vmatmul.mubr.msk.f32.vlgmr.msra.gmra.mxu1 %vm850_vm9, %v847_v0 }
 0x674   :  { %3263 = vmatprep.mubr.msk.f32.mxu1 %vm850_vm9, %v848_v25 }
 0x677   :  { %3264 = vmatmul.mubr.msk.f32.gmra.mxu1 %vm850_vm9, %v849_v22 }
 0x678   :  { %3274 = vmatprep.mubr.msk.f32.mxu1 %vm850_vm9, %v846_v17  ;;  %v1086_v17 = vld [vmem:[%s4676_s17 + $0x8] sm:$0xff] }
 0x733   :  { %v4230_v23 = vpop.f32.mrf.mxu1 }
 0x734   :  { %v1074_v50 = vmul.f32 0.0026666666, %v4230_v23 }
 0x735   :  { %v4232_v24 = vpop.f32.mrf.mxu1 }
 0x736   :  { %v1078_v51 = vmul.f32 %v4230_v23, %v1074_v50  ;;  %v1073_v54 = vmul.f32 0.0026666666, %v4232_v24 }
 0x737   :  { %v4234_v31 = vpop.f32.mrf.mxu1 }
 0x738   :  { %965 = vperm.xlu1 %3448, %v4234_v31   ;;  %v1076_v8 = vmul.f32 0.0026666666, %v4234_v31  ;;  %v1077_v58 = vmul.f32 %v1073_v54, %v4232_v24 }
 0x739   :  { %v4237_v32 = vpop.f32.mrf.mxu1 }
 0x73a   :  { %960 = vperm.xlu0 %3447, %v4237_v32   ;;  %v1075_v9 = vmul.f32 0.0026666666, %v4237_v32  ;;  %v1080_v56 = vmul.f32 %v4234_v31, %v1076_v8 }
 0x73c   :  { %955 = vperm.xlu1 %3448, %v4230_v23   ;;  %v1079_v60 = vmul.f32 %v1075_v9, %v4237_v32 }
 0x740   :  { %950 = vperm.xlu1 %3448, %v4232_v24  }
 0x7b3   :  { %v966_v33 = vpop.permute.xlu1 %965 }
 0x7b4   :  { %v971_v34 = vsub.f32 %v4192_v6, %v966_v33 }
 0x7b5   :  { %v961_v35 = vpop.permute.xlu0 %960 }
 0x7b6   :  { %v975_v36 = vmul.f32 %v971_v34, %v971_v34  ;;  %v970_v37 = vsub.f32 %v4205_v11, %v961_v35 }
 0x7b7   :  { %v956_v38 = vpop.permute.xlu1 %955 }
 0x7b8   :  { %v974_v39 = vmul.f32 %v970_v37, %v970_v37  ;;  %v969_v40 = vsub.f32 %v4210_v26, %v956_v38  ;;  %v985_v41 = vsel %vm241_vm0, %v975_v36, 0.0  ;;  %v1102_v37 = vld [vmem:[%s4677_s15 + $0x8] sm:$0xff]  ;;  %v1085_v38 = vld [vmem:[%s4676_s17] sm:$0xff] }
 0x7b9   :  { %986 = vadd.xlane.f32.xlu0 %v985_v41 }
 0x7ba   :  { %v973_v42 = vmul.f32 %v969_v40, %v969_v40  ;;  %v982_v43 = vsel %vm241_vm0, %v974_v39, 0.0 }
 0x7bb   :  { %v951_v44 = vpop.permute.xlu1 %950  ;;  %983 = vadd.xlane.f32.xlu1 %v982_v43  ;;  %v1101_v43 = vld [vmem:[%s4677_s15] sm:$0xff] }
 0x7bc   :  { %v968_v45 = vsub.f32 %v4221_v15, %v951_v44  ;;  %v979_v1 = vsel %vm241_vm0, %v973_v42, 0.0 }
 0x7bd   :  { %980 = vadd.xlane.f32.xlu0 %v979_v1 }
 0x7be   :  { %v972_v46 = vmul.f32 %v968_v45, %v968_v45  ;;  %v1174_v45 = vld [vmem:[%s4636_s11] sm:$0xff] }
 0x7c0   :  { %v976_v47 = vsel %vm241_vm0, %v972_v46, 0.0  ;;  %v1170_v46 = vld [vmem:[#allocation7] sm:$0xff] }
 0x7c1   :  { %977 = vadd.xlane.f32.xlu0 %v976_v47  ;;  %3290 = vmatprep.mubr.msk.f32.mxu0 %vm1198_vm10, %v1170_v46 }
 0x842   :  { %v987_v2 = vpop.xlane.xlu0 %986 }
 0x843   :  { %3266 = vmatprep.subr.mxu1 %v987_v2 }
 0x844   :  { %v984_v48 = vpop.xlane.xlu1 %983  ;;  %3267 = vmatpush3.msra.mxu1 %v987_v2 }
 0x845   :  { %3268 = vmatprep.subr.mxu1 %v984_v48 }
 0x846   :  { %3269 = vmatpush3.msra.mxu1 %v984_v48  ;;  %v981_v49 = vpop.xlane.xlu0 %980 }
 0x847   :  { %3270 = vmatprep.subr.mxu1 %v981_v49 }
 0x848   :  { %3271 = vmatpush3.msra.mxu1 %v981_v49  ;;  %v1177_v49 = vld [vmem:[%s4636_s11 + $0x18] sm:$0xff] }
 0x84a   :  { %v978_v5 = vpop.xlane.xlu0 %977 }
 0x84b   :  { %3272 = vmatprep.subr.mxu1 %v978_v5 }
 0x84c   :  { %3273 = vmatpush3.msra.mxu1 %v978_v5 }
 0x84d   :  { %3275 = vmatmul.mubr.msk.f32.vlgmr.msra.gmra.mxu1 %vm850_vm9, %v847_v0  ;;  %v1104_v0 = vld [vmem:[%s4677_s15 + $0x18] sm:$0xff] }
 0x84e   :  { %3277 = vmatprep.mubr.msk.f32.mxu1 %vm850_vm9, %v848_v25  ;;  %v1087_v25 = vld [vmem:[%s4676_s17 + $0x10] sm:$0xff]  ;;  %s3785_s17 = smov 26  }
 0x851   :  { %3278 = vmatmul.mubr.msk.f32.gmra.mxu1 %vm850_vm9, %v849_v22 }
 0x90d   :  { %v3276_v52 = vpop.f32.mrf.mxu1 }
 0x90e   :  { %v1082_v53 = vsub.f32 %v3276_v52, %v1078_v51  ;;  %v1623_v52 = vld [vmem:[#allocation10 + $0x18] sm:$0xff] }
 0x90f   :  { %v1054_v55 = vpop.f32.mrf.mxu1 }
 0x910   :  { %v1090_v29 = vadd.f32 1e-05, %v1082_v53  ;;  %v1081_v4 = vsub.f32 %v1054_v55, %v1077_v58 }
 0x911   :  { %v3279_v57 = vpop.f32.mrf.mxu1 }
 0x912   :  { %v1084_v59 = vsub.f32 %v3279_v57, %v1080_v56  ;;  %3469 = vrsqrt.f32 %v1090_v29  ;;  %v1089_v13 = vadd.f32 1e-05, %v1081_v4 }
 0x913   :  { %v1064_v63 = vpop.f32.mrf.mxu1 }
 0x914   :  { %v1092_v7 = vadd.f32 1e-05, %v1084_v59  ;;  %v1083_v30 = vsub.f32 %v1064_v63, %v1079_v60 }
 0x916   :  { %3471 = vrsqrt.f32 %v1092_v7  ;;  %v1091_v12 = vadd.f32 1e-05, %v1083_v30 }
 0x918   :  { %3473 = vrsqrt.f32 %v1091_v12 }
 0x919   :  { %3475 = vrsqrt.f32 %v1089_v13 }
 0x91f   :  { %v3470_v14 = vpop.eup %3469 }
 0x920   :  { %v1098_v20 = vmul.f32 %v3470_v14, %v1086_v17 }
 0x922   :  { %v1106_v35 = vmul.f32 %v4230_v23, %v1098_v20 }
 0x923   :  { %v3472_v18 = vpop.eup %3471 }
 0x924   :  { %v1100_v19 = vmul.f32 %v3472_v18, %v1088_v16  ;;  %v1110_v39 = vsub.f32 %v1102_v37, %v1106_v35  ;;  %v1314_v37 = vld [vmem:[#allocation9 + $0x10] sm:$0xff] }
 0x925   :  { %v3474_v21 = vpop.eup %3473 }
 0x926   :  { %1130 = vperm.xlu1 %3448, %v1100_v19   ;;  %v1108_v22 = vmul.f32 %v4234_v31, %v1100_v19  ;;  %v1099_v34 = vmul.f32 %v3474_v21, %v1087_v25  ;;  %v3476_v36 = vpop.eup %3475  ;;  %v1103_v31 = vld [vmem:[%s4677_s15 + $0x10] sm:$0xff]  ;;  %s3789_s15 = smov 52  }
 0x927   :  { %v1097_v40 = vmul.f32 %v3476_v36, %v1085_v38  ;;  %v1312_v25 = vld [vmem:[#allocation9] sm:$0xff]  ;;  %v1313_v36 = vld [vmem:[#allocation9 + $0x8] sm:$0xff]  ;;  %v1315_v38 = vld [vmem:[#allocation9 + $0x18] sm:$0xff] }
 0x928   :  { %v1112_v33 = vsub.f32 %v1104_v0, %v1108_v22  ;;  %v1107_v41 = vmul.f32 %v1099_v34, %v4237_v32  ;;  %v1176_v32 = vld [vmem:[%s4636_s11 + $0x10] sm:$0xff]  ;;  %3304 = vmatprep.mubr.msk.f32.mxu1 %vm850_vm9, %v1312_v25 }
 0x929   :  { %v1105_v42 = vmul.f32 %v1097_v40, %v4232_v24 }
 0x92a   :  { %1154 = vperm.xlu0 %3447, %v1112_v33   ;;  %1125 = vperm.xlu1 %3448, %v1099_v34   ;;  %v1111_v23 = vsub.f32 %v1103_v31, %v1107_v41 }
 0x92b   :  { %v1109_v44 = vsub.f32 %v1101_v43, %v1105_v42 }
 0x92e   :  { %1144 = vperm.xlu0 %3447, %v1110_v39   ;;  %1120 = vperm.xlu1 %3448, %v1098_v20  }
 0x932   :  { %1115 = vperm.xlu1 %3448, %v1097_v40   ;;  %1149 = vperm.xlu0 %3447, %v1111_v23  }
 0x936   :  { %1139 = vperm.xlu0 %3447, %v1109_v44  }
 0x93a   :  { %1190 = vperm.xlu0 %3447, %v1176_v32  }
 0x93e   :  { %1180 = vperm.xlu0 %3447, %v1174_v45  }
 0x9a1   :  { %v1131_v1 = vpop.permute.xlu1 %1130 }
 0x9a2   :  { %v1136_v24 = vmul.f32 %v1131_v1, %v4192_v6  ;;  %v1175_v6 = vld [vmem:[%s4636_s11 + $0x8] sm:$0xff] }
 0x9a5   :  { %v1155_v47 = vpop.permute.xlu0 %1154  ;;  %v1126_v5 = vpop.permute.xlu1 %1125 }
 0x9a6   :  { %v1160_v2 = vadd.f32 %v1155_v47, %v1136_v24  ;;  %v1135_v9 = vmul.f32 %v1126_v5, %v4205_v11 }
 0x9a8   :  { %v1164_v48 = vsel %vm829_vm5, %v1160_v2, 0.0 }
 0x9a9   :  { %1166 = vrot.lane.b32.xlu1 %v1164_v48, %s3782_s2  ;;  %v1121_v50 = vpop.permute.xlu1 %1120  ;;  %v1145_v51 = vpop.permute.xlu0 %1144 }
 0x9aa   :  { %v1134_v55 = vmul.f32 %v1121_v50, %v4210_v26 }
 0x9ac   :  { %v1158_v57 = vadd.f32 %v1145_v51, %v1134_v55 }
 0x9ad   :  { %1195 = vperm.xlu1 %3448, %v1177_v49   ;;  %v1116_v8 = vpop.permute.xlu1 %1115  ;;  %v1150_v53 = vpop.permute.xlu0 %1149 }
 0x9ae   :  { %v1159_v29 = vadd.f32 %v1150_v53, %v1135_v9  ;;  %v1133_v11 = vmul.f32 %v1116_v8, %v4221_v15  ;;  %v1172_v15 = vld [vmem:[#allocation7 + $0x10] sm:$0xff] }
 0x9b1   :  { %1185 = vperm.xlu1 %3448, %v1175_v6   ;;  %v1140_v56 = vpop.permute.xlu0 %1139 }
 0x9b2   :  { %v1157_v26 = vadd.f32 %v1140_v56, %v1133_v11 }
 0x9b5   :  { %v1191_v58 = vpop.permute.xlu0 %1190 }
 0x9b9   :  { %v1181_v63 = vpop.permute.xlu0 %1180 }
 0xa1b   :  { %v1167_v54 = vpop.permute.xlu1 %1166 }
 0xa1c   :  { %3280 = vmatprep.subr.msk.mxu0 %vm4308_vm11, %v1167_v54 }
 0xa1d   :  { %3281 = vmatpush3.msk.msra.mxu0 %vm4308_vm11, %v1167_v54 }
 0xa1e   :  { %3282 = vmatprep.subr.msk.mxu0 %vm829_vm5, %v1160_v2 }
 0xa1f   :  { %3283 = vmatpush3.msk.msra.mxu0 %vm829_vm5, %v1160_v2  ;;  %vm1833_vm5 = vcmask 572416  }
 0xa20   :  { %3284 = vmatprep.subr.msk.mxu0 %vm828_vm6, %v1159_v29 }
 0xa21   :  { %3285 = vmatpush3.msk.msra.mxu0 %vm828_vm6, %v1159_v29  ;;  %vm1829_vm6 = vcmask 80896  }
 0xa22   :  { %3286 = vmatprep.subr.msk.mxu0 %vm827_vm7, %v1158_v57 }
 0xa23   :  { %3287 = vmatpush3.msk.msra.mxu0 %vm827_vm7, %v1158_v57  ;;  %vm1831_vm7 = vcmask 850944  }
 0xa24   :  { %3288 = vmatprep.subr.msk.mxu0 %vm826_vm8, %v1157_v26 }
 0xa25   :  { %3289 = vmatpush3.msk.msra.mxu0 %vm826_vm8, %v1157_v26  ;;  %vm1837_vm8 = vcmask 15360  }
 0xa26   :  { %3291 = vmatmul.mubr.msk.f32.vlgmr.msra.gmra.mxu0 %vm1198_vm10, %v1171_v27 }
 0xa27   :  { %3293 = vmatprep.mubr.msk.f32.mxu0 %vm1198_vm10, %v1172_v15  ;;  %v1456_v15 = vld [vmem:[%s4638_s13 + $0x18] sm:$0xff] }
 0xa28   :  { %v1196_v3 = vpop.permute.xlu1 %1195 }
 0xa2a   :  { %3294 = vmatmul.mubr.msk.f32.gmra.mxu0 %vm1198_vm10, %v1173_v61  ;;  %vm2227_vm10 = vcmask 785408  }
 0xa2b   :  { %3318 = vmatprep.mubr.msk.f32.mxu0 %vm850_vm9, %v1312_v25 }
 0xa2c   :  { %v1186_v12 = vpop.permute.xlu1 %1185 }
 0xae6   :  { %v3292_v59 = vpop.f32.mrf.mxu0 }
 0xae7   :  { %v1283_v14 = vadd.f32 %v3292_v59, %v1186_v12  ;;  %v1454_v59 = vld [vmem:[%s4638_s13 + $0x8] sm:$0xff]  ;;  %v1553_v12 = vld [vmem:[%s4639_s14 + $0x18] sm:$0xff] }
 0xae8   :  { %v1277_v60 = vpop.f32.mrf.mxu0 }
 0xae9   :  { %v1278_v4 = vadd.f32 %v1277_v60, %v1181_v63 }
 0xaea   :  { %v3295_v7 = vpop.f32.mrf.mxu0 }
 0xaeb   :  { %v1293_v30 = vadd.f32 %v3295_v7, %v1196_v3  ;;  %v1455_v3 = vld [vmem:[%s4638_s13 + $0x10] sm:$0xff] }
 0xaec   :  { %v1287_v13 = vpop.f32.mrf.mxu0 }
 0xaed   :  { %3477 = vtanh.f32 %v1293_v30  ;;  %v1288_v62 = vadd.f32 %v1287_v13, %v1191_v58  ;;  %v1552_v13 = vld [vmem:[%s4639_s14 + $0x10] sm:$0xff] }
 0xaee   :  { %3479 = vtanh.f32 %v1278_v4 }
 0xaef   :  { %3481 = vtanh.f32 %v1288_v62 }
 0xaf0   :  { %3483 = vtanh.f32 %v1283_v14 }
 0xafa   :  { %v4346_v10 = vpop.eup %3477 }
 0xafb   :  { %v4348_v16 = vpop.eup %3479  ;;  %v1309_v17 = vsel %vm241_vm0, %v4346_v10, 0.0 }
 0xafc   :  { %v4352_v18 = vpop.eup %3481  ;;  %1310 = vadd.xlane.f32.xlu1 %v1309_v17  ;;  %v1300_v21 = vsel %vm241_vm0, %v4348_v16, 0.0 }
 0xafd   :  { %v1306_v19 = vsel %vm241_vm0, %v4352_v18, 0.0  ;;  %v4356_v20 = vpop.eup %3483 }
 0xafe   :  { %1307 = vadd.xlane.f32.xlu0 %v1306_v19  ;;  %v1303_v0 = vsel %vm241_vm0, %v4356_v20, 0.0 }
 0xb00   :  { %1301 = vadd.xlane.f32.xlu1 %v1300_v21  ;;  %v1551_v21 = vld [vmem:[%s4639_s14 + $0x8] sm:$0xff] }
 0xb02   :  { %1304 = vadd.xlane.f32.xlu0 %v1303_v0 }
 0xb85   :  { %v1311_v22 = vpop.xlane.xlu1 %1310 }
 0xb86   :  { %3296 = vmatprep.subr.mxu1 %v1311_v22 }
 0xb87   :  { %3297 = vmatpush3.msra.mxu1 %v1311_v22  ;;  %v1308_v33 = vpop.xlane.xlu0 %1307  ;;  %v1453_v22 = vld [vmem:[%s4638_s13] sm:$0xff] }
 0xb88   :  { %3298 = vmatprep.subr.mxu1 %v1308_v33 }
 0xb89   :  { %3299 = vmatpush3.msra.mxu1 %v1308_v33  ;;  %v1302_v35 = vpop.xlane.xlu1 %1301 }
 0xb8b   :  { %v1305_v34 = vpop.xlane.xlu0 %1304 }
 0xb8c   :  { %3300 = vmatprep.subr.mxu1 %v1305_v34 }
 0xb8d   :  { %3301 = vmatpush3.msra.mxu1 %v1305_v34 }
 0xb8e   :  { %3302 = vmatprep.subr.mxu1 %v1302_v35 }
 0xb8f   :  { %3303 = vmatpush3.msra.mxu1 %v1302_v35 }
 0xb90   :  { %3305 = vmatmul.mubr.msk.f32.vlgmr.msra.gmra.mxu1 %vm850_vm9, %v1313_v36 }
 0xb91   :  { %3307 = vmatprep.mubr.msk.f32.mxu1 %vm850_vm9, %v1314_v37 }
 0xb94   :  { %3308 = vmatmul.mubr.msk.f32.gmra.mxu1 %vm850_vm9, %v1315_v38 }
 0xc50   :  { %v4367_v39 = vpop.f32.mrf.mxu1 }
 0xc52   :  { %v4369_v40 = vpop.f32.mrf.mxu1 }
 0xc54   :  { %v3309_v41 = vpop.f32.mrf.mxu1 }
 0xc55   :  { %1430 = vperm.xlu0 %3447, %v3309_v41  }
 0xc56   :  { %v4371_v31 = vpop.f32.mrf.mxu1 }
 0xc57   :  { %1425 = vperm.xlu1 %3448, %v4371_v31  }
 0xc59   :  { %1415 = vperm.xlu0 %3447, %v4369_v40  }
 0xc5b   :  { %1420 = vperm.xlu1 %3448, %v4367_v39  }
 0xcd0   :  { %v1431_v23 = vpop.permute.xlu0 %1430 }
 0xcd1   :  { %v1436_v42 = vsub.f32 %v4346_v10, %v1431_v23 }
 0xcd2   :  { %v1426_v43 = vpop.permute.xlu1 %1425 }
 0xcd3   :  { %v1440_v44 = vmul.f32 %v1436_v42, %v1436_v42  ;;  %v1435_v32 = vsub.f32 %v4352_v18, %v1426_v43  ;;  %v1550_v42 = vld [vmem:[%s4639_s14] sm:$0xff] }
 0xcd4   :  { %v1416_v45 = vpop.permute.xlu0 %1415 }
 0xcd5   :  { %v1439_v1 = vmul.f32 %v1435_v32, %v1435_v32  ;;  %v1433_v24 = vsub.f32 %v4348_v16, %v1416_v45  ;;  %v1450_v46 = vsel %vm241_vm0, %v1440_v44, 0.0  ;;  %v1625_v44 = vld [vmem:[%s4641_s16 + $0x8] sm:$0xff] }
 0xcd6   :  { %1451 = vadd.xlane.f32.xlu1 %v1450_v46  ;;  %v1421_v47 = vpop.permute.xlu1 %1420 }
 0xcd7   :  { %v1437_v2 = vmul.f32 %v1433_v24, %v1433_v24  ;;  %v1434_v48 = vsub.f32 %v4356_v20, %v1421_v47  ;;  %v1447_v49 = vsel %vm241_vm0, %v1439_v1, 0.0 }
 0xcd8   :  { %1448 = vadd.xlane.f32.xlu0 %v1447_v49 }
 0xcd9   :  { %v1438_v6 = vmul.f32 %v1434_v48, %v1434_v48  ;;  %v1441_v5 = vsel %vm241_vm0, %v1437_v2, 0.0 }
 0xcda   :  { %1442 = vadd.xlane.f32.xlu1 %v1441_v5  ;;  %v1621_v5 = vld [vmem:[#allocation10 + $0x8] sm:$0xff] }
 0xcdb   :  { %v1444_v50 = vsel %vm241_vm0, %v1438_v6, 0.0 }
 0xcdc   :  { %1445 = vadd.xlane.f32.xlu0 %v1444_v50  ;;  %v1870_v50 = vld [vmem:[#allocation12 + $0xf8] sm:$0xff] }
 0xd5f   :  { %v1452_v51 = vpop.xlane.xlu1 %1451 }
 0xd60   :  { %3310 = vmatprep.subr.mxu0 %v1452_v51 }
 0xd61   :  { %v1449_v8 = vpop.xlane.xlu0 %1448  ;;  %3311 = vmatpush3.msra.mxu0 %v1452_v51  ;;  %v1869_v51 = vld [vmem:[#allocation12 + $0xf0] sm:$0xff] }
 0xd62   :  { %3312 = vmatprep.subr.mxu0 %v1449_v8 }
 0xd63   :  { %3313 = vmatpush3.msra.mxu0 %v1449_v8  ;;  %v1443_v54 = vpop.xlane.xlu1 %1442  ;;  %v1868_v8 = vld [vmem:[#allocation12 + $0xe8] sm:$0xff] }
 0xd65   :  { %v1446_v53 = vpop.xlane.xlu0 %1445 }
 0xd66   :  { %3314 = vmatprep.subr.mxu0 %v1446_v53 }
 0xd67   :  { %3315 = vmatpush3.msra.mxu0 %v1446_v53  ;;  %v1867_v53 = vld [vmem:[#allocation12 + $0xe0] sm:$0xff] }
 0xd68   :  { %3316 = vmatprep.subr.mxu0 %v1443_v54 }
 0xd69   :  { %3317 = vmatpush3.msra.mxu0 %v1443_v54  ;;  %v1865_v54 = vld [vmem:[#allocation12 + $0xd0] sm:$0xff] }
 0xd6a   :  { %3319 = vmatmul.mubr.msk.f32.vlgmr.msra.gmra.mxu0 %vm850_vm9, %v1313_v36  ;;  %2231 = vmatprep.subr.mxu0 %v1870_v50  ;;  %v1901_v50 = vld [vmem:[#allocation12 + $0x1f0] sm:$0xff] }
 0xd6b   :  { %3321 = vmatprep.mubr.msk.f32.mxu0 %vm850_vm9, %v1314_v37  ;;  %2232 = vmatpush1.msra.mxu0 %v1869_v51  ;;  %v1904_v51 = vld [vmem:[#allocation12 + $0x208] sm:$0xff] }
 0xd6c   :  { %2233 = vmatprep.subr.mxu0 %v1868_v8  ;;  %v1900_v8 = vld [vmem:[#allocation12 + $0x1e8] sm:$0xff] }
 0xd6d   :  { %2234 = vmatpush1.msra.mxu0 %v1867_v53  ;;  %v1903_v53 = vld [vmem:[#allocation12 + $0x200] sm:$0xff] }
 0xd6e   :  { %3322 = vmatmul.mubr.msk.f32.gmra.mxu0 %vm850_vm9, %v1315_v38  ;;  %vm1835_vm9 = vcmask 293888  }
 0xe2a   :  { %v3320_v9 = vpop.f32.mrf.mxu0 }
 0xe2b   :  { %v1529_v55 = vadd.f32 1e-05, %v3320_v9  ;;  %v1934_v9 = vld [vmem:[#allocation12 + $0x2f8] sm:$0xff] }
 0xe2c   :  { %v1523_v29 = vpop.f32.mrf.mxu0 }
 0xe2d   :  { %3485 = vrsqrt.f32 %v1529_v55  ;;  %v1524_v27 = vadd.f32 1e-05, %v1523_v29  ;;  %v1933_v55 = vld [vmem:[#allocation12 + $0x2f0] sm:$0xff]  ;;  %v1864_v29 = vld [vmem:[#allocation12 + $0xc8] sm:$0xff] }
 0xe2e   :  { %v3323_v56 = vpop.f32.mrf.mxu0 }
 0xe2f   :  { %v1539_v57 = vadd.f32 1e-05, %v3323_v56  ;;  %v1932_v56 = vld [vmem:[#allocation12 + $0x2e8] sm:$0xff] }
 0xe30   :  { %v1533_v11 = vpop.f32.mrf.mxu0 }
 0xe31   :  { %3487 = vrsqrt.f32 %v1539_v57  ;;  %v1534_v26 = vadd.f32 1e-05, %v1533_v11  ;;  %v1863_v57 = vld [vmem:[#allocation12 + $0xc0] sm:$0xff] }
 0xe32   :  { %v1931_v11 = vld [vmem:[#allocation12 + $0x2e0] sm:$0xff] }
 0xe33   :  { %3489 = vrsqrt.f32 %v1534_v26  ;;  %v1930_v26 = vld [vmem:[#allocation12 + $0x2d8] sm:$0xff] }
 0xe34   :  { %3491 = vrsqrt.f32 %v1524_v27  ;;  %v1862_v27 = vld [vmem:[#allocation12 + $0xb8] sm:$0xff] }
 0xe3a   :  { %v3486_v61 = vpop.eup %3485 }
 0xe3b   :  { %v1547_v30 = vmul.f32 %v3486_v61, %v1454_v59  ;;  %v1861_v61 = vld [vmem:[#allocation12 + $0xb0] sm:$0xff]  ;;  %v1927_v59 = vld [vmem:[#allocation12 + $0x2c0] sm:$0xff] }
 0xe3d   :  { %v1555_v19 = vmul.f32 %v4367_v39, %v1547_v30 }
 0xe3e   :  { %v3488_v58 = vpop.eup %3487 }
 0xe3f   :  { %v1549_v60 = vmul.f32 %v3488_v58, %v1456_v15  ;;  %v1559_v0 = vsub.f32 %v1551_v21, %v1555_v19  ;;  %v1929_v15 = vld [vmem:[#allocation12 + $0x2d0] sm:$0xff]  ;;  %v1928_v58 = vld [vmem:[#allocation12 + $0x2c8] sm:$0xff]  ;;  %v1854_v19 = vld [vmem:[#allocation12 + $0x78] sm:$0xff] }
 0xe40   :  { %v3490_v63 = vpop.eup %3489  ;;  %v1921_v21 = vld [vmem:[#allocation12 + $0x290] sm:$0xff] }
 0xe41   :  { %1579 = vperm.xlu0 %3447, %v1549_v60   ;;  %v1548_v4 = vmul.f32 %v3490_v63, %v1455_v3  ;;  %v1557_v7 = vmul.f32 %v3309_v41, %v1549_v60  ;;  %v3492_v25 = vpop.eup %3491  ;;  %v1860_v3 = vld [vmem:[#allocation12 + $0xa8] sm:$0xff]  ;;  %v1859_v60 = vld [vmem:[#allocation12 + $0xa0] sm:$0xff]  ;;  %v1926_v63 = vld [vmem:[#allocation12 + $0x2b8] sm:$0xff] }
 0xe42   :  { %v1546_v33 = vmul.f32 %v3492_v25, %v1453_v22  ;;  %v1920_v25 = vld [vmem:[#allocation12 + $0x288] sm:$0xff] }
 0xe43   :  { %1574 = vperm.xlu1 %3448, %v1548_v4   ;;  %v1556_v14 = vmul.f32 %v1548_v4, %v4371_v31  ;;  %v1561_v62 = vsub.f32 %v1553_v12, %v1557_v7  ;;  %v1858_v4 = vld [vmem:[#allocation12 + $0x98] sm:$0xff]  ;;  %v1925_v7 = vld [vmem:[#allocation12 + $0x2b0] sm:$0xff]  ;;  %v1924_v12 = vld [vmem:[#allocation12 + $0x2a8] sm:$0xff] }
 0xe44   :  { %v1554_v23 = vmul.f32 %v1546_v33, %v4369_v40  ;;  %v1626_v40 = vld [vmem:[%s4641_s16 + $0x10] sm:$0xff]  ;;  %v1852_v22 = vld [vmem:[#allocation12 + $0x68] sm:$0xff] }
 0xe45   :  { %v1560_v17 = vsub.f32 %v1552_v13, %v1556_v14  ;;  %v1856_v13 = vld [vmem:[#allocation12 + $0x88] sm:$0xff]  ;;  %v1923_v14 = vld [vmem:[#allocation12 + $0x2a0] sm:$0xff] }
 0xe46   :  { %v1558_v43 = vsub.f32 %v1550_v42, %v1554_v23  ;;  %v1847_v23 = vld [vmem:[#allocation12 + $0x40] sm:$0xff]  ;;  %v1914_v42 = vld [vmem:[#allocation12 + $0x258] sm:$0xff] }
 0xe47   :  { %1603 = vperm.xlu1 %3448, %v1561_v62   ;;  %1598 = vperm.xlu0 %3447, %v1560_v17   ;;  %v1855_v62 = vld [vmem:[#allocation12 + $0x80] sm:$0xff]  ;;  %v1922_v17 = vld [vmem:[#allocation12 + $0x298] sm:$0xff] }
 0xe4b   :  { %1569 = vperm.xlu1 %3448, %v1547_v30   ;;  %1593 = vperm.xlu0 %3447, %v1559_v0   ;;  %v1857_v30 = vld [vmem:[#allocation12 + $0x90] sm:$0xff] }
 0xe4c   :  { %v1853_v0 = vld [vmem:[#allocation12 + $0x70] sm:$0xff] }
 0xe4f   :  { %1564 = vperm.xlu1 %3448, %v1546_v33   ;;  %v1919_v33 = vld [vmem:[#allocation12 + $0x280] sm:$0xff] }
 0xebc   :  { %v1580_v34 = vpop.permute.xlu0 %1579 }
 0xebd   :  { %v1585_v36 = vmul.f32 %v4346_v10, %v1580_v34  ;;  %v1624_v10 = vld [vmem:[%s4641_s16] sm:$0xff]  ;;  %v1851_v34 = vld [vmem:[#allocation12 + $0x60] sm:$0xff] }
 0xebe   :  { %v1575_v35 = vpop.permute.xlu1 %1574 }
 0xebf   :  { %v1584_v37 = vmul.f32 %v4352_v18, %v1575_v35  ;;  %v1620_v18 = vld [vmem:[#allocation10] sm:$0xff]  ;;  %v1918_v35 = vld [vmem:[#allocation12 + $0x278] sm:$0xff] }
 0xec0   :  { %3336 = vmatprep.mubr.msk.f32.mxu1 %vm266_vm1, %v1620_v18  ;;  %v1845_v18 = vld [vmem:[#allocation12 + $0x30] sm:$0xff] }
 0xec2   :  { %v1604_v38 = vpop.permute.xlu1 %1603  ;;  %v1599_v39 = vpop.permute.xlu0 %1598 }
 0xec3   :  { %v1609_v41 = vadd.f32 %v1604_v38, %v1585_v36  ;;  %v1608_v31 = vadd.f32 %v1599_v39, %v1584_v37  ;;  %v1850_v36 = vld [vmem:[#allocation12 + $0x58] sm:$0xff]  ;;  %v1917_v37 = vld [vmem:[#allocation12 + $0x270] sm:$0xff]  ;;  %v1916_v39 = vld [vmem:[#allocation12 + $0x268] sm:$0xff] }
 0xec4   :  { %v1849_v38 = vld [vmem:[#allocation12 + $0x50] sm:$0xff] }
 0xec5   :  { %1614 = vrot.lane.b32.xlu0 %v1609_v41, %s3782_s2  ;;  %1612 = vrot.lane.b32.xlu1 %v1608_v31, %s3782_s2  ;;  %s3783_s2 = smov 60  }
 0xec6   :  { %v1570_v32 = vpop.permute.xlu1 %1569  ;;  %v1594_v45 = vpop.permute.xlu0 %1593 }
 0xec7   :  { %v1583_v47 = vmul.f32 %v4356_v20, %v1570_v32  ;;  %v1622_v20 = vld [vmem:[#allocation10 + $0x10] sm:$0xff]  ;;  %v1911_v32 = vld [vmem:[#allocation12 + $0x240] sm:$0xff] }
 0xec9   :  { %1630 = vperm.xlu1 %3448, %v1624_v10   ;;  %1588 = vperm.xlu0 %3447, %v1558_v43   ;;  %v1607_v2 = vadd.f32 %v1594_v45, %v1583_v47  ;;  %v1846_v10 = vld [vmem:[#allocation12 + $0x38] sm:$0xff]  ;;  %v1913_v43 = vld [vmem:[#allocation12 + $0x250] sm:$0xff]  ;;  %v1843_v45 = vld [vmem:[#allocation12 + $0x20] sm:$0xff] }
 0xeca   :  { %v1565_v1 = vpop.permute.xlu1 %1564  ;;  %v1841_v47 = vld [vmem:[#allocation12 + $0x10] sm:$0xff] }
 0xecb   :  { %v1582_v48 = vmul.f32 %v4348_v16, %v1565_v1  ;;  %v1866_v16 = vld [vmem:[#allocation12 + $0xd8] sm:$0xff] }
 0xecc   :  { %2235 = vmatprep.subr.mxu0 %v1866_v16  ;;  %v1910_v1 = vld [vmem:[#allocation12 + $0x238] sm:$0xff]  ;;  %v1899_v16 = vld [vmem:[#allocation12 + $0x1e0] sm:$0xff] }
 0xecd   :  { %1640 = vperm.xlu1 %3448, %v1626_v40   ;;  %1635 = vperm.xlu0 %3447, %v1625_v44   ;;  %v1912_v40 = vld [vmem:[#allocation12 + $0x248] sm:$0xff] }
 0xece   :  { %2236 = vmatpush1.msra.mxu0 %v1865_v54  ;;  %v1844_v44 = vld [vmem:[#allocation12 + $0x28] sm:$0xff]  ;;  %v1966_v54 = vld [vmem:[#allocation12 + $0x3f8] sm:$0xff] }
 0xecf   :  { %2237 = vmatprep.subr.mxu0 %v1864_v29  ;;  %v1897_v29 = vld [vmem:[#allocation12 + $0x1d0] sm:$0xff] }
 0xed0   :  { %2238 = vmatpush1.msra.mxu0 %v1863_v57  ;;  %v1896_v57 = vld [vmem:[#allocation12 + $0x1c8] sm:$0xff] }
 0xed1   :  { %2239 = vmatprep.subr.mxu0 %v1862_v27  ;;  %v1962_v27 = vld [vmem:[#allocation12 + $0x3d8] sm:$0xff] }
 0xed2   :  { %2240 = vmatpush1.msra.mxu0 %v1861_v61  ;;  %v1961_v61 = vld [vmem:[#allocation12 + $0x3d0] sm:$0xff] }
 0xed3   :  { %2241 = vmatprep.subr.mxu0 %v1860_v3  ;;  %v1960_v3 = vld [vmem:[#allocation12 + $0x3c8] sm:$0xff] }
 0xed4   :  { %2242 = vmatpush1.msra.mxu0 %v1859_v60  ;;  %v1959_v60 = vld [vmem:[#allocation12 + $0x3c0] sm:$0xff] }
 0xed5   :  { %2243 = vmatprep.subr.mxu0 %v1858_v4  ;;  %v1958_v4 = vld [vmem:[#allocation12 + $0x3b8] sm:$0xff] }
 0xed6   :  { %2244 = vmatpush1.msra.mxu0 %v1857_v30  ;;  %v1957_v30 = vld [vmem:[#allocation12 + $0x3b0] sm:$0xff] }
 0xed7   :  { %2245 = vmatprep.subr.mxu0 %v1856_v13  ;;  %v1956_v13 = vld [vmem:[#allocation12 + $0x3a8] sm:$0xff] }
 0xed8   :  { %2246 = vmatpush1.msra.mxu0 %v1855_v62  ;;  %v1955_v62 = vld [vmem:[#allocation12 + $0x3a0] sm:$0xff] }
 0xed9   :  { %2247 = vmatprep.subr.mxu0 %v1854_v19  ;;  %v1954_v19 = vld [vmem:[#allocation12 + $0x398] sm:$0xff] }
 0xeda   :  { %2248 = vmatpush1.msra.mxu0 %v1853_v0  ;;  %v1953_v0 = vld [vmem:[#allocation12 + $0x390] sm:$0xff] }
 0xedb   :  { %2249 = vmatprep.subr.mxu0 %v1852_v22  ;;  %v1952_v22 = vld [vmem:[#allocation12 + $0x388] sm:$0xff] }
 0xedc   :  { %2250 = vmatpush1.msra.mxu0 %v1851_v34  ;;  %v1951_v34 = vld [vmem:[#allocation12 + $0x380] sm:$0xff] }
 0xedd   :  { %2251 = vmatprep.subr.mxu0 %v1850_v36  ;;  %v1950_v36 = vld [vmem:[#allocation12 + $0x378] sm:$0xff] }
 0xede   :  { %2252 = vmatpush1.msra.mxu0 %v1849_v38  ;;  %v1949_v38 = vld [vmem:[#allocation12 + $0x370] sm:$0xff] }
 0xf37   :  { %v1615_v24 = vpop.permute.xlu0 %1614  ;;  %v1613_v46 = vpop.permute.xlu1 %1612 }
 0xf38   :  { %3324 = vmatprep.subr.msk.mxu1 %vm4308_vm11, %v1615_v24 }
 0xf39   :  { %3325 = vmatpush3.msk.msra.mxu1 %vm4308_vm11, %v1615_v24  ;;  %v1842_v24 = vld [vmem:[#allocation12 + $0x18] sm:$0xff] }
 0xf3a   :  { %3326 = vmatprep.subr.msk.mxu1 %vm4308_vm11, %v1613_v46 }
 0xf3b   :  { %3327 = vmatpush3.msk.msra.mxu1 %vm4308_vm11, %v1613_v46  ;;  %v1909_v46 = vld [vmem:[#allocation12 + $0x230] sm:$0xff]  ;;  %vm3799_vm11 = vmmov 0  }
 0xf3c   :  { %3328 = vmatprep.subr.mxu1 %v1609_v41 }
 0xf3d   :  { %3329 = vmatpush3.msra.mxu1 %v1609_v41  ;;  %v1848_v41 = vld [vmem:[#allocation12 + $0x48] sm:$0xff] }
 0xf3e   :  { %3330 = vmatprep.subr.mxu1 %v1608_v31  ;;  %2253 = vmatprep.subr.mxu0 %v1848_v41  ;;  %v1948_v41 = vld [vmem:[#allocation12 + $0x368] sm:$0xff] }
 0xf3f   :  { %3331 = vmatpush3.msra.mxu1 %v1608_v31  ;;  %v1915_v31 = vld [vmem:[#allocation12 + $0x260] sm:$0xff]  ;;  %2254 = vmatpush1.msra.mxu0 %v1847_v23 }
 0xf40   :  { %3332 = vmatprep.subr.mxu1 %v1607_v2  ;;  %2255 = vmatprep.subr.mxu0 %v1846_v10  ;;  %v1947_v23 = vld [vmem:[#allocation12 + $0x360] sm:$0xff]  ;;  %v1946_v10 = vld [vmem:[#allocation12 + $0x358] sm:$0xff] }
 0xf41   :  { %3333 = vmatpush3.msra.mxu1 %v1607_v2  ;;  %2256 = vmatpush1.msra.mxu0 %v1845_v18  ;;  %v1908_v2 = vld [vmem:[#allocation12 + $0x228] sm:$0xff]  ;;  %v1945_v18 = vld [vmem:[#allocation12 + $0x350] sm:$0xff] }
 0xf42   :  { %2257 = vmatprep.subr.mxu0 %v1844_v44  ;;  %v1944_v44 = vld [vmem:[#allocation12 + $0x348] sm:$0xff] }
 0xf43   :  { %2258 = vmatpush1.msra.mxu0 %v1843_v45  ;;  %v1875_v45 = vld [vmem:[#allocation12 + $0x120] sm:$0xff] }
 0xf44   :  { %v1589_v49 = vpop.permute.xlu0 %1588  ;;  %2259 = vmatprep.subr.mxu0 %v1842_v24  ;;  %v1873_v24 = vld [vmem:[#allocation12 + $0x110] sm:$0xff] }
 0xf45   :  { %v1606_v6 = vadd.f32 %v1589_v49, %v1582_v48  ;;  %v1840_v48 = vld [vmem:[#allocation12 + $0x8] sm:$0xff]  ;;  %v1907_v49 = vld [vmem:[#allocation12 + $0x220] sm:$0xff]  ;;  %2260 = vmatpush1.msra.mxu0 %v1841_v47 }
 0xf46   :  { %2261 = vmatprep.subr.mxu0 %v1840_v48 }
 0xf47   :  { %3334 = vmatprep.subr.mxu1 %v1606_v6 }
 0xf48   :  { %3335 = vmatpush3.msra.mxu1 %v1606_v6  ;;  %v1839_v6 = vld [vmem:[#allocation12] sm:$0xff] }
 0xf49   :  { %3337 = vmatmul.mubr.msk.f32.vlgmr.msra.gmra.mxu1 %vm266_vm1, %v1621_v5  ;;  %2302 = vmatprep.subr.mxu1 %v1934_v9  ;;  %v1906_v5 = vld [vmem:[#allocation12 + $0x218] sm:$0xff] }
 0xf4a   :  { %3339 = vmatprep.mubr.msk.f32.mxu1 %vm266_vm1, %v1622_v20  ;;  %2303 = vmatpush1.msra.mxu1 %v1933_v55  ;;  %v1902_v20 = vld [vmem:[#allocation12 + $0x1f8] sm:$0xff]  ;;  %v1965_v55 = vld [vmem:[#allocation12 + $0x3f0] sm:$0xff] }
 0xf4b   :  { %2304 = vmatprep.subr.mxu1 %v1932_v56  ;;  %2262 = vmatpush1.msra.mxu0 %v1839_v6  ;;  %v1898_v9 = vld [vmem:[#allocation12 + $0x1d8] sm:$0xff]  ;;  %v1964_v56 = vld [vmem:[#allocation12 + $0x3e8] sm:$0xff]  ;;  %v1636_v6 = vpop.permute.xlu0 %1635 }
 0xf4c   :  { %2305 = vmatpush1.msra.mxu1 %v1931_v11  ;;  %2263 = vmatprep.subr.mxu0 %v1902_v20  ;;  %v1963_v11 = vld [vmem:[#allocation12 + $0x3e0] sm:$0xff] }
 0xf4d   :  { %3340 = vmatmul.mubr.msk.f32.gmra.mxu1 %vm266_vm1, %v1623_v52  ;;  %2306 = vmatprep.subr.mxu1 %v1930_v26  ;;  %v1905_v52 = vld [vmem:[#allocation12 + $0x210] sm:$0xff]  ;;  %v1895_v26 = vld [vmem:[#allocation12 + $0x1c0] sm:$0xff]  ;;  %vm1823_vm1 = vcmask 916480  }
 0xf4e   :  { %2307 = vmatpush1.msra.mxu1 %v1929_v15  ;;  %2264 = vmatpush2.msra.mxu0 %v1901_v50  ;;  %v1894_v15 = vld [vmem:[#allocation12 + $0x1b8] sm:$0xff]  ;;  %v1871_v20 = vld [vmem:[#allocation12 + $0x100] sm:$0xff] }
 0xf4f   :  { %2308 = vmatprep.subr.mxu1 %v1928_v58  ;;  %2265 = vmatprep.subr.mxu0 %v1900_v8  ;;  %v1893_v58 = vld [vmem:[#allocation12 + $0x1b0] sm:$0xff]  ;;  %v1998_v8 = vld [vmem:[#allocation12 + $0x4f8] sm:$0xff] }
 0xf50   :  { %2309 = vmatpush1.msra.mxu1 %v1927_v59  ;;  %2266 = vmatpush2.msra.mxu0 %v1899_v16  ;;  %v1892_v59 = vld [vmem:[#allocation12 + $0x1a8] sm:$0xff] }
 0xf51   :  { %2310 = vmatprep.subr.mxu1 %v1926_v63  ;;  %2267 = vmatprep.subr.mxu0 %v1898_v9  ;;  %v1891_v63 = vld [vmem:[#allocation12 + $0x1a0] sm:$0xff]  ;;  %v1940_v16 = vld [vmem:[#allocation12 + $0x328] sm:$0xff] }
 0xf52   :  { %2311 = vmatpush1.msra.mxu1 %v1925_v7  ;;  %2268 = vmatpush2.msra.mxu0 %v1897_v29  ;;  %v1890_v7 = vld [vmem:[#allocation12 + $0x198] sm:$0xff]  ;;  %v1939_v9 = vld [vmem:[#allocation12 + $0x320] sm:$0xff] }
 0xf53   :  { %2312 = vmatprep.subr.mxu1 %v1924_v12  ;;  %2269 = vmatprep.subr.mxu0 %v1896_v57  ;;  %v1889_v12 = vld [vmem:[#allocation12 + $0x190] sm:$0xff] }
 0xf54   :  { %2313 = vmatpush1.msra.mxu1 %v1923_v14  ;;  %2270 = vmatpush2.msra.mxu0 %v1895_v26  ;;  %v1888_v14 = vld [vmem:[#allocation12 + $0x188] sm:$0xff]  ;;  %v1935_v26 = vld [vmem:[#allocation12 + $0x300] sm:$0xff] }
 0xf55   :  { %2314 = vmatprep.subr.mxu1 %v1922_v17  ;;  %2271 = vmatprep.subr.mxu0 %v1894_v15  ;;  %v1887_v17 = vld [vmem:[#allocation12 + $0x180] sm:$0xff] }
 0xf56   :  { %2315 = vmatpush1.msra.mxu1 %v1921_v21  ;;  %2272 = vmatpush2.msra.mxu0 %v1893_v58  ;;  %v1886_v21 = vld [vmem:[#allocation12 + $0x178] sm:$0xff] }
 0xf57   :  { %2316 = vmatprep.subr.mxu1 %v1920_v25  ;;  %2273 = vmatprep.subr.mxu0 %v1892_v59  ;;  %v1885_v25 = vld [vmem:[#allocation12 + $0x170] sm:$0xff] }
 0xf58   :  { %2317 = vmatpush1.msra.mxu1 %v1919_v33  ;;  %2274 = vmatpush2.msra.mxu0 %v1891_v63  ;;  %v1884_v33 = vld [vmem:[#allocation12 + $0x168] sm:$0xff] }
 0xf59   :  { %2318 = vmatprep.subr.mxu1 %v1918_v35  ;;  %2275 = vmatprep.subr.mxu0 %v1890_v7  ;;  %v1883_v35 = vld [vmem:[#allocation12 + $0x160] sm:$0xff] }
 0xf5a   :  { %2319 = vmatpush1.msra.mxu1 %v1917_v37  ;;  %2276 = vmatpush2.msra.mxu0 %v1889_v12  ;;  %v1882_v37 = vld [vmem:[#allocation12 + $0x158] sm:$0xff] }
 0xf5b   :  { %2320 = vmatprep.subr.mxu1 %v1916_v39  ;;  %2277 = vmatprep.subr.mxu0 %v1888_v14  ;;  %v1881_v39 = vld [vmem:[#allocation12 + $0x150] sm:$0xff] }
 0xf5c   :  { %2321 = vmatpush1.msra.mxu1 %v1915_v31  ;;  %2278 = vmatpush2.msra.mxu0 %v1887_v17  ;;  %v1880_v31 = vld [vmem:[#allocation12 + $0x148] sm:$0xff] }
 0xf5d   :  { %2322 = vmatprep.subr.mxu1 %v1914_v42  ;;  %2279 = vmatprep.subr.mxu0 %v1886_v21  ;;  %v1879_v42 = vld [vmem:[#allocation12 + $0x140] sm:$0xff]  ;;  %v1997_v21 = vld [vmem:[#allocation12 + $0x4f0] sm:$0xff] }
 0xf5e   :  { %2323 = vmatpush1.msra.mxu1 %v1913_v43  ;;  %2280 = vmatpush2.msra.mxu0 %v1885_v25  ;;  %v1878_v43 = vld [vmem:[#allocation12 + $0x138] sm:$0xff]  ;;  %v1995_v25 = vld [vmem:[#allocation12 + $0x4e0] sm:$0xff] }
 0xf5f   :  { %2324 = vmatprep.subr.mxu1 %v1912_v40  ;;  %2281 = vmatprep.subr.mxu0 %v1884_v33  ;;  %v1877_v40 = vld [vmem:[#allocation12 + $0x130] sm:$0xff]  ;;  %v1994_v33 = vld [vmem:[#allocation12 + $0x4d8] sm:$0xff] }
 0xf60   :  { %2325 = vmatpush1.msra.mxu1 %v1911_v32  ;;  %2282 = vmatpush2.msra.mxu0 %v1883_v35  ;;  %v1876_v32 = vld [vmem:[#allocation12 + $0x128] sm:$0xff] }
 0xf61   :  { %2326 = vmatprep.subr.mxu1 %v1910_v1  ;;  %2283 = vmatprep.subr.mxu0 %v1882_v37  ;;  %v1874_v1 = vld [vmem:[#allocation12 + $0x118] sm:$0xff]  ;;  %v1992_v35 = vld [vmem:[#allocation12 + $0x4c8] sm:$0xff] }
 0xf62   :  { %2327 = vmatpush1.msra.mxu1 %v1909_v46  ;;  %2284 = vmatpush2.msra.mxu0 %v1881_v39  ;;  %v1872_v46 = vld [vmem:[#allocation12 + $0x108] sm:$0xff] }
 0xf63   :  { %2328 = vmatprep.subr.mxu1 %v1908_v2  ;;  %2285 = vmatprep.subr.mxu0 %v1880_v31  ;;  %v1631_v2 = vpop.permute.xlu1 %1630 }
 0xf64   :  { %2329 = vmatpush1.msra.mxu1 %v1907_v49  ;;  %2286 = vmatpush2.msra.mxu0 %v1879_v42  ;;  %v2061_v42 = vld [vmem:[#allocation12 + $0x6f0] sm:$0xff] }
 0xf65   :  { %2330 = vmatprep.subr.mxu1 %v1906_v5  ;;  %2287 = vmatprep.subr.mxu0 %v1878_v43  ;;  %v1988_v43 = vld [vmem:[#allocation12 + $0x4a8] sm:$0xff] }
 0xf66   :  { %2331 = vmatpush1.msra.mxu1 %v1905_v52  ;;  %2288 = vmatpush2.msra.mxu0 %v1877_v40  ;;  %v1943_v52 = vld [vmem:[#allocation12 + $0x340] sm:$0xff] }
 0xf67   :  { %2332 = vmatprep.subr.mxu1 %v1904_v51  ;;  %2289 = vmatprep.subr.mxu0 %v1876_v32  ;;  %v1942_v51 = vld [vmem:[#allocation12 + $0x338] sm:$0xff]  ;;  %v1641_v29 = vpop.permute.xlu1 %1640  ;;  %v1987_v40 = vld [vmem:[#allocation12 + $0x4a0] sm:$0xff] }
 0xf68   :  { %2333 = vmatpush1.msra.mxu1 %v1903_v53  ;;  %2290 = vmatpush2.msra.mxu0 %v1875_v45  ;;  %v1941_v53 = vld [vmem:[#allocation12 + $0x330] sm:$0xff]  ;;  %v1986_v32 = vld [vmem:[#allocation12 + $0x498] sm:$0xff] }
 0xf69   :  { %2334 = vmatprep.subr.mxu1 %v1966_v54  ;;  %2291 = vmatprep.subr.mxu0 %v1874_v1  ;;  %v2058_v45 = vld [vmem:[#allocation12 + $0x6d8] sm:$0xff] }
 0xf6a   :  { %2335 = vmatpush2.msra.mxu1 %v1965_v55  ;;  %2292 = vmatpush2.msra.mxu0 %v1873_v24  ;;  %v1938_v55 = vld [vmem:[#allocation12 + $0x318] sm:$0xff]  ;;  %v1985_v24 = vld [vmem:[#allocation12 + $0x490] sm:$0xff] }
 0xf6b   :  { %2336 = vmatprep.subr.mxu1 %v1964_v56  ;;  %2293 = vmatprep.subr.mxu0 %v1872_v46  ;;  %v1937_v56 = vld [vmem:[#allocation12 + $0x310] sm:$0xff] }
 0xf6c   :  { %2337 = vmatpush2.msra.mxu1 %v1963_v11  ;;  %2294 = vmatpush2.msra.mxu0 %v1871_v20  ;;  %v1936_v11 = vld [vmem:[#allocation12 + $0x308] sm:$0xff]  ;;  %v2057_v46 = vld [vmem:[#allocation12 + $0x6d0] sm:$0xff] }
 0xf6d   :  { %2338 = vmatprep.subr.mxu1 %v1962_v27  ;;  %2373 = vmatprep.subr.mxu0 %v1998_v8  ;;  %v2062_v27 = vld [vmem:[#allocation12 + $0x6f8] sm:$0xff] }
 0xf6e   :  { %2339 = vmatpush2.msra.mxu1 %v1961_v61 }
 0xf6f   :  { %2340 = vmatprep.subr.mxu1 %v1960_v3 }
 0xf70   :  { %2341 = vmatpush2.msra.mxu1 %v1959_v60  ;;  %v1627_v60 = vld [vmem:[%s4641_s16 + $0x18] sm:$0xff]  ;;  %s3792_s16 = smov 44  }
 0xf71   :  { %2342 = vmatprep.subr.mxu1 %v1958_v4 }
 0xf72   :  { %2343 = vmatpush2.msra.mxu1 %v1957_v30 }
 0xf73   :  { %2344 = vmatprep.subr.mxu1 %v1956_v13 }
 0xf74   :  { %2345 = vmatpush2.msra.mxu1 %v1955_v62 }
 0xf75   :  { %2346 = vmatprep.subr.mxu1 %v1954_v19 }
 0xf76   :  { %2347 = vmatpush2.msra.mxu1 %v1953_v0  ;;  %v1996_v0 = vld [vmem:[#allocation12 + $0x4e8] sm:$0xff] }
 0xf77   :  { %2348 = vmatprep.subr.mxu1 %v1952_v22 }
 0xf78   :  { %2349 = vmatpush2.msra.mxu1 %v1951_v34  ;;  %v1993_v34 = vld [vmem:[#allocation12 + $0x4d0] sm:$0xff] }
 0xf79   :  { %2350 = vmatprep.subr.mxu1 %v1950_v36 }
 0xf7a   :  { %2351 = vmatpush2.msra.mxu1 %v1949_v38  ;;  %v1991_v38 = vld [vmem:[#allocation12 + $0x4c0] sm:$0xff] }
 0xf7b   :  { %2352 = vmatprep.subr.mxu1 %v1948_v41  ;;  %v1990_v41 = vld [vmem:[#allocation12 + $0x4b8] sm:$0xff] }
 0xf7c   :  { %2353 = vmatpush2.msra.mxu1 %v1947_v23  ;;  %v1989_v23 = vld [vmem:[#allocation12 + $0x4b0] sm:$0xff] }
 0xf7d   :  { %2354 = vmatprep.subr.mxu1 %v1946_v10 }
 0xf7e   :  { %2355 = vmatpush2.msra.mxu1 %v1945_v18  ;;  %v2060_v18 = vld [vmem:[#allocation12 + $0x6e8] sm:$0xff] }
 0xf7f   :  { %2356 = vmatprep.subr.mxu1 %v1944_v44  ;;  %v2059_v44 = vld [vmem:[#allocation12 + $0x6e0] sm:$0xff] }
 0xf80   :  { %2357 = vmatpush2.msra.mxu1 %v1943_v52  ;;  %v1981_v52 = vld [vmem:[#allocation12 + $0x470] sm:$0xff] }
 0xf81   :  { %2358 = vmatprep.subr.mxu1 %v1942_v51  ;;  %v2053_v51 = vld [vmem:[#allocation12 + $0x6b0] sm:$0xff] }
 0xf82   :  { %2359 = vmatpush2.msra.mxu1 %v1941_v53  ;;  %v1980_v53 = vld [vmem:[#allocation12 + $0x468] sm:$0xff] }
 0xf83   :  { %2360 = vmatprep.subr.mxu1 %v1940_v16  ;;  %v2052_v16 = vld [vmem:[#allocation12 + $0x6a8] sm:$0xff] }
 0xf84   :  { %2361 = vmatpush2.msra.mxu1 %v1939_v9  ;;  %v1979_v9 = vld [vmem:[#allocation12 + $0x460] sm:$0xff] }
 0xf85   :  { %2362 = vmatprep.subr.mxu1 %v1938_v55  ;;  %v2051_v55 = vld [vmem:[#allocation12 + $0x6a0] sm:$0xff] }
 0xf86   :  { %2363 = vmatpush2.msra.mxu1 %v1937_v56  ;;  %v2050_v56 = vld [vmem:[#allocation12 + $0x698] sm:$0xff] }
 0xf87   :  { %2364 = vmatprep.subr.mxu1 %v1936_v11  ;;  %v2049_v11 = vld [vmem:[#allocation12 + $0x690] sm:$0xff] }
 0xf88   :  { %2365 = vmatpush2.msra.mxu1 %v1935_v26 }
 0xf89   :  { %2444 = vmatprep.subr.mxu1 %v2062_v27  ;;  %v1976_v27 = vld [vmem:[#allocation12 + $0x448] sm:$0xff] }
0x1009   :  { %v3338_v47 = vpop.f32.mrf.mxu1 }
0x100a   :  { %v1732_v5 = vadd.f32 %v3338_v47, %v1636_v6  ;;  %v1984_v47 = vld [vmem:[#allocation12 + $0x488] sm:$0xff]  ;;  %v1982_v6 = vld [vmem:[#allocation12 + $0x478] sm:$0xff] }
0x100b   :  { %v1726_v48 = vpop.f32.mrf.mxu1 }
0x100c   :  { %v1727_v49 = vadd.f32 %v1726_v48, %v1631_v2  ;;  %v2056_v2 = vld [vmem:[#allocation12 + $0x6c8] sm:$0xff]  ;;  %v1983_v48 = vld [vmem:[#allocation12 + $0x480] sm:$0xff] }
0x100d   :  { %v4441_v50 = vpop.f32.mrf.mxu1 }
0x100e   :  { %3493 = vtanh.f32 %v1727_v49  ;;  %v2055_v49 = vld [vmem:[#allocation12 + $0x6c0] sm:$0xff] }
0x100f   :  { %3495 = vtanh.f32 %v1732_v5  ;;  %v1736_v54 = vpop.f32.mrf.mxu1  ;;  %v2054_v5 = vld [vmem:[#allocation12 + $0x6b8] sm:$0xff] }
0x1010   :  { %v1737_v57 = vadd.f32 %v1736_v54, %v1641_v29  ;;  %v1978_v29 = vld [vmem:[#allocation12 + $0x458] sm:$0xff] }
0x1012   :  { %3497 = vtanh.f32 %v1737_v57  ;;  %v1977_v57 = vld [vmem:[#allocation12 + $0x450] sm:$0xff] }
0x101b   :  { %v3494_v15 = vpop.eup %3493 }
0x101c   :  { %v1754_v61 = vrot.slane %v3494_v15, 4  ;;  %v1750_v58 = vrot.slane %v3494_v15, 2  ;;  %v1758_v3 = vrot.slane %v3494_v15, 6  ;;  %v3496_v59 = vpop.eup %3495 }
0x101d   :  { %v1766_v63 = vrot.slane %v3496_v59, 2  ;;  %v1774_v4 = vrot.slane %v3496_v59, 6  ;;  %v1770_v7 = vrot.slane %v3496_v59, 4 }
0x101e   :  { %1755 = vrot.lane.b32.xlu1 %v1754_v61, %s3783_s2  ;;  %1751 = vrot.lane.b32.xlu0 %v1750_v58, %s3784_s27  ;;  %v2048_v61 = vld [vmem:[#allocation12 + $0x688] sm:$0xff]  ;;  %v1975_v58 = vld [vmem:[#allocation12 + $0x440] sm:$0xff] }
0x101f   :  { %v4446_v30 = vpop.eup %3497 }
0x1020   :  { %v1782_v12 = vrot.slane %v4446_v30, 2  ;;  %v1786_v13 = vrot.slane %v4446_v30, 4 }
0x1022   :  { %1759 = vrot.lane.b32.xlu0 %v1758_v3, %s3785_s17  ;;  %1763 = vrot.lane.b32.xlu1 %v3496_v59, %s3786_s28  ;;  %v2047_v3 = vld [vmem:[#allocation12 + $0x680] sm:$0xff]  ;;  %v1974_v59 = vld [vmem:[#allocation12 + $0x438] sm:$0xff] }
0x1026   :  { %1645 = vperm.xlu1 %3448, %v1627_v60   ;;  %1767 = vrot.lane.b32.xlu0 %v1766_v63, %s3787_s5 }
0x102a   :  { %1775 = vrot.lane.b32.xlu1 %v1774_v4, %s3788_s4  ;;  %1771 = vrot.lane.b32.xlu0 %v1770_v7, %s3789_s15  ;;  %v2046_v4 = vld [vmem:[#allocation12 + $0x678] sm:$0xff]  ;;  %v1973_v7 = vld [vmem:[#allocation12 + $0x430] sm:$0xff] }
0x102e   :  { %1783 = vrot.lane.b32.xlu1 %v1782_v12, %s3790_s19  ;;  %1779 = vrot.lane.b32.xlu0 %v4446_v30, %s3791_s29  ;;  %v2045_v12 = vld [vmem:[#allocation12 + $0x670] sm:$0xff] }
0x1032   :  { %1787 = vrot.lane.b32.xlu0 %v1786_v13, %s3792_s16 }
0x1090   :  { %v1756_v14 = vpop.permute.xlu1 %1755  ;;  %v1752_v62 = vpop.permute.xlu0 %1751 }
0x1091   :  { %v1810_v17 = vsel %vm241_vm0, %v3494_v15, %v1752_v62  ;;  %v1812_v19 = vsel %vm1811_vm12, %v1752_v62, %v1756_v14  ;;  %vm1821_vm0 = vcmask 146432   ;;  %v2044_v62 = vld [vmem:[#allocation12 + $0x668] sm:$0xff]  ;;  %vm3001_vm12 = vcmask 64512  }
0x1092   :  { %2295 = vmatprep.mubr.f32.mxu0 %v1812_v19  ;;  %v2043_v19 = vld [vmem:[#allocation12 + $0x660] sm:$0xff] }
0x1093   :  { %2296 = vmatmul.mubr.f32.vlgmr.msra.gmra.mxu0 %v1810_v17  ;;  %v1971_v17 = vld [vmem:[#allocation12 + $0x420] sm:$0xff] }
0x1094   :  { %2374 = vmatpush1.msra.mxu0 %v1997_v21  ;;  %v1760_v22 = vpop.permute.xlu0 %1759  ;;  %v1764_v36 = vpop.permute.xlu1 %1763  ;;  %v1970_v21 = vld [vmem:[#allocation12 + $0x418] sm:$0xff] }
0x1095   :  { %2375 = vmatprep.subr.mxu0 %v1996_v0  ;;  %v1814_v37 = vsel %vm1813_vm13, %v1756_v14, %v1760_v22  ;;  %v1972_v14 = vld [vmem:[#allocation12 + $0x428] sm:$0xff]  ;;  %v2042_v0 = vld [vmem:[#allocation12 + $0x658] sm:$0xff]  ;;  %v2041_v22 = vld [vmem:[#allocation12 + $0x650] sm:$0xff]  ;;  %vm3003_vm13 = vcmask 123904  }
0x1096   :  { %2376 = vmatpush1.msra.mxu0 %v1995_v25  ;;  %v1816_v10 = vsel %vm1815_vm15, %v1814_v37, %v1764_v36  ;;  %v1969_v25 = vld [vmem:[#allocation12 + $0x410] sm:$0xff] }
0x1097   :  { %2377 = vmatprep.subr.mxu0 %v1994_v33  ;;  %v1968_v33 = vld [vmem:[#allocation12 + $0x408] sm:$0xff] }
0x1098   :  { %2378 = vmatpush1.msra.mxu0 %v1993_v34  ;;  %v4452_v39 = vpop.permute.xlu0 %1767  ;;  %v2040_v34 = vld [vmem:[#allocation12 + $0x648] sm:$0xff] }
0x1099   :  { %2379 = vmatprep.subr.mxu0 %v1992_v35  ;;  %v1818_v31 = vsel %vm1817_vm14, %v1764_v36, %v4452_v39  ;;  %v1967_v35 = vld [vmem:[#allocation12 + $0x400] sm:$0xff] }
0x109a   :  { %2380 = vmatpush1.msra.mxu0 %v1991_v38  ;;  %2366 = vmatprep.mubr.f32.mxu1 %v1818_v31  ;;  %v2039_v36 = vld [vmem:[#allocation12 + $0x640] sm:$0xff]  ;;  %v2030_v38 = vld [vmem:[#allocation12 + $0x5f8] sm:$0xff]  ;;  %v2029_v31 = vld [vmem:[#allocation12 + $0x5f0] sm:$0xff] }
0x109b   :  { %2381 = vmatprep.subr.mxu0 %v1990_v41  ;;  %2367 = vmatmul.mubr.f32.vlgmr.msra.gmra.mxu1 %v1816_v10  ;;  %v2038_v41 = vld [vmem:[#allocation12 + $0x638] sm:$0xff]  ;;  %v2028_v10 = vld [vmem:[#allocation12 + $0x5e8] sm:$0xff] }
0x109c   :  { %2382 = vmatpush1.msra.mxu0 %v1989_v23  ;;  %2445 = vmatpush1.msra.mxu1 %v2061_v42  ;;  %v4455_v1 = vpop.permute.xlu0 %1771  ;;  %v2037_v42 = vld [vmem:[#allocation12 + $0x630] sm:$0xff] }
0x109d   :  { %2383 = vmatprep.subr.mxu0 %v1988_v43  ;;  %2446 = vmatprep.subr.mxu1 %v2060_v18  ;;  %v2036_v43 = vld [vmem:[#allocation12 + $0x628] sm:$0xff]  ;;  %v2027_v18 = vld [vmem:[#allocation12 + $0x5e0] sm:$0xff] }
0x109e   :  { %2384 = vmatpush1.msra.mxu0 %v1987_v40  ;;  %2447 = vmatpush1.msra.mxu1 %v2059_v44  ;;  %v2035_v40 = vld [vmem:[#allocation12 + $0x620] sm:$0xff]  ;;  %v2026_v44 = vld [vmem:[#allocation12 + $0x5d8] sm:$0xff] }
0x109f   :  { %2385 = vmatprep.subr.mxu0 %v1986_v32  ;;  %2448 = vmatprep.subr.mxu1 %v2058_v45  ;;  %v2034_v45 = vld [vmem:[#allocation12 + $0x618] sm:$0xff] }
0x10a0   :  { %2386 = vmatpush1.msra.mxu0 %v1985_v24  ;;  %2449 = vmatpush1.msra.mxu1 %v2057_v46  ;;  %v4458_v54 = vpop.permute.xlu0 %1779  ;;  %v2025_v24 = vld [vmem:[#allocation12 + $0x5d0] sm:$0xff] }
0x10a1   :  { %2387 = vmatprep.subr.mxu0 %v1984_v47  ;;  %2450 = vmatprep.subr.mxu1 %v2056_v2  ;;  %v1646_v20 = vpop.permute.xlu1 %1645  ;;  %v2033_v46 = vld [vmem:[#allocation12 + $0x610] sm:$0xff]  ;;  %v1790_v47 = vrot.slane %v4446_v30, 6  ;;  %v2024_v2 = vld [vmem:[#allocation12 + $0x5c8] sm:$0xff] }
0x10a2   :  { %v1742_v8 = vadd.f32 %v4441_v50, %v1646_v20  ;;  %2388 = vmatpush1.msra.mxu0 %v1983_v48  ;;  %2451 = vmatpush1.msra.mxu1 %v2055_v49  ;;  %v2032_v48 = vld [vmem:[#allocation12 + $0x608] sm:$0xff]  ;;  %v2023_v49 = vld [vmem:[#allocation12 + $0x5c0] sm:$0xff]  ;;  %v2094_v20 = vld [vmem:[#allocation12 + $0x7f8] sm:$0xff] }
0x10a3   :  { %2389 = vmatprep.subr.mxu0 %v1982_v6  ;;  %2452 = vmatprep.subr.mxu1 %v2054_v5  ;;  %v2031_v6 = vld [vmem:[#allocation12 + $0x600] sm:$0xff]  ;;  %v2022_v5 = vld [vmem:[#allocation12 + $0x5b8] sm:$0xff] }
0x10a4   :  { %3499 = vtanh.f32 %v1742_v8  ;;  %2390 = vmatpush1.msra.mxu0 %v1981_v52  ;;  %2453 = vmatpush1.msra.mxu1 %v2053_v51  ;;  %v4462_v60 = vpop.permute.xlu0 %1787  ;;  %v2021_v52 = vld [vmem:[#allocation12 + $0x5b0] sm:$0xff]  ;;  %v2020_v8 = vld [vmem:[#allocation12 + $0x5a8] sm:$0xff] }
0x10a5   :  { %2391 = vmatprep.subr.mxu0 %v1980_v53  ;;  %2454 = vmatprep.subr.mxu1 %v2052_v16  ;;  %v1776_v50 = vpop.permute.xlu1 %1775  ;;  %v2093_v51 = vld [vmem:[#allocation12 + $0x7f0] sm:$0xff]  ;;  %v2092_v53 = vld [vmem:[#allocation12 + $0x7e8] sm:$0xff]  ;;  %v2019_v16 = vld [vmem:[#allocation12 + $0x5a0] sm:$0xff] }
0x10a6   :  { %v1822_v26 = vsel %vm1821_vm0, %v4455_v1, %v1776_v50  ;;  %2392 = vmatpush1.msra.mxu0 %v1979_v9  ;;  %2455 = vmatpush1.msra.mxu1 %v2051_v55  ;;  %v2091_v9 = vld [vmem:[#allocation12 + $0x7e0] sm:$0xff]  ;;  %v2018_v55 = vld [vmem:[#allocation12 + $0x598] sm:$0xff]  ;;  %v2089_v50 = vld [vmem:[#allocation12 + $0x7d0] sm:$0xff] }
0x10a7   :  { %2393 = vmatprep.subr.mxu0 %v1978_v29  ;;  %2456 = vmatprep.subr.mxu1 %v2050_v56  ;;  %v1824_v15 = vsel %vm1823_vm1, %v1822_v26, %v4458_v54  ;;  %v2090_v29 = vld [vmem:[#allocation12 + $0x7d8] sm:$0xff]  ;;  %v2017_v56 = vld [vmem:[#allocation12 + $0x590] sm:$0xff]  ;;  %v2015_v26 = vld [vmem:[#allocation12 + $0x580] sm:$0xff] }
0x10a8   :  { %2394 = vmatpush1.msra.mxu0 %v1977_v57  ;;  %2457 = vmatpush1.msra.mxu1 %v2049_v11  ;;  %v2016_v57 = vld [vmem:[#allocation12 + $0x588] sm:$0xff] }
0x10a9   :  { %2395 = vmatprep.subr.mxu0 %v1976_v27  ;;  %2437 = vmatprep.mubr.f32.mxu0 %v1824_v15  ;;  %v4464_v63 = vpop.permute.xlu1 %1783  ;;  %v2088_v11 = vld [vmem:[#allocation12 + $0x7c8] sm:$0xff]  ;;  %v2087_v27 = vld [vmem:[#allocation12 + $0x7c0] sm:$0xff]  ;;  %v2014_v15 = vld [vmem:[#allocation12 + $0x578] sm:$0xff] }
0x10aa   :  { %2458 = vmatprep.subr.mxu1 %v2048_v61  ;;  %2396 = vmatpush1.msra.mxu0 %v1975_v58  ;;  %v1828_v13 = vsel %vm1827_vm2, %v4464_v63, %v4462_v60  ;;  %v2086_v61 = vld [vmem:[#allocation12 + $0x7b8] sm:$0xff]  ;;  %v2013_v58 = vld [vmem:[#allocation12 + $0x570] sm:$0xff] }
0x10ab   :  { %2459 = vmatpush1.msra.mxu1 %v2047_v3  ;;  %2397 = vmatprep.subr.mxu0 %v1974_v59  ;;  %v2085_v3 = vld [vmem:[#allocation12 + $0x7b0] sm:$0xff]  ;;  %v2012_v59 = vld [vmem:[#allocation12 + $0x568] sm:$0xff] }
0x10ac   :  { %2460 = vmatprep.subr.mxu1 %v2046_v4  ;;  %2398 = vmatpush1.msra.mxu0 %v1973_v7  ;;  %v2084_v4 = vld [vmem:[#allocation12 + $0x7a8] sm:$0xff]  ;;  %v2011_v7 = vld [vmem:[#allocation12 + $0x560] sm:$0xff] }
0x10ad   :  { %2461 = vmatpush1.msra.mxu1 %v2045_v12  ;;  %2508 = vmatprep.mubr.f32.mxu1 %v1828_v13  ;;  %v2083_v12 = vld [vmem:[#allocation12 + $0x7a0] sm:$0xff]  ;;  %v2010_v13 = vld [vmem:[#allocation12 + $0x558] sm:$0xff] }
0x10ae   :  { %2399 = vmatprep.subr.mxu0 %v1972_v14  ;;  %2462 = vmatprep.subr.mxu1 %v2044_v62  ;;  %v2082_v14 = vld [vmem:[#allocation12 + $0x798] sm:$0xff]  ;;  %v2009_v62 = vld [vmem:[#allocation12 + $0x550] sm:$0xff] }
0x10af   :  { %2400 = vmatpush1.msra.mxu0 %v1971_v17  ;;  %2463 = vmatpush1.msra.mxu1 %v2043_v19  ;;  %v2081_v17 = vld [vmem:[#allocation12 + $0x790] sm:$0xff]  ;;  %v2008_v19 = vld [vmem:[#allocation12 + $0x548] sm:$0xff] }
0x10b0   :  { %2401 = vmatprep.subr.mxu0 %v1970_v21  ;;  %2464 = vmatprep.subr.mxu1 %v2042_v0  ;;  %v2080_v21 = vld [vmem:[#allocation12 + $0x788] sm:$0xff]  ;;  %v2007_v0 = vld [vmem:[#allocation12 + $0x540] sm:$0xff] }
0x10b1   :  { %v4468_v37 = vpop.eup %3499  ;;  %2402 = vmatpush1.msra.mxu0 %v1969_v25  ;;  %2465 = vmatpush1.msra.mxu1 %v2041_v22  ;;  %v2079_v25 = vld [vmem:[#allocation12 + $0x780] sm:$0xff]  ;;  %v2006_v22 = vld [vmem:[#allocation12 + $0x538] sm:$0xff] }
0x10b2   :  { %2403 = vmatprep.subr.mxu0 %v1968_v33  ;;  %2466 = vmatprep.subr.mxu1 %v2040_v34  ;;  %v1798_v23 = vrot.slane %v4468_v37, 2  ;;  %v1802_v32 = vrot.slane %v4468_v37, 4  ;;  %v1806_v30 = vrot.slane %v4468_v37, 6  ;;  %v2078_v33 = vld [vmem:[#allocation12 + $0x778] sm:$0xff]  ;;  %v2005_v34 = vld [vmem:[#allocation12 + $0x530] sm:$0xff] }
0x10b3   :  { %2404 = vmatpush1.msra.mxu0 %v1967_v35  ;;  %2467 = vmatpush1.msra.mxu1 %v2039_v36  ;;  %v2077_v35 = vld [vmem:[#allocation12 + $0x770] sm:$0xff]  ;;  %v2004_v36 = vld [vmem:[#allocation12 + $0x528] sm:$0xff] }
0x10b4   :  { %1795 = vrot.lane.b32.xlu0 %v4468_v37, %s3793_s22  ;;  %2405 = vmatprep.subr.mxu0 %v2030_v38  ;;  %v2076_v37 = vld [vmem:[#allocation12 + $0x768] sm:$0xff]  ;;  %v2003_v38 = vld [vmem:[#allocation12 + $0x520] sm:$0xff] }
0x10b5   :  { %2468 = vmatprep.subr.mxu1 %v2038_v41  ;;  %2406 = vmatpush2.msra.mxu0 %v2029_v31  ;;  %v2075_v41 = vld [vmem:[#allocation12 + $0x760] sm:$0xff]  ;;  %v2002_v31 = vld [vmem:[#allocation12 + $0x518] sm:$0xff] }
0x10b6   :  { %2469 = vmatpush1.msra.mxu1 %v2037_v42  ;;  %1799 = vrot.lane.b32.xlu1 %v1798_v23, %s3794_s18  ;;  %v2074_v23 = vld [vmem:[#allocation12 + $0x758] sm:$0xff]  ;;  %v2001_v42 = vld [vmem:[#allocation12 + $0x510] sm:$0xff] }
0x10b7   :  { %2407 = vmatprep.subr.mxu0 %v2028_v10  ;;  %2470 = vmatprep.subr.mxu1 %v2036_v43  ;;  %v2073_v10 = vld [vmem:[#allocation12 + $0x750] sm:$0xff]  ;;  %v2000_v43 = vld [vmem:[#allocation12 + $0x508] sm:$0xff] }
0x10b8   :  { %2408 = vmatpush2.msra.mxu0 %v2027_v18  ;;  %2471 = vmatpush1.msra.mxu1 %v2035_v40  ;;  %v2072_v18 = vld [vmem:[#allocation12 + $0x748] sm:$0xff]  ;;  %v1999_v40 = vld [vmem:[#allocation12 + $0x500] sm:$0xff] }
0x10b9   :  { %1803 = vrot.lane.b32.xlu0 %v1802_v32, %s3795_s6  ;;  %2409 = vmatprep.subr.mxu0 %v2026_v44  ;;  %v2071_v44 = vld [vmem:[#allocation12 + $0x740] sm:$0xff]  ;;  %v2070_v32 = vld [vmem:[#allocation12 + $0x738] sm:$0xff] }
0x10ba   :  { %2472 = vmatprep.subr.mxu1 %v2034_v45  ;;  %2410 = vmatpush2.msra.mxu0 %v2025_v24  ;;  %v2126_v45 = vld [vmem:[#allocation12 + $0x8f8] sm:$0xff]  ;;  %v1820_v24 = vsel %vm1819_vm3, %v4452_v39, %v4455_v1  ;;  %v2121_v39 = vld [vmem:[#allocation12 + $0x8d0] sm:$0xff]  ;;  %v2064_v1 = vld [vmem:[#allocation12 + $0x708] sm:$0xff] }
0x10bb   :  { %2473 = vmatpush1.msra.mxu1 %v2033_v46  ;;  %1791 = vrot.lane.b32.xlu1 %v1790_v47, %s3796_s24  ;;  %v2069_v46 = vld [vmem:[#allocation12 + $0x730] sm:$0xff] }
0x10bc   :  { %2411 = vmatprep.subr.mxu0 %v2024_v2  ;;  %2474 = vmatprep.subr.mxu1 %v2032_v48  ;;  %v2125_v47 = vld [vmem:[#allocation12 + $0x8f0] sm:$0xff]  ;;  %v2068_v2 = vld [vmem:[#allocation12 + $0x728] sm:$0xff] }
0x10bd   :  { %2412 = vmatpush2.msra.mxu0 %v2023_v49  ;;  %2475 = vmatpush1.msra.mxu1 %v2031_v6  ;;  %v2124_v48 = vld [vmem:[#allocation12 + $0x8e8] sm:$0xff]  ;;  %v2067_v49 = vld [vmem:[#allocation12 + $0x720] sm:$0xff] }
0x10be   :  { %2413 = vmatprep.subr.mxu0 %v2022_v5  ;;  %2476 = vmatprep.subr.mxu1 %v2094_v20  ;;  %v2123_v6 = vld [vmem:[#allocation12 + $0x8e0] sm:$0xff]  ;;  %v2066_v5 = vld [vmem:[#allocation12 + $0x718] sm:$0xff] }
0x10bf   :  { %2414 = vmatpush2.msra.mxu0 %v2021_v52  ;;  %2477 = vmatpush2.msra.mxu1 %v2093_v51  ;;  %v2122_v20 = vld [vmem:[#allocation12 + $0x8d8] sm:$0xff]  ;;  %v2065_v52 = vld [vmem:[#allocation12 + $0x710] sm:$0xff]  ;;  %v2120_v51 = vld [vmem:[#allocation12 + $0x8c8] sm:$0xff] }
0x10c0   :  { %1807 = vrot.lane.b32.xlu1 %v1806_v30, %s3797_s7  ;;  %2415 = vmatprep.subr.mxu0 %v2020_v8  ;;  %v2063_v8 = vld [vmem:[#allocation12 + $0x700] sm:$0xff] }
0x10c1   :  { %2478 = vmatprep.subr.mxu1 %v2092_v53  ;;  %2416 = vmatpush2.msra.mxu0 %v2019_v16  ;;  %v2119_v30 = vld [vmem:[#allocation12 + $0x8c0] sm:$0xff]  ;;  %v2118_v53 = vld [vmem:[#allocation12 + $0x8b8] sm:$0xff]  ;;  %v2117_v16 = vld [vmem:[#allocation12 + $0x8b0] sm:$0xff] }
0x10c2   :  { %2479 = vmatpush2.msra.mxu1 %v2091_v9  ;;  %2417 = vmatprep.subr.mxu0 %v2018_v55  ;;  %v2190_v9 = vld [vmem:[#allocation12 + $0xaf8] sm:$0xff]  ;;  %v1826_v55 = vsel %vm1825_vm4, %v4458_v54, %v4464_v63  ;;  %v2185_v54 = vld [vmem:[#allocation12 + $0xad0] sm:$0xff]  ;;  %v2111_v63 = vld [vmem:[#allocation12 + $0x880] sm:$0xff] }
0x10c3   :  { %2480 = vmatprep.subr.mxu1 %v2090_v29  ;;  %2418 = vmatpush2.msra.mxu0 %v2017_v56  ;;  %v2116_v29 = vld [vmem:[#allocation12 + $0x8a8] sm:$0xff]  ;;  %v2189_v56 = vld [vmem:[#allocation12 + $0xaf0] sm:$0xff] }
0x10c4   :  { %2481 = vmatpush2.msra.mxu1 %v2089_v50  ;;  %2419 = vmatprep.subr.mxu0 %v2016_v57  ;;  %v2115_v50 = vld [vmem:[#allocation12 + $0x8a0] sm:$0xff]  ;;  %v2188_v57 = vld [vmem:[#allocation12 + $0xae8] sm:$0xff] }
0x10c5   :  { %2482 = vmatprep.subr.mxu1 %v2088_v11  ;;  %2420 = vmatpush2.msra.mxu0 %v2015_v26  ;;  %v2114_v11 = vld [vmem:[#allocation12 + $0x898] sm:$0xff]  ;;  %v2187_v26 = vld [vmem:[#allocation12 + $0xae0] sm:$0xff] }
0x10c6   :  { %2483 = vmatpush2.msra.mxu1 %v2087_v27  ;;  %2421 = vmatprep.subr.mxu0 %v2014_v15  ;;  %v2113_v27 = vld [vmem:[#allocation12 + $0x890] sm:$0xff]  ;;  %v2186_v15 = vld [vmem:[#allocation12 + $0xad8] sm:$0xff] }
0x10c7   :  { %2484 = vmatprep.subr.mxu1 %v2086_v61  ;;  %2422 = vmatpush2.msra.mxu0 %v2013_v58  ;;  %v2112_v61 = vld [vmem:[#allocation12 + $0x888] sm:$0xff] }
0x10c8   :  { %2485 = vmatpush2.msra.mxu1 %v2085_v3  ;;  %2423 = vmatprep.subr.mxu0 %v2012_v59  ;;  %v2184_v58 = vld [vmem:[#allocation12 + $0xac8] sm:$0xff]  ;;  %v2110_v3 = vld [vmem:[#allocation12 + $0x878] sm:$0xff]  ;;  %v2183_v59 = vld [vmem:[#allocation12 + $0xac0] sm:$0xff] }
0x10c9   :  { %2486 = vmatprep.subr.mxu1 %v2084_v4  ;;  %2424 = vmatpush2.msra.mxu0 %v2011_v7  ;;  %v2109_v4 = vld [vmem:[#allocation12 + $0x870] sm:$0xff]  ;;  %v2182_v7 = vld [vmem:[#allocation12 + $0xab8] sm:$0xff] }
0x10ca   :  { %2487 = vmatpush2.msra.mxu1 %v2083_v12  ;;  %2425 = vmatprep.subr.mxu0 %v2010_v13  ;;  %v2108_v12 = vld [vmem:[#allocation12 + $0x868] sm:$0xff]  ;;  %v2181_v13 = vld [vmem:[#allocation12 + $0xab0] sm:$0xff] }
0x10cb   :  { %2488 = vmatprep.subr.mxu1 %v2082_v14  ;;  %2426 = vmatpush2.msra.mxu0 %v2009_v62  ;;  %v2107_v14 = vld [vmem:[#allocation12 + $0x860] sm:$0xff]  ;;  %v2180_v62 = vld [vmem:[#allocation12 + $0xaa8] sm:$0xff] }
0x10cc   :  { %2489 = vmatpush2.msra.mxu1 %v2081_v17  ;;  %2427 = vmatprep.subr.mxu0 %v2008_v19  ;;  %v2106_v17 = vld [vmem:[#allocation12 + $0x858] sm:$0xff]  ;;  %v2179_v19 = vld [vmem:[#allocation12 + $0xaa0] sm:$0xff] }
0x10cd   :  { %2490 = vmatprep.subr.mxu1 %v2080_v21  ;;  %2428 = vmatpush2.msra.mxu0 %v2007_v0  ;;  %v2105_v21 = vld [vmem:[#allocation12 + $0x850] sm:$0xff]  ;;  %v2178_v0 = vld [vmem:[#allocation12 + $0xa98] sm:$0xff] }
0x10ce   :  { %2491 = vmatpush2.msra.mxu1 %v2079_v25  ;;  %2429 = vmatprep.subr.mxu0 %v2006_v22  ;;  %v2104_v25 = vld [vmem:[#allocation12 + $0x848] sm:$0xff]  ;;  %v2177_v22 = vld [vmem:[#allocation12 + $0xa90] sm:$0xff] }
0x10cf   :  { %2492 = vmatprep.subr.mxu1 %v2078_v33  ;;  %2430 = vmatpush2.msra.mxu0 %v2005_v34  ;;  %v2103_v33 = vld [vmem:[#allocation12 + $0x840] sm:$0xff]  ;;  %v2176_v34 = vld [vmem:[#allocation12 + $0xa88] sm:$0xff] }
0x10d0   :  { %2493 = vmatpush2.msra.mxu1 %v2077_v35  ;;  %2431 = vmatprep.subr.mxu0 %v2004_v36  ;;  %v2102_v35 = vld [vmem:[#allocation12 + $0x838] sm:$0xff]  ;;  %v2175_v36 = vld [vmem:[#allocation12 + $0xa80] sm:$0xff] }
0x10d1   :  { %2494 = vmatprep.subr.mxu1 %v2076_v37  ;;  %2432 = vmatpush2.msra.mxu0 %v2003_v38  ;;  %v2101_v37 = vld [vmem:[#allocation12 + $0x830] sm:$0xff]  ;;  %v2174_v38 = vld [vmem:[#allocation12 + $0xa78] sm:$0xff] }
0x10d2   :  { %2495 = vmatpush2.msra.mxu1 %v2075_v41  ;;  %2433 = vmatprep.subr.mxu0 %v2002_v31  ;;  %v2100_v41 = vld [vmem:[#allocation12 + $0x828] sm:$0xff]  ;;  %v2173_v31 = vld [vmem:[#allocation12 + $0xa70] sm:$0xff] }
0x10d3   :  { %2496 = vmatprep.subr.mxu1 %v2074_v23  ;;  %2434 = vmatpush2.msra.mxu0 %v2001_v42  ;;  %v2099_v23 = vld [vmem:[#allocation12 + $0x820] sm:$0xff]  ;;  %v2172_v42 = vld [vmem:[#allocation12 + $0xa68] sm:$0xff] }
0x10d4   :  { %2497 = vmatpush2.msra.mxu1 %v2073_v10  ;;  %2435 = vmatprep.subr.mxu0 %v2000_v43  ;;  %v2098_v10 = vld [vmem:[#allocation12 + $0x818] sm:$0xff]  ;;  %v2171_v43 = vld [vmem:[#allocation12 + $0xa60] sm:$0xff] }
0x10d5   :  { %2498 = vmatprep.subr.mxu1 %v2072_v18  ;;  %2436 = vmatpush2.msra.mxu0 %v1999_v40  ;;  %v2097_v18 = vld [vmem:[#allocation12 + $0x810] sm:$0xff]  ;;  %v2170_v40 = vld [vmem:[#allocation12 + $0xa58] sm:$0xff] }
0x10d6   :  { %2499 = vmatpush2.msra.mxu1 %v2071_v44  ;;  %2438 = vmatmul.mubr.f32.vlgmr.msra.gmra.mxu0 %v1820_v24  ;;  %v2096_v44 = vld [vmem:[#allocation12 + $0x808] sm:$0xff] }
0x10d7   :  { %2500 = vmatprep.subr.mxu1 %v2070_v32  ;;  %2515 = vmatprep.subr.mxu0 %v2126_v45  ;;  %v2169_v32 = vld [vmem:[#allocation12 + $0xa50] sm:$0xff]  ;;  %v2095_v45 = vld [vmem:[#allocation12 + $0x800] sm:$0xff]  ;;  %v2168_v24 = vld [vmem:[#allocation12 + $0xa48] sm:$0xff] }
0x10d8   :  { %2501 = vmatpush2.msra.mxu1 %v2069_v46  ;;  %2516 = vmatpush1.msra.mxu0 %v2125_v47  ;;  %v2158_v46 = vld [vmem:[#allocation12 + $0x9f8] sm:$0xff]  ;;  %v2167_v47 = vld [vmem:[#allocation12 + $0xa40] sm:$0xff] }
0x10d9   :  { %2502 = vmatprep.subr.mxu1 %v2068_v2  ;;  %2517 = vmatprep.subr.mxu0 %v2124_v48  ;;  %v2157_v2 = vld [vmem:[#allocation12 + $0x9f0] sm:$0xff]  ;;  %v2166_v48 = vld [vmem:[#allocation12 + $0xa38] sm:$0xff] }
0x10da   :  { %2503 = vmatpush2.msra.mxu1 %v2067_v49  ;;  %2518 = vmatpush1.msra.mxu0 %v2123_v6  ;;  %v2156_v49 = vld [vmem:[#allocation12 + $0x9e8] sm:$0xff]  ;;  %v2165_v6 = vld [vmem:[#allocation12 + $0xa30] sm:$0xff] }
0x10db   :  { %2504 = vmatprep.subr.mxu1 %v2066_v5  ;;  %2519 = vmatprep.subr.mxu0 %v2122_v20  ;;  %v2155_v5 = vld [vmem:[#allocation12 + $0x9e0] sm:$0xff]  ;;  %v2164_v20 = vld [vmem:[#allocation12 + $0xa28] sm:$0xff] }
0x10dc   :  { %2505 = vmatpush2.msra.mxu1 %v2065_v52  ;;  %2520 = vmatpush1.msra.mxu0 %v2121_v39  ;;  %v2154_v52 = vld [vmem:[#allocation12 + $0x9d8] sm:$0xff]  ;;  %v2163_v39 = vld [vmem:[#allocation12 + $0xa20] sm:$0xff] }
0x10dd   :  { %2506 = vmatprep.subr.mxu1 %v2064_v1  ;;  %2521 = vmatprep.subr.mxu0 %v2120_v51  ;;  %v2153_v1 = vld [vmem:[#allocation12 + $0x9d0] sm:$0xff]  ;;  %v2162_v51 = vld [vmem:[#allocation12 + $0xa18] sm:$0xff] }
0x10de   :  { %2507 = vmatpush2.msra.mxu1 %v2063_v8  ;;  %2522 = vmatpush1.msra.mxu0 %v2119_v30  ;;  %v2152_v8 = vld [vmem:[#allocation12 + $0x9c8] sm:$0xff]  ;;  %v2161_v30 = vld [vmem:[#allocation12 + $0xa10] sm:$0xff] }
0x10df   :  { %2509 = vmatmul.mubr.f32.vlgmr.msra.gmra.mxu1 %v1826_v55  ;;  %2523 = vmatprep.subr.mxu0 %v2118_v53  ;;  %v2151_v53 = vld [vmem:[#allocation12 + $0x9c0] sm:$0xff] }
0x10e0   :  { %2524 = vmatpush1.msra.mxu0 %v2117_v16  ;;  %2586 = vmatprep.subr.mxu1 %v2190_v9  ;;  %v2160_v16 = vld [vmem:[#allocation12 + $0xa08] sm:$0xff]  ;;  %v2150_v9 = vld [vmem:[#allocation12 + $0x9b8] sm:$0xff]  ;;  %v2159_v55 = vld [vmem:[#allocation12 + $0xa00] sm:$0xff] }
0x10e1   :  { %2525 = vmatprep.subr.mxu0 %v2116_v29  ;;  %2587 = vmatpush1.msra.mxu1 %v2189_v56  ;;  %v2149_v29 = vld [vmem:[#allocation12 + $0x9b0] sm:$0xff]  ;;  %v2214_v56 = vld [vmem:[#allocation12 + $0xbb8] sm:$0xff] }
0x10e2   :  { %2526 = vmatpush1.msra.mxu0 %v2115_v50  ;;  %2588 = vmatprep.subr.mxu1 %v2188_v57  ;;  %v2148_v50 = vld [vmem:[#allocation12 + $0x9a8] sm:$0xff]  ;;  %v2213_v57 = vld [vmem:[#allocation12 + $0xbb0] sm:$0xff] }
0x10e3   :  { %2527 = vmatprep.subr.mxu0 %v2114_v11  ;;  %2589 = vmatpush1.msra.mxu1 %v2187_v26  ;;  %v2147_v11 = vld [vmem:[#allocation12 + $0x9a0] sm:$0xff]  ;;  %v2212_v26 = vld [vmem:[#allocation12 + $0xba8] sm:$0xff] }
0x10e4   :  { %2528 = vmatpush1.msra.mxu0 %v2113_v27  ;;  %2590 = vmatprep.subr.mxu1 %v2186_v15  ;;  %v2146_v27 = vld [vmem:[#allocation12 + $0x998] sm:$0xff]  ;;  %v2211_v15 = vld [vmem:[#allocation12 + $0xba0] sm:$0xff] }
0x10e5   :  { %2529 = vmatprep.subr.mxu0 %v2112_v61  ;;  %2591 = vmatpush1.msra.mxu1 %v2185_v54  ;;  %v2145_v61 = vld [vmem:[#allocation12 + $0x990] sm:$0xff]  ;;  %v2210_v54 = vld [vmem:[#allocation12 + $0xb98] sm:$0xff] }
0x10e6   :  { %2530 = vmatpush1.msra.mxu0 %v2111_v63  ;;  %2592 = vmatprep.subr.mxu1 %v2184_v58  ;;  %v2144_v63 = vld [vmem:[#allocation12 + $0x988] sm:$0xff]  ;;  %v2209_v58 = vld [vmem:[#allocation12 + $0xb90] sm:$0xff] }
0x10e7   :  { %2531 = vmatprep.subr.mxu0 %v2110_v3  ;;  %2593 = vmatpush1.msra.mxu1 %v2183_v59  ;;  %v2143_v3 = vld [vmem:[#allocation12 + $0x980] sm:$0xff]  ;;  %v2208_v59 = vld [vmem:[#allocation12 + $0xb88] sm:$0xff] }
0x10e8   :  { %2532 = vmatpush1.msra.mxu0 %v2109_v4  ;;  %2594 = vmatprep.subr.mxu1 %v2182_v7  ;;  %v2142_v4 = vld [vmem:[#allocation12 + $0x978] sm:$0xff]  ;;  %v2207_v7 = vld [vmem:[#allocation12 + $0xb80] sm:$0xff] }
0x10e9   :  { %2533 = vmatprep.subr.mxu0 %v2108_v12  ;;  %2595 = vmatpush1.msra.mxu1 %v2181_v13  ;;  %v2141_v12 = vld [vmem:[#allocation12 + $0x970] sm:$0xff]  ;;  %v2206_v13 = vld [vmem:[#allocation12 + $0xb78] sm:$0xff] }
0x10ea   :  { %2534 = vmatpush1.msra.mxu0 %v2107_v14  ;;  %2596 = vmatprep.subr.mxu1 %v2180_v62  ;;  %v2140_v14 = vld [vmem:[#allocation12 + $0x968] sm:$0xff]  ;;  %v2205_v62 = vld [vmem:[#allocation12 + $0xb70] sm:$0xff] }
0x10eb   :  { %2535 = vmatprep.subr.mxu0 %v2106_v17  ;;  %2597 = vmatpush1.msra.mxu1 %v2179_v19  ;;  %v2139_v17 = vld [vmem:[#allocation12 + $0x960] sm:$0xff]  ;;  %v2204_v19 = vld [vmem:[#allocation12 + $0xb68] sm:$0xff] }
0x10ec   :  { %2536 = vmatpush1.msra.mxu0 %v2105_v21  ;;  %2598 = vmatprep.subr.mxu1 %v2178_v0  ;;  %v2138_v21 = vld [vmem:[#allocation12 + $0x958] sm:$0xff]  ;;  %v2203_v0 = vld [vmem:[#allocation12 + $0xb60] sm:$0xff] }
0x10ed   :  { %2537 = vmatprep.subr.mxu0 %v2104_v25  ;;  %2599 = vmatpush1.msra.mxu1 %v2177_v22  ;;  %v2137_v25 = vld [vmem:[#allocation12 + $0x950] sm:$0xff]  ;;  %v2202_v22 = vld [vmem:[#allocation12 + $0xb58] sm:$0xff] }
0x10ee   :  { %2538 = vmatpush1.msra.mxu0 %v2103_v33  ;;  %2600 = vmatprep.subr.mxu1 %v2176_v34  ;;  %v2136_v33 = vld [vmem:[#allocation12 + $0x948] sm:$0xff]  ;;  %v2201_v34 = vld [vmem:[#allocation12 + $0xb50] sm:$0xff] }
0x10ef   :  { %2539 = vmatprep.subr.mxu0 %v2102_v35  ;;  %2601 = vmatpush1.msra.mxu1 %v2175_v36  ;;  %v2135_v35 = vld [vmem:[#allocation12 + $0x940] sm:$0xff]  ;;  %v2200_v36 = vld [vmem:[#allocation12 + $0xb48] sm:$0xff] }
0x10f0   :  { %2540 = vmatpush1.msra.mxu0 %v2101_v37  ;;  %2602 = vmatprep.subr.mxu1 %v2174_v38  ;;  %v2134_v37 = vld [vmem:[#allocation12 + $0x938] sm:$0xff]  ;;  %v2199_v38 = vld [vmem:[#allocation12 + $0xb40] sm:$0xff] }
0x10f1   :  { %2541 = vmatprep.subr.mxu0 %v2100_v41  ;;  %2603 = vmatpush1.msra.mxu1 %v2173_v31  ;;  %v2133_v41 = vld [vmem:[#allocation12 + $0x930] sm:$0xff]  ;;  %v2198_v31 = vld [vmem:[#allocation12 + $0xb38] sm:$0xff] }
0x10f2   :  { %2542 = vmatpush1.msra.mxu0 %v2099_v23  ;;  %2604 = vmatprep.subr.mxu1 %v2172_v42  ;;  %v2132_v23 = vld [vmem:[#allocation12 + $0x928] sm:$0xff]  ;;  %v2197_v42 = vld [vmem:[#allocation12 + $0xb30] sm:$0xff] }
0x10f3   :  { %2543 = vmatprep.subr.mxu0 %v2098_v10  ;;  %2605 = vmatpush1.msra.mxu1 %v2171_v43  ;;  %v2131_v10 = vld [vmem:[#allocation12 + $0x920] sm:$0xff]  ;;  %v2196_v43 = vld [vmem:[#allocation12 + $0xb28] sm:$0xff] }
0x10f4   :  { %2544 = vmatpush1.msra.mxu0 %v2097_v18  ;;  %2606 = vmatprep.subr.mxu1 %v2170_v40  ;;  %v2130_v18 = vld [vmem:[#allocation12 + $0x918] sm:$0xff]  ;;  %v2195_v40 = vld [vmem:[#allocation12 + $0xb20] sm:$0xff] }
0x10f5   :  { %2545 = vmatprep.subr.mxu0 %v2096_v44  ;;  %2607 = vmatpush1.msra.mxu1 %v2169_v32  ;;  %v2129_v44 = vld [vmem:[#allocation12 + $0x910] sm:$0xff]  ;;  %v2194_v32 = vld [vmem:[#allocation12 + $0xb18] sm:$0xff] }
0x10f6   :  { %2546 = vmatpush1.msra.mxu0 %v2095_v45  ;;  %2608 = vmatprep.subr.mxu1 %v2168_v24  ;;  %v2128_v45 = vld [vmem:[#allocation12 + $0x908] sm:$0xff]  ;;  %v2193_v24 = vld [vmem:[#allocation12 + $0xb10] sm:$0xff] }
0x10f7   :  { %2547 = vmatprep.subr.mxu0 %v2158_v46  ;;  %2609 = vmatpush1.msra.mxu1 %v2167_v47  ;;  %v2127_v46 = vld [vmem:[#allocation12 + $0x900] sm:$0xff]  ;;  %v2192_v47 = vld [vmem:[#allocation12 + $0xb08] sm:$0xff] }
0x10f8   :  { %2548 = vmatpush2.msra.mxu0 %v2157_v2  ;;  %2610 = vmatprep.subr.mxu1 %v2166_v48  ;;  %v2191_v2 = vld [vmem:[#allocation12 + $0xb00] sm:$0xff] }
0x10f9   :  { %2549 = vmatprep.subr.mxu0 %v2156_v49  ;;  %2611 = vmatpush1.msra.mxu1 %v2165_v6  ;;  %v2690_v48 = vld [vmem:[#allocation15 + $0xf8] sm:$0xff] }
0x10fa   :  { %2550 = vmatpush2.msra.mxu0 %v2155_v5  ;;  %2612 = vmatprep.subr.mxu1 %v2164_v20 }
0x10fb   :  { %2551 = vmatprep.subr.mxu0 %v2154_v52  ;;  %2613 = vmatpush1.msra.mxu1 %v2163_v39  ;;  %v2689_v39 = vld [vmem:[#allocation15 + $0xf0] sm:$0xff] }
0x10fc   :  { %2552 = vmatpush2.msra.mxu0 %v2153_v1  ;;  %2614 = vmatprep.subr.mxu1 %v2162_v51  ;;  %v2688_v51 = vld [vmem:[#allocation15 + $0xe8] sm:$0xff] }
0x10fd   :  { %2553 = vmatprep.subr.mxu0 %v2152_v8  ;;  %2615 = vmatpush1.msra.mxu1 %v2161_v30  ;;  %v2687_v8 = vld [vmem:[#allocation15 + $0xe0] sm:$0xff] }
0x10fe   :  { %2554 = vmatpush2.msra.mxu0 %v2151_v53  ;;  %2616 = vmatprep.subr.mxu1 %v2160_v16  ;;  %v2686_v53 = vld [vmem:[#allocation15 + $0xd8] sm:$0xff] }
0x10ff   :  { %2555 = vmatprep.subr.mxu0 %v2150_v9  ;;  %2617 = vmatpush1.msra.mxu1 %v2159_v55  ;;  %v2685_v9 = vld [vmem:[#allocation15 + $0xd0] sm:$0xff] }
0x1100   :  { %2556 = vmatpush2.msra.mxu0 %v2149_v29  ;;  %2626 = vmatprep.subr.mxu1 %v2214_v56  ;;  %v2684_v29 = vld [vmem:[#allocation15 + $0xc8] sm:$0xff] }
0x1101   :  { %2557 = vmatprep.subr.mxu0 %v2148_v50  ;;  %2627 = vmatpush2.msra.mxu1 %v2213_v57  ;;  %v2682_v50 = vld [vmem:[#allocation15 + $0xb8] sm:$0xff]  ;;  %v2681_v57 = vld [vmem:[#allocation15 + $0xb0] sm:$0xff] }
0x1102   :  { %2558 = vmatpush2.msra.mxu0 %v2147_v11  ;;  %2628 = vmatprep.subr.mxu1 %v2212_v26  ;;  %v2680_v11 = vld [vmem:[#allocation15 + $0xa8] sm:$0xff]  ;;  %v2679_v26 = vld [vmem:[#allocation15 + $0xa0] sm:$0xff] }
0x1103   :  { %2559 = vmatprep.subr.mxu0 %v2146_v27  ;;  %2629 = vmatpush2.msra.mxu1 %v2211_v15  ;;  %v2678_v27 = vld [vmem:[#allocation15 + $0x98] sm:$0xff]  ;;  %v2677_v15 = vld [vmem:[#allocation15 + $0x90] sm:$0xff] }
0x1104   :  { %2560 = vmatpush2.msra.mxu0 %v2145_v61  ;;  %2630 = vmatprep.subr.mxu1 %v2210_v54  ;;  %v2676_v61 = vld [vmem:[#allocation15 + $0x88] sm:$0xff]  ;;  %v2675_v54 = vld [vmem:[#allocation15 + $0x80] sm:$0xff] }
0x1105   :  { %2561 = vmatprep.subr.mxu0 %v2144_v63  ;;  %2631 = vmatpush2.msra.mxu1 %v2209_v58  ;;  %v2674_v63 = vld [vmem:[#allocation15 + $0x78] sm:$0xff]  ;;  %v2673_v58 = vld [vmem:[#allocation15 + $0x70] sm:$0xff] }
0x1106   :  { %2562 = vmatpush2.msra.mxu0 %v2143_v3  ;;  %2632 = vmatprep.subr.mxu1 %v2208_v59  ;;  %v2672_v3 = vld [vmem:[#allocation15 + $0x68] sm:$0xff]  ;;  %v2671_v59 = vld [vmem:[#allocation15 + $0x60] sm:$0xff] }
0x1107   :  { %2563 = vmatprep.subr.mxu0 %v2142_v4  ;;  %2633 = vmatpush2.msra.mxu1 %v2207_v7  ;;  %v2670_v4 = vld [vmem:[#allocation15 + $0x58] sm:$0xff]  ;;  %v2669_v7 = vld [vmem:[#allocation15 + $0x50] sm:$0xff] }
0x1108   :  { %2564 = vmatpush2.msra.mxu0 %v2141_v12  ;;  %2634 = vmatprep.subr.mxu1 %v2206_v13  ;;  %v2668_v12 = vld [vmem:[#allocation15 + $0x48] sm:$0xff]  ;;  %v2667_v13 = vld [vmem:[#allocation15 + $0x40] sm:$0xff] }
0x1109   :  { %2565 = vmatprep.subr.mxu0 %v2140_v14  ;;  %2635 = vmatpush2.msra.mxu1 %v2205_v62  ;;  %v2666_v14 = vld [vmem:[#allocation15 + $0x38] sm:$0xff]  ;;  %v2665_v62 = vld [vmem:[#allocation15 + $0x30] sm:$0xff] }
0x110a   :  { %2566 = vmatpush2.msra.mxu0 %v2139_v17  ;;  %2636 = vmatprep.subr.mxu1 %v2204_v19  ;;  %v2664_v17 = vld [vmem:[#allocation15 + $0x28] sm:$0xff]  ;;  %v2663_v19 = vld [vmem:[#allocation15 + $0x20] sm:$0xff] }
0x110b   :  { %2567 = vmatprep.subr.mxu0 %v2138_v21  ;;  %2637 = vmatpush2.msra.mxu1 %v2203_v0  ;;  %v2662_v21 = vld [vmem:[#allocation15 + $0x18] sm:$0xff]  ;;  %v2661_v0 = vld [vmem:[#allocation15 + $0x10] sm:$0xff] }
0x110c   :  { %2568 = vmatpush2.msra.mxu0 %v2137_v25  ;;  %2638 = vmatprep.subr.mxu1 %v2202_v22  ;;  %v2660_v25 = vld [vmem:[#allocation15 + $0x8] sm:$0xff]  ;;  %v2659_v22 = vld [vmem:[#allocation15] sm:$0xff] }
0x110d   :  { %2569 = vmatprep.subr.mxu0 %v2136_v33  ;;  %2639 = vmatpush2.msra.mxu1 %v2201_v34  ;;  %v2722_v33 = vld [vmem:[#allocation15 + $0x1f8] sm:$0xff]  ;;  %v2721_v34 = vld [vmem:[#allocation15 + $0x1f0] sm:$0xff] }
0x110e   :  { %2570 = vmatpush2.msra.mxu0 %v2135_v35  ;;  %2640 = vmatprep.subr.mxu1 %v2200_v36  ;;  %v2720_v35 = vld [vmem:[#allocation15 + $0x1e8] sm:$0xff]  ;;  %v2719_v36 = vld [vmem:[#allocation15 + $0x1e0] sm:$0xff] }
0x110f   :  { %2571 = vmatprep.subr.mxu0 %v2134_v37  ;;  %2641 = vmatpush2.msra.mxu1 %v2199_v38  ;;  %v2718_v37 = vld [vmem:[#allocation15 + $0x1d8] sm:$0xff]  ;;  %v2717_v38 = vld [vmem:[#allocation15 + $0x1d0] sm:$0xff] }
0x1110   :  { %2572 = vmatpush2.msra.mxu0 %v2133_v41  ;;  %2642 = vmatprep.subr.mxu1 %v2198_v31  ;;  %v2716_v41 = vld [vmem:[#allocation15 + $0x1c8] sm:$0xff]  ;;  %v2715_v31 = vld [vmem:[#allocation15 + $0x1c0] sm:$0xff] }
0x1111   :  { %2573 = vmatprep.subr.mxu0 %v2132_v23  ;;  %2643 = vmatpush2.msra.mxu1 %v2197_v42  ;;  %v2714_v23 = vld [vmem:[#allocation15 + $0x1b8] sm:$0xff]  ;;  %v2713_v42 = vld [vmem:[#allocation15 + $0x1b0] sm:$0xff] }
0x1112   :  { %2574 = vmatpush2.msra.mxu0 %v2131_v10  ;;  %2644 = vmatprep.subr.mxu1 %v2196_v43  ;;  %v2712_v10 = vld [vmem:[#allocation15 + $0x1a8] sm:$0xff]  ;;  %v2711_v43 = vld [vmem:[#allocation15 + $0x1a0] sm:$0xff] }
0x1113   :  { %2575 = vmatprep.subr.mxu0 %v2130_v18  ;;  %2645 = vmatpush2.msra.mxu1 %v2195_v40  ;;  %v2710_v18 = vld [vmem:[#allocation15 + $0x198] sm:$0xff]  ;;  %v2709_v40 = vld [vmem:[#allocation15 + $0x190] sm:$0xff] }
0x1114   :  { %2576 = vmatpush2.msra.mxu0 %v2129_v44  ;;  %2646 = vmatprep.subr.mxu1 %v2194_v32  ;;  %v2708_v44 = vld [vmem:[#allocation15 + $0x188] sm:$0xff]  ;;  %v2707_v32 = vld [vmem:[#allocation15 + $0x180] sm:$0xff] }
0x1115   :  { %2577 = vmatprep.subr.mxu0 %v2128_v45  ;;  %2647 = vmatpush2.msra.mxu1 %v2193_v24  ;;  %v2706_v45 = vld [vmem:[#allocation15 + $0x178] sm:$0xff]  ;;  %v2705_v24 = vld [vmem:[#allocation15 + $0x170] sm:$0xff] }
0x1116   :  { %2578 = vmatpush2.msra.mxu0 %v2127_v46  ;;  %2648 = vmatprep.subr.mxu1 %v2192_v47  ;;  %v2704_v46 = vld [vmem:[#allocation15 + $0x168] sm:$0xff]  ;;  %v2703_v47 = vld [vmem:[#allocation15 + $0x160] sm:$0xff] }
0x1117   :  { %2649 = vmatpush2.msra.mxu1 %v2191_v2  ;;  %2735 = vmatprep.subr.mxu0 %v2690_v48  ;;  %v2702_v2 = vld [vmem:[#allocation15 + $0x158] sm:$0xff]  ;;  %v2701_v48 = vld [vmem:[#allocation15 + $0x150] sm:$0xff] }
0x1126   :  { %v1796_v49 = vpop.permute.xlu0 %1795 }
0x1128   :  { %v1800_v6 = vpop.permute.xlu1 %1799 }
0x1129   :  { %v1834_v5 = vsel %vm1833_vm5, %v1796_v49, %v1800_v6 }
0x112a   :  { %2579 = vmatprep.mubr.f32.mxu0 %v1834_v5  ;;  %v2698_v5 = vld [vmem:[#allocation15 + $0x138] sm:$0xff] }
0x112b   :  { %v1804_v30 = vpop.permute.xlu0 %1803 }
0x112c   :  { %v1836_v56 = vsel %vm1835_vm9, %v1800_v6, %v1804_v30  ;;  %v2699_v6 = vld [vmem:[#allocation15 + $0x140] sm:$0xff] }
0x112d   :  { %v1792_v20 = vpop.permute.xlu1 %1791 }
0x112e   :  { %v1830_v52 = vsel %vm1829_vm6, %v4462_v60, %v1792_v20  ;;  %v2683_v60 = vld [vmem:[#allocation15 + $0xc0] sm:$0xff]  ;;  %v2697_v20 = vld [vmem:[#allocation15 + $0x130] sm:$0xff] }
0x112f   :  { %v1832_v1 = vsel %vm1831_vm7, %v1830_v52, %v1796_v49  ;;  %v2700_v49 = vld [vmem:[#allocation15 + $0x148] sm:$0xff] }
0x1130   :  { %2580 = vmatmul.mubr.f32.vlgmr.msra.gmra.mxu0 %v1832_v1  ;;  %v2696_v52 = vld [vmem:[#allocation15 + $0x128] sm:$0xff]  ;;  %v2694_v1 = vld [vmem:[#allocation15 + $0x118] sm:$0xff] }
0x1131   :  { %2736 = vmatpush1.msra.mxu0 %v2689_v39  ;;  %v2695_v39 = vld [vmem:[#allocation15 + $0x120] sm:$0xff] }
0x1132   :  { %v1808_v16 = vpop.permute.xlu1 %1807  ;;  %2737 = vmatprep.subr.mxu0 %v2688_v51  ;;  %v2693_v51 = vld [vmem:[#allocation15 + $0x110] sm:$0xff] }
0x1133   :  { %v1838_v55 = vsel %vm1837_vm8, %v1804_v30, %v1808_v16  ;;  %2738 = vmatpush1.msra.mxu0 %v2687_v8  ;;  %v2692_v8 = vld [vmem:[#allocation15 + $0x108] sm:$0xff]  ;;  %v2691_v30 = vld [vmem:[#allocation15 + $0x100] sm:$0xff]  ;;  %v3798_v16 = vmov 0.0  }
0x1134   :  { %3067 = vmatprep.mubr.msk.f32.mxu1 %vm2227_vm10, %v1838_v55  ;;  %2739 = vmatprep.subr.mxu0 %v2686_v53  ;;  %v2823_v53 = vld [vmem:[%s4646_s21 + $0x78] sm:$0xff]  ;;  %v2821_v55 = vld [vmem:[%s4646_s21 + $0x68] sm:$0xff] }
0x1135   :  { %2651 = vmatmul.mubr.f32.vlgmr.msra.gmra.mxu1 %v1836_v56  ;;  %2740 = vmatpush1.msra.mxu0 %v2685_v9  ;;  %v2822_v9 = vld [vmem:[%s4646_s21 + $0x70] sm:$0xff]  ;;  %v2819_v56 = vld [vmem:[%s4646_s21 + $0x58] sm:$0xff] }
0x1136   :  { %2741 = vmatprep.subr.mxu0 %v2684_v29  ;;  %3342 = vmatprep.subr.mxu1 %v3798_v16  ;;  %v2820_v29 = vld [vmem:[%s4646_s21 + $0x60] sm:$0xff] }
0x1137   :  { %2742 = vmatpush1.msra.mxu0 %v2683_v60  ;;  %3343 = vmatpush3.msra.mxu1 %v2823_v53  ;;  %v2818_v60 = vld [vmem:[%s4646_s21 + $0x50] sm:$0xff] }
0x1138   :  { %2743 = vmatprep.subr.mxu0 %v2682_v50  ;;  %3344 = vmatprep.subr.mxu1 %v3798_v16  ;;  %v2817_v50 = vld [vmem:[%s4646_s21 + $0x48] sm:$0xff] }
0x1139   :  { %2744 = vmatpush1.msra.mxu0 %v2681_v57  ;;  %3345 = vmatpush3.msra.mxu1 %v2822_v9  ;;  %v2816_v57 = vld [vmem:[%s4646_s21 + $0x40] sm:$0xff]  ;;  %v2908_v9 = vld [vmem:[%s4648_s23 + $0x38] sm:$0xff] }
0x113a   :  { %2745 = vmatprep.subr.mxu0 %v2680_v11  ;;  %3346 = vmatprep.subr.mxu1 %v3798_v16  ;;  %v4514_v11 = vshrl.u32 %v808_v28, 7 }
0x113b   :  { %2746 = vmatpush1.msra.mxu0 %v2679_v26  ;;  %3347 = vmatpush3.msra.mxu1 %v2821_v55  ;;  %v2907_v55 = vld [vmem:[%s4648_s23 + $0x30] sm:$0xff] }
0x113c   :  { %2747 = vmatprep.subr.mxu0 %v2678_v27  ;;  %3348 = vmatprep.subr.mxu1 %v3798_v16  ;;  %v2219_v27 = vsub.s32 0, %v4514_v11 }
0x113d   :  { %2748 = vmatpush1.msra.mxu0 %v2677_v15  ;;  %3349 = vmatpush3.msra.mxu1 %v2820_v29  ;;  %v2215_v15 = vld [vmem:[#allocation13] sm:$0x3]  ;;  %v2906_v29 = vld [vmem:[%s4648_s23 + $0x28] sm:$0xff] }
0x113e   :  { %2749 = vmatprep.subr.mxu0 %v2676_v61  ;;  %3350 = vmatprep.subr.mxu1 %v3798_v16  ;;  %v2223_v61 = vsub.s32 1, %v4514_v11  ;;  %v2901_v11 = vld [vmem:[%s4648_s23] sm:$0xff] }
0x113f   :  { %2750 = vmatpush1.msra.mxu0 %v2675_v54  ;;  %3351 = vmatpush3.msra.mxu1 %v2819_v56  ;;  %v2905_v56 = vld [vmem:[%s4648_s23 + $0x20] sm:$0xff] }
0x1140   :  { %2751 = vmatprep.subr.mxu0 %v2674_v63  ;;  %3352 = vmatprep.subr.mxu1 %v3798_v16 }
0x1141   :  { %2752 = vmatpush1.msra.mxu0 %v2673_v58  ;;  %3353 = vmatpush3.msra.mxu1 %v2818_v60  ;;  %v2220_v58 = vrot.slane %v2215_v15, %v2219_v27  ;;  %v2904_v60 = vld [vmem:[%s4648_s23 + $0x18] sm:$0xff] }
0x1142   :  { %2753 = vmatprep.subr.mxu0 %v2672_v3  ;;  %3354 = vmatprep.subr.mxu1 %v3798_v16  ;;  %v2224_v3 = vrot.slane %v2215_v15, %v2223_v61 }
0x1143   :  { %2754 = vmatpush1.msra.mxu0 %v2671_v59  ;;  %3355 = vmatpush3.msra.mxu1 %v2817_v50  ;;  %v2903_v50 = vld [vmem:[%s4648_s23 + $0x10] sm:$0xff] }
0x1144   :  { %2755 = vmatprep.subr.mxu0 %v2670_v4  ;;  %3356 = vmatprep.subr.mxu1 %v3798_v16 }
0x1145   :  { %2756 = vmatpush1.msra.mxu0 %v2669_v7  ;;  %3357 = vmatpush3.msra.mxu1 %v2816_v57  ;;  %v2902_v57 = vld [vmem:[%s4648_s23 + $0x8] sm:$0xff] }
0x1146   :  { %2757 = vmatprep.subr.mxu0 %v2668_v12  ;;  %3358 = vmatprep.subr.mxu1 %v3798_v16 }
0x1147   :  { %2758 = vmatpush1.msra.mxu0 %v2667_v13  ;;  %3374 = vmatprep.mubr.msk.f32.mxu1 %vm3799_vm11, %v3798_v16 }
0x1148   :  { %2759 = vmatprep.subr.mxu0 %v2666_v14 }
0x1149   :  { %2760 = vmatpush1.msra.mxu0 %v2665_v62 }
0x114a   :  { %2761 = vmatprep.subr.mxu0 %v2664_v17 }
0x114b   :  { %2762 = vmatpush1.msra.mxu0 %v2663_v19 }
0x114c   :  { %2763 = vmatprep.subr.mxu0 %v2662_v21 }
0x114d   :  { %2764 = vmatpush1.msra.mxu0 %v2661_v0 }
0x114e   :  { %2765 = vmatprep.subr.mxu0 %v2660_v25 }
0x114f   :  { %2766 = vmatpush1.msra.mxu0 %v2659_v22 }
0x1150   :  { %2767 = vmatprep.subr.mxu0 %v2722_v33 }
0x1151   :  { %2768 = vmatpush2.msra.mxu0 %v2721_v34 }
0x1152   :  { %2769 = vmatprep.subr.mxu0 %v2720_v35 }
0x1153   :  { %2770 = vmatpush2.msra.mxu0 %v2719_v36  ;;  %v2297_v26 = vpop.f32.mrf.mxu0 }
0x1154   :  { %2771 = vmatprep.subr.mxu0 %v2718_v37  ;;  %v2298_v7 = vadd.f32 %v2297_v26, %v2220_v58 }
0x1155   :  { %2772 = vmatpush2.msra.mxu0 %v2717_v38  ;;  %v2299_v63 = vpop.f32.mrf.mxu0 }
0x1156   :  { %2773 = vmatprep.subr.mxu0 %v2716_v41  ;;  %v2300_v13 = vadd.f32 %v2299_v63, %v2224_v3 }
0x1157   :  { %2774 = vmatpush2.msra.mxu0 %v2715_v31 }
0x1158   :  { %2775 = vmatprep.subr.mxu0 %v2714_v23 }
0x1159   :  { %2776 = vmatpush2.msra.mxu0 %v2713_v42  ;;  %v2815_v42 = vld [vmem:[%s4646_s21 + $0x38] sm:$0xff] }
0x115a   :  { %2777 = vmatprep.subr.mxu0 %v2712_v10  ;;  %3359 = vmatpush3.msra.mxu1 %v2815_v42  ;;  %v2814_v10 = vld [vmem:[%s4646_s21 + $0x30] sm:$0xff] }
0x115b   :  { %2778 = vmatpush2.msra.mxu0 %v2711_v43  ;;  %v2368_v54 = vpop.f32.mrf.mxu1  ;;  %3360 = vmatprep.subr.mxu1 %v3798_v16  ;;  %v2813_v43 = vld [vmem:[%s4646_s21 + $0x28] sm:$0xff] }
0x115c   :  { %2779 = vmatprep.subr.mxu0 %v2710_v18  ;;  %v2369_v28 = vadd.f32 %v2368_v54, %v2298_v7  ;;  %3361 = vmatpush3.msra.mxu1 %v2814_v10  ;;  %v2812_v18 = vld [vmem:[%s4646_s21 + $0x20] sm:$0xff]  ;;  %v3068_v7 = vld [vmem:[#allocation18] ss:$0 sm:$0xff] }
0x115d   :  { %2780 = vmatpush2.msra.mxu0 %v2709_v40  ;;  %v2370_v4 = vpop.f32.mrf.mxu1  ;;  %3362 = vmatprep.subr.mxu1 %v3798_v16  ;;  %v2811_v40 = vld [vmem:[%s4646_s21 + $0x18] sm:$0xff] }
0x115e   :  { %2781 = vmatprep.subr.mxu0 %v2708_v44  ;;  %v2371_v62 = vadd.f32 %v2370_v4, %v2300_v13  ;;  %3363 = vmatpush3.msra.mxu1 %v2813_v43  ;;  %v2810_v44 = vld [vmem:[%s4646_s21 + $0x10] sm:$0xff] }
0x115f   :  { %2782 = vmatpush2.msra.mxu0 %v2707_v32  ;;  %3364 = vmatprep.subr.mxu1 %v3798_v16  ;;  %v2809_v32 = vld [vmem:[%s4646_s21 + $0x8] sm:$0xff] }
0x1160   :  { %2783 = vmatprep.subr.mxu0 %v2706_v45  ;;  %3365 = vmatpush3.msra.mxu1 %v2812_v18  ;;  %v2808_v45 = vld [vmem:[%s4646_s21] sm:$0xff] }
0x1161   :  { %2784 = vmatpush2.msra.mxu0 %v2705_v24  ;;  %3366 = vmatprep.subr.mxu1 %v3798_v16  ;;  %v2723_v24 = vld [vmem:[#allocation16] sm:$0x3] }
0x1162   :  { %2785 = vmatprep.subr.mxu0 %v2704_v46  ;;  %3367 = vmatpush3.msra.mxu1 %v2811_v40  ;;  %v2728_v46 = vrot.slane %v2723_v24, %v2219_v27 }
0x1163   :  { %2786 = vmatpush2.msra.mxu0 %v2703_v47  ;;  %3368 = vmatprep.subr.mxu1 %v3798_v16 }
0x1164   :  { %2787 = vmatprep.subr.mxu0 %v2702_v2  ;;  %3369 = vmatpush3.msra.mxu1 %v2810_v44 }
0x1165   :  { %2788 = vmatpush2.msra.mxu0 %v2701_v48  ;;  %3370 = vmatprep.subr.mxu1 %v3798_v16  ;;  %v2916_v48 = vld [vmem:[%s4648_s23 + $0x78] sm:$0xff] }
0x1166   :  { %2789 = vmatprep.subr.mxu0 %v2700_v49  ;;  %3371 = vmatpush3.msra.mxu1 %v2809_v32 }
0x1167   :  { %2790 = vmatpush2.msra.mxu0 %v2699_v6  ;;  %3372 = vmatprep.subr.mxu1 %v3798_v16  ;;  %v2915_v6 = vld [vmem:[%s4648_s23 + $0x70] sm:$0xff] }
0x1168   :  { %2791 = vmatprep.subr.mxu0 %v2698_v5  ;;  %3373 = vmatpush3.msra.mxu1 %v2808_v45  ;;  %v2914_v5 = vld [vmem:[%s4648_s23 + $0x68] sm:$0xff] }
0x1169   :  { %2792 = vmatpush2.msra.mxu0 %v2697_v20  ;;  %3377 = vmatprep.subr.mxu1 %v3798_v16  ;;  %v2913_v20 = vld [vmem:[%s4648_s23 + $0x60] sm:$0xff] }
0x116a   :  { %2793 = vmatprep.subr.mxu0 %v2696_v52  ;;  %v2912_v52 = vld [vmem:[%s4648_s23 + $0x58] sm:$0xff] }
0x116b   :  { %2794 = vmatpush2.msra.mxu0 %v2695_v39  ;;  %v2911_v39 = vld [vmem:[%s4648_s23 + $0x50] sm:$0xff] }
0x116c   :  { %2795 = vmatprep.subr.mxu0 %v2694_v1  ;;  %v2732_v1 = vrot.slane %v2723_v24, %v2223_v61  ;;  %v3069_v61 = vld [vmem:[#allocation19] ss:$0 sm:$0xff] }
0x116d   :  { %2796 = vmatpush2.msra.mxu0 %v2693_v51  ;;  %v2910_v51 = vld [vmem:[%s4648_s23 + $0x48] sm:$0xff] }
0x116e   :  { %2797 = vmatprep.subr.mxu0 %v2692_v8 }
0x116f   :  { %2798 = vmatpush2.msra.mxu0 %v2691_v30  ;;  %v2909_v30 = vld [vmem:[%s4648_s23 + $0x40] sm:$0xff] }
0x1196   :  { %v2439_v59 = vpop.f32.mrf.mxu0 }
0x1197   :  { %v2440_v19 = vadd.f32 %v2439_v59, %v2369_v28 }
0x1198   :  { %v2441_v14 = vpop.f32.mrf.mxu0 }
0x1199   :  { %v2442_v0 = vadd.f32 %v2441_v14, %v2371_v62 }
0x119f   :  { %v2510_v12 = vpop.f32.mrf.mxu1 }
0x11a0   :  { %v2511_v25 = vadd.f32 %v2510_v12, %v2440_v19 }
0x11a1   :  { %v2512_v21 = vpop.f32.mrf.mxu1 }
0x11a2   :  { %v2513_v33 = vadd.f32 %v2512_v21, %v2442_v0 }
0x11f0   :  { %v2581_v17 = vpop.f32.mrf.mxu0 }
0x11f1   :  { %v2582_v34 = vadd.f32 %v2581_v17, %v2511_v25 }
0x11f2   :  { %v2583_v22 = vpop.f32.mrf.mxu0 }
0x11f3   :  { %v2584_v36 = vadd.f32 %v2583_v22, %v2513_v33 }
0x11f5   :  { %v2652_v35 = vpop.f32.mrf.mxu1 }
0x11f6   :  { %v2653_v37 = vadd.f32 %v2652_v35, %v2582_v34 }
0x11f7   :  { %v2654_v38 = vpop.f32.mrf.mxu1 }
0x11f8   :  { %v2655_v41 = vadd.f32 %v2654_v38, %v2584_v36 }
0x11fa   :  { %3501 = vtanh.f32 %v2655_v41 }
0x11fb   :  { %3503 = vtanh.f32 %v2653_v37 }
0x1207   :  { %v3502_v31 = vpop.eup %3501 }
0x1208   :  { %v3504_v23 = vpop.eup %3503  ;;  %2799 = vmatprep.mubr.f32.mxu0 %v3502_v31 }
0x1209   :  { %2800 = vmatmul.mubr.f32.vlgmr.msra.gmra.mxu0 %v3504_v23 }
0x12c9   :  { %v2801_v47 = vpop.f32.mrf.mxu0 }
0x12ca   :  { %v2802_v2 = vadd.f32 %v2801_v47, %v2728_v46 }
0x12cb   :  { %v2803_v8 = vpop.f32.mrf.mxu0 }
0x12cc   :  { %3505 = vtanh.f32 %v2802_v2  ;;  %v2804_v53 = vadd.f32 %v2803_v8, %v2732_v1 }
0x12ce   :  { %3507 = vtanh.f32 %v2804_v53 }
0x12d9   :  { %v3506_v49 = vpop.eup %3505 }
0x12da   :  { %3375 = vmatmul.mubr.f32.vlgmr.msra.gmra.mxu1 %v3506_v49 }
0x12db   :  { %3378 = vmatpush3.msra.mxu1 %v2916_v48  ;;  %3409 = vmatprep.mubr.msk.f32.mxu1 %vm3799_vm11, %v3798_v16  ;;  %v3508_v26 = vpop.eup %3507 }
0x12dc   :  { %3379 = vmatprep.subr.mxu1 %v3798_v16 }
0x12dd   :  { %3380 = vmatpush3.msra.mxu1 %v2915_v6 }
0x12de   :  { %3381 = vmatprep.subr.mxu1 %v3798_v16 }
0x12df   :  { %3382 = vmatpush3.msra.mxu1 %v2914_v5 }
0x12e0   :  { %3383 = vmatprep.subr.mxu1 %v3798_v16 }
0x12e1   :  { %3384 = vmatpush3.msra.mxu1 %v2913_v20 }
0x12e2   :  { %3385 = vmatprep.subr.mxu1 %v3798_v16 }
0x12e3   :  { %3386 = vmatpush3.msra.mxu1 %v2912_v52 }
0x12e4   :  { %3387 = vmatprep.subr.mxu1 %v3798_v16 }
0x12e5   :  { %3388 = vmatpush3.msra.mxu1 %v2911_v39 }
0x12e6   :  { %3389 = vmatprep.subr.mxu1 %v3798_v16 }
0x12e7   :  { %3390 = vmatpush3.msra.mxu1 %v2910_v51 }
0x12e8   :  { %3391 = vmatprep.subr.mxu1 %v3798_v16 }
0x12e9   :  { %3392 = vmatpush3.msra.mxu1 %v2909_v30 }
0x12ea   :  { %3393 = vmatprep.subr.mxu1 %v3798_v16 }
0x12eb   :  { %3394 = vmatpush3.msra.mxu1 %v2908_v9 }
0x12ec   :  { %3395 = vmatprep.subr.mxu1 %v3798_v16 }
0x12ed   :  { %3396 = vmatpush3.msra.mxu1 %v2907_v55 }
0x12ee   :  { %3397 = vmatprep.subr.mxu1 %v3798_v16 }
0x12ef   :  { %3398 = vmatpush3.msra.mxu1 %v2906_v29 }
0x12f0   :  { %3399 = vmatprep.subr.mxu1 %v3798_v16 }
0x12f1   :  { %3400 = vmatpush3.msra.mxu1 %v2905_v56 }
0x12f2   :  { %3401 = vmatprep.subr.mxu1 %v3798_v16 }
0x12f3   :  { %3402 = vmatpush3.msra.mxu1 %v2904_v60 }
0x12f4   :  { %3403 = vmatprep.subr.mxu1 %v3798_v16 }
0x12f5   :  { %3404 = vmatpush3.msra.mxu1 %v2903_v50 }
0x12f6   :  { %3405 = vmatprep.subr.mxu1 %v3798_v16 }
0x12f7   :  { %3406 = vmatpush3.msra.mxu1 %v2902_v57 }
0x12f8   :  { %3407 = vmatprep.subr.mxu1 %v3798_v16 }
0x12f9   :  { %3408 = vmatpush3.msra.mxu1 %v2901_v11 }
0x12fa   :  { %3410 = vmatmul.mubr.f32.vlgmr.msra.gmra.mxu1 %v3508_v26 }
0x139a   :  { %v2897_v27 = vpop.f32.mrf.mxu1 }
0x139b   :  { %v2898_v12 = vadd.f32 %v3068_v7, %v2897_v27 }
0x139c   :  { %v3376_v15 = vpop.f32.mrf.mxu1 }
0x13ba   :  { %v2990_v54 = vpop.f32.mrf.mxu1 }
0x13bb   :  { %v2991_v63 = vadd.f32 %v3069_v61, %v2990_v54 }
0x13bc   :  { %v3411_v58 = vpop.f32.mrf.mxu1 }
0x13bd   :  { %v2994_v3 = vmul.f32 1.442695, %v2991_v63 }
0x13bf   :  { %3509 = vpow2.f32 %v2994_v3 }
0x13cc   :  { %v3510_v59 = vpop.eup %3509 }
0x13cd   :  { %v2996_v4 = vadd.f32 0.001, %v3510_v59 }
0x13cf   :  { %2998 = vrot.lane.b32.xlu0 %v2996_v4, %s3768_s26 }
0x1441   :  { %v2999_v16 = vpop.permute.xlu0 %2998 }
0x1442   :  { %v3002_v13 = vsel %vm3001_vm12, %v2898_v12, %v2999_v16 }
0x1443   :  { %3004 = vst.msk [vmem:[%s4650_s25] sm:$0x3] %vm3003_vm13, %v3002_v13 }
0x1444   :  { %3009 = vsyncpa [#allocation3], 1 }
0x1445   :  { %3010 = vsyncpa [#allocation5], 1 }
0x1446   :  { %3011 = vsyncpa [#allocation8], 1 }
0x1447   :  { %3012 = vsyncpa [#allocation11], 1 }
0x1448   :  { %3013 = vsyncpa [#allocation14], 1 }
0x1449   :  { %3014 = vsyncpa [#allocation17], 1 }
0x144a   :  { %3015 = vsyncpa [#allocation20], 1 }

</bundles_post_ra>
